<compile_context>
chip_gen: v7x
topology: tpu7x:2x2x1
jax: 0.10.0
libtpu: 0.0.40
codegen_flags: <defaults>
</compile_context>

<pallas_src>
import functools

import jax
import jax.numpy as jnp
from jax.experimental import pallas as pl
from jax.experimental.pallas import tpu as pltpu

BN_EPS = 1e-5


def _round_up8(n):
    return -(-n // 8) * 8


# ----------------------------------------------------------------------------
# Fused forward kernel
# ----------------------------------------------------------------------------
def _decban_kernel(x_ref, w1_ref, w2_ref, w3_ref, attw_ref, linw_ref, attb_ref,
                   out_ref, *, B, L):
    """Layouts:
      x_ref   : (Cp, B*L)  channel-padded input, sample b in lanes [b*L,(b+1)*L)
      w{1,2,3}: (96, 5*Cin+1) stage slabs; rows [32*br, 32*(br+1)) hold branch
                br's im2col weight (BN folded), bias in the last used column.
      attw_ref: (96, 1)  attention head s weight in rows [32*s, 32*(s+1)).
      linw_ref: (97, 2)  final Linear W^T with the bias as the last row.
      attb_ref: (3,)     attention biases (SMEM scalars).
    """
    f32 = jnp.float32

    def conv_relu(xp, Lin, K, w_slab, row0):
        """Batch-lane-packed valid Conv1d (+ folded BN bias) + ReLU.

        xp: (Cin, B*Lin) packed; returns ((32, B*Lout), Lout) packed.
        One MXU matmul per conv for the whole batch; bias comes from an
        appended ones-row matched with the bias column of the weight slab.
        """
        Cin = xp.shape[0]
        Lout = Lin - K + 1
        cols = []
        for b in range(B):
            base = b * Lin
            taps = [xp[:, base + k: base + k + Lout] for k in range(K)]
            cols.append(jnp.concatenate(taps, axis=0))            # (K*Cin, Lout)
        xcol = jnp.concatenate(cols, axis=1)                      # (K*Cin, B*Lout)
        xcol = jnp.concatenate([xcol, jnp.ones((1, B * Lout), f32)], axis=0)
        w_aug = w_slab[row0:row0 + 32, 0:K * Cin + 1]             # (32, K*Cin+1)
        y = jnp.dot(w_aug, xcol, preferred_element_type=f32)
        return jnp.maximum(y, 0.0), Lout

    def pooled(y, Lout, b):
        """Global max over sample b's lane segment: (32, B*Lout) -> (32, 1)."""
        return jnp.max(y[:, b * Lout:(b + 1) * Lout], axis=1, keepdims=True)

    def attention(M, s):
        """torch Attention over the 3 pooled branch vectors. M: (32, 3) -> (32, 1)."""
        aw = attw_ref[s * 32:(s + 1) * 32, 0:1]                               # (32, 1)
        sc = jnp.tanh(jnp.sum(aw * M, axis=0, keepdims=True) + attb_ref[s])   # (1, 3)
        mx = jnp.max(sc, axis=1, keepdims=True)
        e = jnp.exp(sc - mx)
        p = e * pl.reciprocal(jnp.sum(e, axis=1, keepdims=True), approx=True)
        return jnp.sum(M * p, axis=1, keepdims=True)                          # (32, 1)

    xp0 = x_ref[...]                                              # (Cp, B*L)

    # ---- 9 convs, each a single batch-fused MXU matmul; all stay on-chip ----
    y11, L11 = conv_relu(xp0, L, 3, w1_ref, 0)
    y21, L21 = conv_relu(xp0, L, 4, w1_ref, 32)
    y31, L31 = conv_relu(xp0, L, 5, w1_ref, 64)

    y12, L12 = conv_relu(y11, L11, 3, w2_ref, 0)
    y22, L22 = conv_relu(y21, L21, 4, w2_ref, 32)
    y32, L32 = conv_relu(y31, L31, 5, w2_ref, 64)

    y13, L13 = conv_relu(y12, L12, 3, w3_ref, 0)
    y23, L23 = conv_relu(y22, L22, 4, w3_ref, 32)
    y33, L33 = conv_relu(y32, L32, 5, w3_ref, 64)

    # ---- pools + attention + final Linear (tiny; B is static & unrolled) ----
    linw = linw_ref[...]                                          # (97, 2)
    rows = []
    for b in range(B):
        M1 = jnp.concatenate([pooled(y11, L11, b), pooled(y21, L21, b),
                              pooled(y31, L31, b)], axis=1)       # (32, 3)
        M2 = jnp.concatenate([pooled(y12, L12, b), pooled(y22, L22, b),
                              pooled(y32, L32, b)], axis=1)
        M3 = jnp.concatenate([pooled(y13, L13, b), pooled(y23, L23, b),
                              pooled(y33, L33, b)], axis=1)
        o1 = attention(M1, 0)
        o2 = attention(M2, 1)
        o3 = attention(M3, 2)
        feat = jnp.concatenate([o1, o2, o3, jnp.ones((1, 1), f32)], axis=0)  # (97, 1)
        rows.append(jnp.sum(linw * feat, axis=0, keepdims=True))             # (1, 2)
    out_ref[...] = jnp.concatenate(rows, axis=0)                  # single store


def decban_forward(x, packed):
    """x: (B, C, L) float32; packed: tuple from prepare_params(). Returns (B, 2)."""
    w_s1, w_s2, w_s3, att_w, lin_w_aug, att_b = packed
    B, C, L = x.shape
    Cp = _round_up8(C)
    # Channel-pad to a sublane-aligned count and lane-pack the batch:
    #   x_packed[c, b*L + l] = x[b, c, l]   (padded channels are zero)
    xp = jnp.pad(x, ((0, 0), (0, Cp - C), (0, 0)))
    x_packed = jnp.transpose(xp, (1, 0, 2)).reshape(Cp, B * L)

    kernel = functools.partial(_decban_kernel, B=B, L=L)
    return pl.pallas_call(
        kernel,
        out_shape=jax.ShapeDtypeStruct((B, 2), jnp.float32),
        in_specs=[pl.BlockSpec(memory_space=pltpu.MemorySpace.VMEM)] * 6
                 + [pl.BlockSpec(memory_space=pltpu.MemorySpace.SMEM)],
        out_specs=pl.BlockSpec(memory_space=pltpu.MemorySpace.VMEM),
    )(x_packed, w_s1, w_s2, w_s3, att_w, lin_w_aug, att_b)


# ----------------------------------------------------------------------------
# Parameters (deterministic, synthetic) + host-side packing (BN fold, slabs)
# ----------------------------------------------------------------------------
def init_params(key, input_size):
    keys = iter(jax.random.split(key, 80))

    def conv_params(cin, cout, k):
        w = jax.random.normal(next(keys), (cout, cin, k), jnp.float32) * 0.1
        b = jax.random.normal(next(keys), (cout,), jnp.float32) * 0.1
        gamma = 1.0 + 0.05 * jax.random.normal(next(keys), (cout,), jnp.float32)
        beta = 0.05 * jax.random.normal(next(keys), (cout,), jnp.float32)
        rmean = 0.1 * jax.random.normal(next(keys), (cout,), jnp.float32)
        rvar = 0.5 + jax.random.uniform(next(keys), (cout,), jnp.float32)
        return (w, b, gamma, beta, rmean, rvar)

    def att_params():
        aw = jax.random.normal(next(keys), (1, 32), jnp.float32) * 0.1
        ab = jax.random.normal(next(keys), (1,), jnp.float32) * 0.1
        return (aw, ab)

    return {
        "conv3": [conv_params(input_size, 32, 3),
                  conv_params(32, 32, 3), conv_params(32, 32, 3)],
        "conv4": [conv_params(input_size, 32, 4),
                  conv_params(32, 32, 4), conv_params(32, 32, 4)],
        "conv5": [conv_params(input_size, 32, 5),
                  conv_params(32, 32, 5), conv_params(32, 32, 5)],
        "att": [att_params() for _ in range(3)],
        "lin_w": jax.random.normal(next(keys), (2, 96), jnp.float32) * 0.1,
        "lin_b": jax.random.normal(next(keys), (2,), jnp.float32) * 0.1,
    }


def prepare_params(params):
    """Fold eval-mode BN into the conv weights and pack everything into 6 blobs."""
    def fold(p, cin_pad):
        w, b, gamma, beta, rmean, rvar = p
        out_dim, cin, k = w.shape
        scale = gamma / jnp.sqrt(rvar + BN_EPS)                        # (O,)
        w_f = w * scale[:, None, None]                                 # (O, Cin, K)
        b_f = scale * (b - rmean) + beta                               # (O,)
        if cin_pad > cin:
            w_f = jnp.pad(w_f, ((0, 0), (0, cin_pad - cin), (0, 0)))
        w2 = jnp.transpose(w_f, (0, 2, 1)).reshape(out_dim, k * cin_pad)  # k-major
        return jnp.concatenate([w2, b_f[:, None]], axis=1).astype(jnp.float32)

    def slab(stage, cin_pad):
        ws = [fold(params[br][stage], cin_pad) for br in ("conv3", "conv4", "conv5")]
        width = max(w.shape[1] for w in ws)                            # 5*cin_pad + 1
        ws = [jnp.pad(w, ((0, 0), (0, width - w.shape[1]))) for w in ws]
        return jnp.concatenate(ws, axis=0)                             # (96, width)

    cin = params["conv3"][0][0].shape[1]
    cp = _round_up8(cin)
    w_s1 = slab(0, cp)
    w_s2 = slab(1, 32)
    w_s3 = slab(2, 32)
    att_w = jnp.concatenate([aw.reshape(32, 1) for (aw, _) in params["att"]], axis=0)
    att_b = jnp.concatenate([ab.reshape(1) for (_, ab) in params["att"]], axis=0)
    lin_w_aug = jnp.concatenate([params["lin_w"].T,
                                 params["lin_b"].reshape(1, 2)], axis=0)   # (97, 2)
    return (w_s1, w_s2, w_s3, att_w, lin_w_aug, att_b)


# ----------------------------------------------------------------------------
# Pure-JAX reference (for correctness check)
# ----------------------------------------------------------------------------
def _conv1d_valid(x, w):
    k = w.shape[-1]
    lout = x.shape[-1] - k + 1
    y = jnp.zeros((x.shape[0], w.shape[0], lout), jnp.float32)
    for kk in range(k):
        y = y + jnp.einsum("bcl,oc->bol", x[:, :, kk:kk + lout], w[:, :, kk],
                           precision=jax.lax.Precision.HIGHEST)
    return y


def decban_reference(x, params):
    def block(xx, p):
        w, b, gamma, beta, rmean, rvar = p
        y = _conv1d_valid(xx, w) + b[None, :, None]
        scale = (gamma / jnp.sqrt(rvar + BN_EPS))[None, :, None]
        y = scale * (y - rmean[None, :, None]) + beta[None, :, None]
        return jnp.maximum(y, 0.0)

    def gpool(y):                       # (B, 32, Lout) -> (B, 32)
        return jnp.max(y, axis=-1)

    def att(pool, aw, ab):              # pool: (B, 3, 32)
        s = jnp.tanh(jnp.einsum("btc,oc->bto", pool, aw,
                                precision=jax.lax.Precision.HIGHEST) + ab[None, None, :])
        p = jax.nn.softmax(s, axis=1)
        return jnp.sum(p * pool, axis=1)  # (B, 32)

    x11 = block(x, params["conv3"][0]); x21 = block(x, params["conv4"][0]); x31 = block(x, params["conv5"][0])
    out1 = att(jnp.stack([gpool(x11), gpool(x21), gpool(x31)], axis=1), *params["att"][0])
    x12 = block(x11, params["conv3"][1]); x22 = block(x21, params["conv4"][1]); x32 = block(x31, params["conv5"][1])
    out2 = att(jnp.stack([gpool(x12), gpool(x22), gpool(x32)], axis=1), *params["att"][1])
    x13 = block(x12, params["conv3"][2]); x23 = block(x22, params["conv4"][2]); x33 = block(x32, params["conv5"][2])
    out3 = att(jnp.stack([gpool(x13), gpool(x23), gpool(x33)], axis=1), *params["att"][2])
    feat = jnp.concatenate([out1, out2, out3], axis=1)                # (B, 96)
    return feat @ params["lin_w"].T + params["lin_b"][None, :]


if __name__ == "__main__":
    B, C, L = 2, 4, 32   # batch=2, input_size=4, length=32 (length >= 13 required)
    key = jax.random.PRNGKey(0)
    pkey, xkey = jax.random.split(key)
    params = init_params(pkey, C)
    packed = prepare_params(params)
    x = jax.random.normal(xkey, (B, C, L), jnp.float32)

    fwd = jax.jit(lambda xx: decban_forward(xx, packed))
    out = jax.block_until_ready(fwd(x))
    ref = decban_reference(x, params)

    assert out.shape == (B, 2), out.shape
    assert bool(jnp.all(jnp.isfinite(out)))
    assert bool(jnp.allclose(out, ref, rtol=5e-2, atol=5e-2)), (out, ref)
    print("KERNEL_OK")
</pallas_src>

<mosaic_0001>
module attributes {stable_mosaic.version = 11 : i64} {
  func.func @_decban_kernel(%arg0: memref<8x64xf32, #tpu.memory_space<vmem>>, %arg1: memref<96x41xf32, #tpu.memory_space<vmem>>, %arg2: memref<96x161xf32, #tpu.memory_space<vmem>>, %arg3: memref<96x161xf32, #tpu.memory_space<vmem>>, %arg4: memref<96x1xf32, #tpu.memory_space<vmem>>, %arg5: memref<97x2xf32, #tpu.memory_space<vmem>>, %arg6: memref<3xf32, #tpu.memory_space<smem>>, %arg7: memref<2x2xf32, #tpu.memory_space<vmem>>) attributes {dimension_semantics = [], scalar_prefetch = 0 : i64, scratch_operands = 0 : i64, tpu.core_type = #tpu.core_type<tc>} {
    %c0 = arith.constant 0 : index
    %c0_0 = arith.constant 0 : index
    %0 = vector.load %arg0[%c0, %c0_0] : memref<8x64xf32, #tpu.memory_space<vmem>>, vector<8x64xf32>
    %1 = vector.extract_strided_slice %0 {offsets = [0, 0], sizes = [8, 30], strides = [1, 1]} : vector<8x64xf32> to vector<8x30xf32>
    %2 = vector.extract_strided_slice %0 {offsets = [0, 1], sizes = [8, 30], strides = [1, 1]} : vector<8x64xf32> to vector<8x30xf32>
    %3 = vector.extract_strided_slice %0 {offsets = [0, 2], sizes = [8, 30], strides = [1, 1]} : vector<8x64xf32> to vector<8x30xf32>
    %4 = tpu.concatenate %1, %2, %3 in 0 : vector<8x30xf32>, vector<8x30xf32>, vector<8x30xf32> -> vector<24x30xf32>
    %5 = vector.extract_strided_slice %0 {offsets = [0, 32], sizes = [8, 30], strides = [1, 1]} : vector<8x64xf32> to vector<8x30xf32>
    %6 = vector.extract_strided_slice %0 {offsets = [0, 33], sizes = [8, 30], strides = [1, 1]} : vector<8x64xf32> to vector<8x30xf32>
    %7 = vector.extract_strided_slice %0 {offsets = [0, 34], sizes = [8, 30], strides = [1, 1]} : vector<8x64xf32> to vector<8x30xf32>
    %8 = tpu.concatenate %5, %6, %7 in 0 : vector<8x30xf32>, vector<8x30xf32>, vector<8x30xf32> -> vector<24x30xf32>
    %9 = tpu.concatenate %4, %8 in 1 : vector<24x30xf32>, vector<24x30xf32> -> vector<24x60xf32>
    %cst = arith.constant 1.000000e+00 : f32
    %10 = vector.broadcast %cst : f32 to vector<1x60xf32>
    %11 = tpu.concatenate %9, %10 in 0 : vector<24x60xf32>, vector<1x60xf32> -> vector<25x60xf32>
    %c0_1 = arith.constant 0 : index
    %c0_2 = arith.constant 0 : index
    %12 = vector.load %arg1[%c0_1, %c0_2] : memref<96x41xf32, #tpu.memory_space<vmem>>, vector<32x25xf32>
    %cst_3 = arith.constant dense<0.000000e+00> : vector<32x60xf32>
    %13 = tpu.matmul %12, %11, %cst_3 {dimension_numbers = #tpu.dot_dimension_numbers<[1], [0], [0], [1], [0, 0, 1, 1], [], []>} : vector<32x25xf32>, vector<25x60xf32>, vector<32x60xf32> -> vector<32x60xf32>
    %cst_4 = arith.constant 0.000000e+00 : f32
    %14 = vector.broadcast %cst_4 : f32 to vector<32x60xf32>
    %15 = arith.maximumf %13, %14 : vector<32x60xf32>
    %16 = vector.extract_strided_slice %0 {offsets = [0, 0], sizes = [8, 29], strides = [1, 1]} : vector<8x64xf32> to vector<8x29xf32>
    %17 = vector.extract_strided_slice %0 {offsets = [0, 1], sizes = [8, 29], strides = [1, 1]} : vector<8x64xf32> to vector<8x29xf32>
    %18 = vector.extract_strided_slice %0 {offsets = [0, 2], sizes = [8, 29], strides = [1, 1]} : vector<8x64xf32> to vector<8x29xf32>
    %19 = vector.extract_strided_slice %0 {offsets = [0, 3], sizes = [8, 29], strides = [1, 1]} : vector<8x64xf32> to vector<8x29xf32>
    %20 = tpu.concatenate %16, %17, %18, %19 in 0 : vector<8x29xf32>, vector<8x29xf32>, vector<8x29xf32>, vector<8x29xf32> -> vector<32x29xf32>
    %21 = vector.extract_strided_slice %0 {offsets = [0, 32], sizes = [8, 29], strides = [1, 1]} : vector<8x64xf32> to vector<8x29xf32>
    %22 = vector.extract_strided_slice %0 {offsets = [0, 33], sizes = [8, 29], strides = [1, 1]} : vector<8x64xf32> to vector<8x29xf32>
    %23 = vector.extract_strided_slice %0 {offsets = [0, 34], sizes = [8, 29], strides = [1, 1]} : vector<8x64xf32> to vector<8x29xf32>
    %24 = vector.extract_strided_slice %0 {offsets = [0, 35], sizes = [8, 29], strides = [1, 1]} : vector<8x64xf32> to vector<8x29xf32>
    %25 = tpu.concatenate %21, %22, %23, %24 in 0 : vector<8x29xf32>, vector<8x29xf32>, vector<8x29xf32>, vector<8x29xf32> -> vector<32x29xf32>
    %26 = tpu.concatenate %20, %25 in 1 : vector<32x29xf32>, vector<32x29xf32> -> vector<32x58xf32>
    %cst_5 = arith.constant 1.000000e+00 : f32
    %27 = vector.broadcast %cst_5 : f32 to vector<1x58xf32>
    %28 = tpu.concatenate %26, %27 in 0 : vector<32x58xf32>, vector<1x58xf32> -> vector<33x58xf32>
    %c32 = arith.constant 32 : index
    %c0_6 = arith.constant 0 : index
    %29 = vector.load %arg1[%c32, %c0_6] : memref<96x41xf32, #tpu.memory_space<vmem>>, vector<32x33xf32>
    %cst_7 = arith.constant dense<0.000000e+00> : vector<32x58xf32>
    %30 = tpu.matmul %29, %28, %cst_7 {dimension_numbers = #tpu.dot_dimension_numbers<[1], [0], [0], [1], [0, 0, 1, 1], [], []>} : vector<32x33xf32>, vector<33x58xf32>, vector<32x58xf32> -> vector<32x58xf32>
    %cst_8 = arith.constant 0.000000e+00 : f32
    %31 = vector.broadcast %cst_8 : f32 to vector<32x58xf32>
    %32 = arith.maximumf %30, %31 : vector<32x58xf32>
    %33 = vector.extract_strided_slice %0 {offsets = [0, 0], sizes = [8, 28], strides = [1, 1]} : vector<8x64xf32> to vector<8x28xf32>
    %34 = vector.extract_strided_slice %0 {offsets = [0, 1], sizes = [8, 28], strides = [1, 1]} : vector<8x64xf32> to vector<8x28xf32>
    %35 = vector.extract_strided_slice %0 {offsets = [0, 2], sizes = [8, 28], strides = [1, 1]} : vector<8x64xf32> to vector<8x28xf32>
    %36 = vector.extract_strided_slice %0 {offsets = [0, 3], sizes = [8, 28], strides = [1, 1]} : vector<8x64xf32> to vector<8x28xf32>
    %37 = vector.extract_strided_slice %0 {offsets = [0, 4], sizes = [8, 28], strides = [1, 1]} : vector<8x64xf32> to vector<8x28xf32>
    %38 = tpu.concatenate %33, %34, %35, %36, %37 in 0 : vector<8x28xf32>, vector<8x28xf32>, vector<8x28xf32>, vector<8x28xf32>, vector<8x28xf32> -> vector<40x28xf32>
    %39 = vector.extract_strided_slice %0 {offsets = [0, 32], sizes = [8, 28], strides = [1, 1]} : vector<8x64xf32> to vector<8x28xf32>
    %40 = vector.extract_strided_slice %0 {offsets = [0, 33], sizes = [8, 28], strides = [1, 1]} : vector<8x64xf32> to vector<8x28xf32>
    %41 = vector.extract_strided_slice %0 {offsets = [0, 34], sizes = [8, 28], strides = [1, 1]} : vector<8x64xf32> to vector<8x28xf32>
    %42 = vector.extract_strided_slice %0 {offsets = [0, 35], sizes = [8, 28], strides = [1, 1]} : vector<8x64xf32> to vector<8x28xf32>
    %43 = vector.extract_strided_slice %0 {offsets = [0, 36], sizes = [8, 28], strides = [1, 1]} : vector<8x64xf32> to vector<8x28xf32>
    %44 = tpu.concatenate %39, %40, %41, %42, %43 in 0 : vector<8x28xf32>, vector<8x28xf32>, vector<8x28xf32>, vector<8x28xf32>, vector<8x28xf32> -> vector<40x28xf32>
    %45 = tpu.concatenate %38, %44 in 1 : vector<40x28xf32>, vector<40x28xf32> -> vector<40x56xf32>
    %cst_9 = arith.constant 1.000000e+00 : f32
    %46 = vector.broadcast %cst_9 : f32 to vector<1x56xf32>
    %47 = tpu.concatenate %45, %46 in 0 : vector<40x56xf32>, vector<1x56xf32> -> vector<41x56xf32>
    %c64 = arith.constant 64 : index
    %c0_10 = arith.constant 0 : index
    %48 = vector.load %arg1[%c64, %c0_10] : memref<96x41xf32, #tpu.memory_space<vmem>>, vector<32x41xf32>
    %cst_11 = arith.constant dense<0.000000e+00> : vector<32x56xf32>
    %49 = tpu.matmul %48, %47, %cst_11 {dimension_numbers = #tpu.dot_dimension_numbers<[1], [0], [0], [1], [0, 0, 1, 1], [], []>} : vector<32x41xf32>, vector<41x56xf32>, vector<32x56xf32> -> vector<32x56xf32>
    %cst_12 = arith.constant 0.000000e+00 : f32
    %50 = vector.broadcast %cst_12 : f32 to vector<32x56xf32>
    %51 = arith.maximumf %49, %50 : vector<32x56xf32>
    %52 = vector.extract_strided_slice %15 {offsets = [0, 0], sizes = [32, 28], strides = [1, 1]} : vector<32x60xf32> to vector<32x28xf32>
    %53 = vector.extract_strided_slice %15 {offsets = [0, 1], sizes = [32, 28], strides = [1, 1]} : vector<32x60xf32> to vector<32x28xf32>
    %54 = vector.extract_strided_slice %15 {offsets = [0, 2], sizes = [32, 28], strides = [1, 1]} : vector<32x60xf32> to vector<32x28xf32>
    %55 = tpu.concatenate %52, %53, %54 in 0 : vector<32x28xf32>, vector<32x28xf32>, vector<32x28xf32> -> vector<96x28xf32>
    %56 = vector.extract_strided_slice %15 {offsets = [0, 30], sizes = [32, 28], strides = [1, 1]} : vector<32x60xf32> to vector<32x28xf32>
    %57 = vector.extract_strided_slice %15 {offsets = [0, 31], sizes = [32, 28], strides = [1, 1]} : vector<32x60xf32> to vector<32x28xf32>
    %58 = vector.extract_strided_slice %15 {offsets = [0, 32], sizes = [32, 28], strides = [1, 1]} : vector<32x60xf32> to vector<32x28xf32>
    %59 = tpu.concatenate %56, %57, %58 in 0 : vector<32x28xf32>, vector<32x28xf32>, vector<32x28xf32> -> vector<96x28xf32>
    %60 = tpu.concatenate %55, %59 in 1 : vector<96x28xf32>, vector<96x28xf32> -> vector<96x56xf32>
    %cst_13 = arith.constant 1.000000e+00 : f32
    %61 = vector.broadcast %cst_13 : f32 to vector<1x56xf32>
    %62 = tpu.concatenate %60, %61 in 0 : vector<96x56xf32>, vector<1x56xf32> -> vector<97x56xf32>
    %c0_14 = arith.constant 0 : index
    %c0_15 = arith.constant 0 : index
    %63 = vector.load %arg2[%c0_14, %c0_15] : memref<96x161xf32, #tpu.memory_space<vmem>>, vector<32x97xf32>
    %cst_16 = arith.constant dense<0.000000e+00> : vector<32x56xf32>
    %64 = tpu.matmul %63, %62, %cst_16 {dimension_numbers = #tpu.dot_dimension_numbers<[1], [0], [0], [1], [0, 0, 1, 1], [], []>} : vector<32x97xf32>, vector<97x56xf32>, vector<32x56xf32> -> vector<32x56xf32>
    %cst_17 = arith.constant 0.000000e+00 : f32
    %65 = vector.broadcast %cst_17 : f32 to vector<32x56xf32>
    %66 = arith.maximumf %64, %65 : vector<32x56xf32>
    %67 = vector.extract_strided_slice %32 {offsets = [0, 0], sizes = [32, 26], strides = [1, 1]} : vector<32x58xf32> to vector<32x26xf32>
    %68 = vector.extract_strided_slice %32 {offsets = [0, 1], sizes = [32, 26], strides = [1, 1]} : vector<32x58xf32> to vector<32x26xf32>
    %69 = vector.extract_strided_slice %32 {offsets = [0, 2], sizes = [32, 26], strides = [1, 1]} : vector<32x58xf32> to vector<32x26xf32>
    %70 = vector.extract_strided_slice %32 {offsets = [0, 3], sizes = [32, 26], strides = [1, 1]} : vector<32x58xf32> to vector<32x26xf32>
    %71 = tpu.concatenate %67, %68, %69, %70 in 0 : vector<32x26xf32>, vector<32x26xf32>, vector<32x26xf32>, vector<32x26xf32> -> vector<128x26xf32>
    %72 = vector.extract_strided_slice %32 {offsets = [0, 29], sizes = [32, 26], strides = [1, 1]} : vector<32x58xf32> to vector<32x26xf32>
    %73 = vector.extract_strided_slice %32 {offsets = [0, 30], sizes = [32, 26], strides = [1, 1]} : vector<32x58xf32> to vector<32x26xf32>
    %74 = vector.extract_strided_slice %32 {offsets = [0, 31], sizes = [32, 26], strides = [1, 1]} : vector<32x58xf32> to vector<32x26xf32>
    %75 = vector.extract_strided_slice %32 {offsets = [0, 32], sizes = [32, 26], strides = [1, 1]} : vector<32x58xf32> to vector<32x26xf32>
    %76 = tpu.concatenate %72, %73, %74, %75 in 0 : vector<32x26xf32>, vector<32x26xf32>, vector<32x26xf32>, vector<32x26xf32> -> vector<128x26xf32>
    %77 = tpu.concatenate %71, %76 in 1 : vector<128x26xf32>, vector<128x26xf32> -> vector<128x52xf32>
    %cst_18 = arith.constant 1.000000e+00 : f32
    %78 = vector.broadcast %cst_18 : f32 to vector<1x52xf32>
    %79 = tpu.concatenate %77, %78 in 0 : vector<128x52xf32>, vector<1x52xf32> -> vector<129x52xf32>
    %c32_19 = arith.constant 32 : index
    %c0_20 = arith.constant 0 : index
    %80 = vector.load %arg2[%c32_19, %c0_20] : memref<96x161xf32, #tpu.memory_space<vmem>>, vector<32x129xf32>
    %cst_21 = arith.constant dense<0.000000e+00> : vector<32x52xf32>
    %81 = tpu.matmul %80, %79, %cst_21 {dimension_numbers = #tpu.dot_dimension_numbers<[1], [0], [0], [1], [0, 0, 1, 1], [], []>} : vector<32x129xf32>, vector<129x52xf32>, vector<32x52xf32> -> vector<32x52xf32>
    %cst_22 = arith.constant 0.000000e+00 : f32
    %82 = vector.broadcast %cst_22 : f32 to vector<32x52xf32>
    %83 = arith.maximumf %81, %82 : vector<32x52xf32>
    %84 = vector.extract_strided_slice %51 {offsets = [0, 0], sizes = [32, 24], strides = [1, 1]} : vector<32x56xf32> to vector<32x24xf32>
    %85 = vector.extract_strided_slice %51 {offsets = [0, 1], sizes = [32, 24], strides = [1, 1]} : vector<32x56xf32> to vector<32x24xf32>
    %86 = vector.extract_strided_slice %51 {offsets = [0, 2], sizes = [32, 24], strides = [1, 1]} : vector<32x56xf32> to vector<32x24xf32>
    %87 = vector.extract_strided_slice %51 {offsets = [0, 3], sizes = [32, 24], strides = [1, 1]} : vector<32x56xf32> to vector<32x24xf32>
    %88 = vector.extract_strided_slice %51 {offsets = [0, 4], sizes = [32, 24], strides = [1, 1]} : vector<32x56xf32> to vector<32x24xf32>
    %89 = tpu.concatenate %84, %85, %86, %87, %88 in 0 : vector<32x24xf32>, vector<32x24xf32>, vector<32x24xf32>, vector<32x24xf32>, vector<32x24xf32> -> vector<160x24xf32>
    %90 = vector.extract_strided_slice %51 {offsets = [0, 28], sizes = [32, 24], strides = [1, 1]} : vector<32x56xf32> to vector<32x24xf32>
    %91 = vector.extract_strided_slice %51 {offsets = [0, 29], sizes = [32, 24], strides = [1, 1]} : vector<32x56xf32> to vector<32x24xf32>
    %92 = vector.extract_strided_slice %51 {offsets = [0, 30], sizes = [32, 24], strides = [1, 1]} : vector<32x56xf32> to vector<32x24xf32>
    %93 = vector.extract_strided_slice %51 {offsets = [0, 31], sizes = [32, 24], strides = [1, 1]} : vector<32x56xf32> to vector<32x24xf32>
    %94 = vector.extract_strided_slice %51 {offsets = [0, 32], sizes = [32, 24], strides = [1, 1]} : vector<32x56xf32> to vector<32x24xf32>
    %95 = tpu.concatenate %90, %91, %92, %93, %94 in 0 : vector<32x24xf32>, vector<32x24xf32>, vector<32x24xf32>, vector<32x24xf32>, vector<32x24xf32> -> vector<160x24xf32>
    %96 = tpu.concatenate %89, %95 in 1 : vector<160x24xf32>, vector<160x24xf32> -> vector<160x48xf32>
    %cst_23 = arith.constant 1.000000e+00 : f32
    %97 = vector.broadcast %cst_23 : f32 to vector<1x48xf32>
    %98 = tpu.concatenate %96, %97 in 0 : vector<160x48xf32>, vector<1x48xf32> -> vector<161x48xf32>
    %c64_24 = arith.constant 64 : index
    %c0_25 = arith.constant 0 : index
    %99 = vector.load %arg2[%c64_24, %c0_25] : memref<96x161xf32, #tpu.memory_space<vmem>>, vector<32x161xf32>
    %cst_26 = arith.constant dense<0.000000e+00> : vector<32x48xf32>
    %100 = tpu.matmul %99, %98, %cst_26 {dimension_numbers = #tpu.dot_dimension_numbers<[1], [0], [0], [1], [0, 0, 1, 1], [], []>} : vector<32x161xf32>, vector<161x48xf32>, vector<32x48xf32> -> vector<32x48xf32>
    %cst_27 = arith.constant 0.000000e+00 : f32
    %101 = vector.broadcast %cst_27 : f32 to vector<32x48xf32>
    %102 = arith.maximumf %100, %101 : vector<32x48xf32>
    %103 = vector.extract_strided_slice %66 {offsets = [0, 0], sizes = [32, 26], strides = [1, 1]} : vector<32x56xf32> to vector<32x26xf32>
    %104 = vector.extract_strided_slice %66 {offsets = [0, 1], sizes = [32, 26], strides = [1, 1]} : vector<32x56xf32> to vector<32x26xf32>
    %105 = vector.extract_strided_slice %66 {offsets = [0, 2], sizes = [32, 26], strides = [1, 1]} : vector<32x56xf32> to vector<32x26xf32>
    %106 = tpu.concatenate %103, %104, %105 in 0 : vector<32x26xf32>, vector<32x26xf32>, vector<32x26xf32> -> vector<96x26xf32>
    %107 = vector.extract_strided_slice %66 {offsets = [0, 28], sizes = [32, 26], strides = [1, 1]} : vector<32x56xf32> to vector<32x26xf32>
    %108 = vector.extract_strided_slice %66 {offsets = [0, 29], sizes = [32, 26], strides = [1, 1]} : vector<32x56xf32> to vector<32x26xf32>
    %109 = vector.extract_strided_slice %66 {offsets = [0, 30], sizes = [32, 26], strides = [1, 1]} : vector<32x56xf32> to vector<32x26xf32>
    %110 = tpu.concatenate %107, %108, %109 in 0 : vector<32x26xf32>, vector<32x26xf32>, vector<32x26xf32> -> vector<96x26xf32>
    %111 = tpu.concatenate %106, %110 in 1 : vector<96x26xf32>, vector<96x26xf32> -> vector<96x52xf32>
    %cst_28 = arith.constant 1.000000e+00 : f32
    %112 = vector.broadcast %cst_28 : f32 to vector<1x52xf32>
    %113 = tpu.concatenate %111, %112 in 0 : vector<96x52xf32>, vector<1x52xf32> -> vector<97x52xf32>
    %c0_29 = arith.constant 0 : index
    %c0_30 = arith.constant 0 : index
    %114 = vector.load %arg3[%c0_29, %c0_30] : memref<96x161xf32, #tpu.memory_space<vmem>>, vector<32x97xf32>
    %cst_31 = arith.constant dense<0.000000e+00> : vector<32x52xf32>
    %115 = tpu.matmul %114, %113, %cst_31 {dimension_numbers = #tpu.dot_dimension_numbers<[1], [0], [0], [1], [0, 0, 1, 1], [], []>} : vector<32x97xf32>, vector<97x52xf32>, vector<32x52xf32> -> vector<32x52xf32>
    %cst_32 = arith.constant 0.000000e+00 : f32
    %116 = vector.broadcast %cst_32 : f32 to vector<32x52xf32>
    %117 = arith.maximumf %115, %116 : vector<32x52xf32>
    %118 = vector.extract_strided_slice %83 {offsets = [0, 0], sizes = [32, 23], strides = [1, 1]} : vector<32x52xf32> to vector<32x23xf32>
    %119 = vector.extract_strided_slice %83 {offsets = [0, 1], sizes = [32, 23], strides = [1, 1]} : vector<32x52xf32> to vector<32x23xf32>
    %120 = vector.extract_strided_slice %83 {offsets = [0, 2], sizes = [32, 23], strides = [1, 1]} : vector<32x52xf32> to vector<32x23xf32>
    %121 = vector.extract_strided_slice %83 {offsets = [0, 3], sizes = [32, 23], strides = [1, 1]} : vector<32x52xf32> to vector<32x23xf32>
    %122 = tpu.concatenate %118, %119, %120, %121 in 0 : vector<32x23xf32>, vector<32x23xf32>, vector<32x23xf32>, vector<32x23xf32> -> vector<128x23xf32>
    %123 = vector.extract_strided_slice %83 {offsets = [0, 26], sizes = [32, 23], strides = [1, 1]} : vector<32x52xf32> to vector<32x23xf32>
    %124 = vector.extract_strided_slice %83 {offsets = [0, 27], sizes = [32, 23], strides = [1, 1]} : vector<32x52xf32> to vector<32x23xf32>
    %125 = vector.extract_strided_slice %83 {offsets = [0, 28], sizes = [32, 23], strides = [1, 1]} : vector<32x52xf32> to vector<32x23xf32>
    %126 = vector.extract_strided_slice %83 {offsets = [0, 29], sizes = [32, 23], strides = [1, 1]} : vector<32x52xf32> to vector<32x23xf32>
    %127 = tpu.concatenate %123, %124, %125, %126 in 0 : vector<32x23xf32>, vector<32x23xf32>, vector<32x23xf32>, vector<32x23xf32> -> vector<128x23xf32>
    %128 = tpu.concatenate %122, %127 in 1 : vector<128x23xf32>, vector<128x23xf32> -> vector<128x46xf32>
    %cst_33 = arith.constant 1.000000e+00 : f32
    %129 = vector.broadcast %cst_33 : f32 to vector<1x46xf32>
    %130 = tpu.concatenate %128, %129 in 0 : vector<128x46xf32>, vector<1x46xf32> -> vector<129x46xf32>
    %c32_34 = arith.constant 32 : index
    %c0_35 = arith.constant 0 : index
    %131 = vector.load %arg3[%c32_34, %c0_35] : memref<96x161xf32, #tpu.memory_space<vmem>>, vector<32x129xf32>
    %cst_36 = arith.constant dense<0.000000e+00> : vector<32x46xf32>
    %132 = tpu.matmul %131, %130, %cst_36 {dimension_numbers = #tpu.dot_dimension_numbers<[1], [0], [0], [1], [0, 0, 1, 1], [], []>} : vector<32x129xf32>, vector<129x46xf32>, vector<32x46xf32> -> vector<32x46xf32>
    %cst_37 = arith.constant 0.000000e+00 : f32
    %133 = vector.broadcast %cst_37 : f32 to vector<32x46xf32>
    %134 = arith.maximumf %132, %133 : vector<32x46xf32>
    %135 = vector.extract_strided_slice %102 {offsets = [0, 0], sizes = [32, 20], strides = [1, 1]} : vector<32x48xf32> to vector<32x20xf32>
    %136 = vector.extract_strided_slice %102 {offsets = [0, 1], sizes = [32, 20], strides = [1, 1]} : vector<32x48xf32> to vector<32x20xf32>
    %137 = vector.extract_strided_slice %102 {offsets = [0, 2], sizes = [32, 20], strides = [1, 1]} : vector<32x48xf32> to vector<32x20xf32>
    %138 = vector.extract_strided_slice %102 {offsets = [0, 3], sizes = [32, 20], strides = [1, 1]} : vector<32x48xf32> to vector<32x20xf32>
    %139 = vector.extract_strided_slice %102 {offsets = [0, 4], sizes = [32, 20], strides = [1, 1]} : vector<32x48xf32> to vector<32x20xf32>
    %140 = tpu.concatenate %135, %136, %137, %138, %139 in 0 : vector<32x20xf32>, vector<32x20xf32>, vector<32x20xf32>, vector<32x20xf32>, vector<32x20xf32> -> vector<160x20xf32>
    %141 = vector.extract_strided_slice %102 {offsets = [0, 24], sizes = [32, 20], strides = [1, 1]} : vector<32x48xf32> to vector<32x20xf32>
    %142 = vector.extract_strided_slice %102 {offsets = [0, 25], sizes = [32, 20], strides = [1, 1]} : vector<32x48xf32> to vector<32x20xf32>
    %143 = vector.extract_strided_slice %102 {offsets = [0, 26], sizes = [32, 20], strides = [1, 1]} : vector<32x48xf32> to vector<32x20xf32>
    %144 = vector.extract_strided_slice %102 {offsets = [0, 27], sizes = [32, 20], strides = [1, 1]} : vector<32x48xf32> to vector<32x20xf32>
    %145 = vector.extract_strided_slice %102 {offsets = [0, 28], sizes = [32, 20], strides = [1, 1]} : vector<32x48xf32> to vector<32x20xf32>
    %146 = tpu.concatenate %141, %142, %143, %144, %145 in 0 : vector<32x20xf32>, vector<32x20xf32>, vector<32x20xf32>, vector<32x20xf32>, vector<32x20xf32> -> vector<160x20xf32>
    %147 = tpu.concatenate %140, %146 in 1 : vector<160x20xf32>, vector<160x20xf32> -> vector<160x40xf32>
    %cst_38 = arith.constant 1.000000e+00 : f32
    %148 = vector.broadcast %cst_38 : f32 to vector<1x40xf32>
    %149 = tpu.concatenate %147, %148 in 0 : vector<160x40xf32>, vector<1x40xf32> -> vector<161x40xf32>
    %c64_39 = arith.constant 64 : index
    %c0_40 = arith.constant 0 : index
    %150 = vector.load %arg3[%c64_39, %c0_40] : memref<96x161xf32, #tpu.memory_space<vmem>>, vector<32x161xf32>
    %cst_41 = arith.constant dense<0.000000e+00> : vector<32x40xf32>
    %151 = tpu.matmul %150, %149, %cst_41 {dimension_numbers = #tpu.dot_dimension_numbers<[1], [0], [0], [1], [0, 0, 1, 1], [], []>} : vector<32x161xf32>, vector<161x40xf32>, vector<32x40xf32> -> vector<32x40xf32>
    %cst_42 = arith.constant 0.000000e+00 : f32
    %152 = vector.broadcast %cst_42 : f32 to vector<32x40xf32>
    %153 = arith.maximumf %151, %152 : vector<32x40xf32>
    %c0_43 = arith.constant 0 : index
    %c0_44 = arith.constant 0 : index
    %154 = vector.load %arg5[%c0_43, %c0_44] : memref<97x2xf32, #tpu.memory_space<vmem>>, vector<97x2xf32>
    %155 = vector.extract_strided_slice %15 {offsets = [0, 0], sizes = [32, 30], strides = [1, 1]} : vector<32x60xf32> to vector<32x30xf32>
    %cst_45 = arith.constant dense<0xFF800000> : vector<32xf32>
    %156 = vector.multi_reduction <maximumf>, %155, %cst_45 [1] : vector<32x30xf32> to vector<32xf32>
    %157 = vector.shape_cast %156 : vector<32xf32> to vector<32x1xf32>
    %158 = vector.extract_strided_slice %32 {offsets = [0, 0], sizes = [32, 29], strides = [1, 1]} : vector<32x58xf32> to vector<32x29xf32>
    %cst_46 = arith.constant dense<0xFF800000> : vector<32xf32>
    %159 = vector.multi_reduction <maximumf>, %158, %cst_46 [1] : vector<32x29xf32> to vector<32xf32>
    %160 = vector.shape_cast %159 : vector<32xf32> to vector<32x1xf32>
    %161 = vector.extract_strided_slice %51 {offsets = [0, 0], sizes = [32, 28], strides = [1, 1]} : vector<32x56xf32> to vector<32x28xf32>
    %cst_47 = arith.constant dense<0xFF800000> : vector<32xf32>
    %162 = vector.multi_reduction <maximumf>, %161, %cst_47 [1] : vector<32x28xf32> to vector<32xf32>
    %163 = vector.shape_cast %162 : vector<32xf32> to vector<32x1xf32>
    %164 = tpu.concatenate %157, %160, %163 in 1 : vector<32x1xf32>, vector<32x1xf32>, vector<32x1xf32> -> vector<32x3xf32>
    %165 = vector.extract_strided_slice %66 {offsets = [0, 0], sizes = [32, 28], strides = [1, 1]} : vector<32x56xf32> to vector<32x28xf32>
    %cst_48 = arith.constant dense<0xFF800000> : vector<32xf32>
    %166 = vector.multi_reduction <maximumf>, %165, %cst_48 [1] : vector<32x28xf32> to vector<32xf32>
    %167 = vector.shape_cast %166 : vector<32xf32> to vector<32x1xf32>
    %168 = vector.extract_strided_slice %83 {offsets = [0, 0], sizes = [32, 26], strides = [1, 1]} : vector<32x52xf32> to vector<32x26xf32>
    %cst_49 = arith.constant dense<0xFF800000> : vector<32xf32>
    %169 = vector.multi_reduction <maximumf>, %168, %cst_49 [1] : vector<32x26xf32> to vector<32xf32>
    %170 = vector.shape_cast %169 : vector<32xf32> to vector<32x1xf32>
    %171 = vector.extract_strided_slice %102 {offsets = [0, 0], sizes = [32, 24], strides = [1, 1]} : vector<32x48xf32> to vector<32x24xf32>
    %cst_50 = arith.constant dense<0xFF800000> : vector<32xf32>
    %172 = vector.multi_reduction <maximumf>, %171, %cst_50 [1] : vector<32x24xf32> to vector<32xf32>
    %173 = vector.shape_cast %172 : vector<32xf32> to vector<32x1xf32>
    %174 = tpu.concatenate %167, %170, %173 in 1 : vector<32x1xf32>, vector<32x1xf32>, vector<32x1xf32> -> vector<32x3xf32>
    %175 = vector.extract_strided_slice %117 {offsets = [0, 0], sizes = [32, 26], strides = [1, 1]} : vector<32x52xf32> to vector<32x26xf32>
    %cst_51 = arith.constant dense<0xFF800000> : vector<32xf32>
    %176 = vector.multi_reduction <maximumf>, %175, %cst_51 [1] : vector<32x26xf32> to vector<32xf32>
    %177 = vector.shape_cast %176 : vector<32xf32> to vector<32x1xf32>
    %178 = vector.extract_strided_slice %134 {offsets = [0, 0], sizes = [32, 23], strides = [1, 1]} : vector<32x46xf32> to vector<32x23xf32>
    %cst_52 = arith.constant dense<0xFF800000> : vector<32xf32>
    %179 = vector.multi_reduction <maximumf>, %178, %cst_52 [1] : vector<32x23xf32> to vector<32xf32>
    %180 = vector.shape_cast %179 : vector<32xf32> to vector<32x1xf32>
    %181 = vector.extract_strided_slice %153 {offsets = [0, 0], sizes = [32, 20], strides = [1, 1]} : vector<32x40xf32> to vector<32x20xf32>
    %cst_53 = arith.constant dense<0xFF800000> : vector<32xf32>
    %182 = vector.multi_reduction <maximumf>, %181, %cst_53 [1] : vector<32x20xf32> to vector<32xf32>
    %183 = vector.shape_cast %182 : vector<32xf32> to vector<32x1xf32>
    %184 = tpu.concatenate %177, %180, %183 in 1 : vector<32x1xf32>, vector<32x1xf32>, vector<32x1xf32> -> vector<32x3xf32>
    %c0_54 = arith.constant 0 : index
    %c0_55 = arith.constant 0 : index
    %185 = vector.load %arg4[%c0_54, %c0_55] : memref<96x1xf32, #tpu.memory_space<vmem>>, vector<32x1xf32>
    %186 = vector.broadcast %185 : vector<32x1xf32> to vector<32x3xf32>
    %187 = arith.mulf %186, %164 : vector<32x3xf32>
    %cst_56 = arith.constant dense<0.000000e+00> : vector<3xf32>
    %188 = vector.multi_reduction <add>, %187, %cst_56 [0] : vector<32x3xf32> to vector<3xf32>
    %189 = vector.shape_cast %188 : vector<3xf32> to vector<1x3xf32>
    %c0_57 = arith.constant 0 : index
    %190 = memref.load %arg6[%c0_57] : memref<3xf32, #tpu.memory_space<smem>>
    %191 = vector.broadcast %190 : f32 to vector<1x3xf32>
    %192 = arith.addf %189, %191 : vector<1x3xf32>
    %193 = math.tanh %192 : vector<1x3xf32>
    %cst_58 = arith.constant dense<0xFF800000> : vector<1xf32>
    %194 = vector.multi_reduction <maximumf>, %193, %cst_58 [1] : vector<1x3xf32> to vector<1xf32>
    %195 = vector.shape_cast %194 : vector<1xf32> to vector<1x1xf32>
    %196 = vector.broadcast %195 : vector<1x1xf32> to vector<1x3xf32>
    %197 = arith.subf %193, %196 : vector<1x3xf32>
    %198 = math.exp %197 : vector<1x3xf32>
    %cst_59 = arith.constant dense<0.000000e+00> : vector<1xf32>
    %199 = vector.multi_reduction <add>, %198, %cst_59 [1] : vector<1x3xf32> to vector<1xf32>
    %200 = vector.shape_cast %199 : vector<1xf32> to vector<1x1xf32>
    %201 = tpu.reciprocal %200 {approx = true} : vector<1x1xf32> -> vector<1x1xf32>
    %202 = vector.broadcast %201 : vector<1x1xf32> to vector<1x3xf32>
    %203 = arith.mulf %198, %202 : vector<1x3xf32>
    %204 = vector.broadcast %203 : vector<1x3xf32> to vector<32x3xf32>
    %205 = arith.mulf %164, %204 : vector<32x3xf32>
    %cst_60 = arith.constant dense<0.000000e+00> : vector<32xf32>
    %206 = vector.multi_reduction <add>, %205, %cst_60 [1] : vector<32x3xf32> to vector<32xf32>
    %207 = vector.shape_cast %206 : vector<32xf32> to vector<32x1xf32>
    %c32_61 = arith.constant 32 : index
    %c0_62 = arith.constant 0 : index
    %208 = vector.load %arg4[%c32_61, %c0_62] : memref<96x1xf32, #tpu.memory_space<vmem>>, vector<32x1xf32>
    %209 = vector.broadcast %208 : vector<32x1xf32> to vector<32x3xf32>
    %210 = arith.mulf %209, %174 : vector<32x3xf32>
    %cst_63 = arith.constant dense<0.000000e+00> : vector<3xf32>
    %211 = vector.multi_reduction <add>, %210, %cst_63 [0] : vector<32x3xf32> to vector<3xf32>
    %212 = vector.shape_cast %211 : vector<3xf32> to vector<1x3xf32>
    %c1 = arith.constant 1 : index
    %213 = memref.load %arg6[%c1] : memref<3xf32, #tpu.memory_space<smem>>
    %214 = vector.broadcast %213 : f32 to vector<1x3xf32>
    %215 = arith.addf %212, %214 : vector<1x3xf32>
    %216 = math.tanh %215 : vector<1x3xf32>
    %cst_64 = arith.constant dense<0xFF800000> : vector<1xf32>
    %217 = vector.multi_reduction <maximumf>, %216, %cst_64 [1] : vector<1x3xf32> to vector<1xf32>
    %218 = vector.shape_cast %217 : vector<1xf32> to vector<1x1xf32>
    %219 = vector.broadcast %218 : vector<1x1xf32> to vector<1x3xf32>
    %220 = arith.subf %216, %219 : vector<1x3xf32>
    %221 = math.exp %220 : vector<1x3xf32>
    %cst_65 = arith.constant dense<0.000000e+00> : vector<1xf32>
    %222 = vector.multi_reduction <add>, %221, %cst_65 [1] : vector<1x3xf32> to vector<1xf32>
    %223 = vector.shape_cast %222 : vector<1xf32> to vector<1x1xf32>
    %224 = tpu.reciprocal %223 {approx = true} : vector<1x1xf32> -> vector<1x1xf32>
    %225 = vector.broadcast %224 : vector<1x1xf32> to vector<1x3xf32>
    %226 = arith.mulf %221, %225 : vector<1x3xf32>
    %227 = vector.broadcast %226 : vector<1x3xf32> to vector<32x3xf32>
    %228 = arith.mulf %174, %227 : vector<32x3xf32>
    %cst_66 = arith.constant dense<0.000000e+00> : vector<32xf32>
    %229 = vector.multi_reduction <add>, %228, %cst_66 [1] : vector<32x3xf32> to vector<32xf32>
    %230 = vector.shape_cast %229 : vector<32xf32> to vector<32x1xf32>
    %c64_67 = arith.constant 64 : index
    %c0_68 = arith.constant 0 : index
    %231 = vector.load %arg4[%c64_67, %c0_68] : memref<96x1xf32, #tpu.memory_space<vmem>>, vector<32x1xf32>
    %232 = vector.broadcast %231 : vector<32x1xf32> to vector<32x3xf32>
    %233 = arith.mulf %232, %184 : vector<32x3xf32>
    %cst_69 = arith.constant dense<0.000000e+00> : vector<3xf32>
    %234 = vector.multi_reduction <add>, %233, %cst_69 [0] : vector<32x3xf32> to vector<3xf32>
    %235 = vector.shape_cast %234 : vector<3xf32> to vector<1x3xf32>
    %c2 = arith.constant 2 : index
    %236 = memref.load %arg6[%c2] : memref<3xf32, #tpu.memory_space<smem>>
    %237 = vector.broadcast %236 : f32 to vector<1x3xf32>
    %238 = arith.addf %235, %237 : vector<1x3xf32>
    %239 = math.tanh %238 : vector<1x3xf32>
    %cst_70 = arith.constant dense<0xFF800000> : vector<1xf32>
    %240 = vector.multi_reduction <maximumf>, %239, %cst_70 [1] : vector<1x3xf32> to vector<1xf32>
    %241 = vector.shape_cast %240 : vector<1xf32> to vector<1x1xf32>
    %242 = vector.broadcast %241 : vector<1x1xf32> to vector<1x3xf32>
    %243 = arith.subf %239, %242 : vector<1x3xf32>
    %244 = math.exp %243 : vector<1x3xf32>
    %cst_71 = arith.constant dense<0.000000e+00> : vector<1xf32>
    %245 = vector.multi_reduction <add>, %244, %cst_71 [1] : vector<1x3xf32> to vector<1xf32>
    %246 = vector.shape_cast %245 : vector<1xf32> to vector<1x1xf32>
    %247 = tpu.reciprocal %246 {approx = true} : vector<1x1xf32> -> vector<1x1xf32>
    %248 = vector.broadcast %247 : vector<1x1xf32> to vector<1x3xf32>
    %249 = arith.mulf %244, %248 : vector<1x3xf32>
    %250 = vector.broadcast %249 : vector<1x3xf32> to vector<32x3xf32>
    %251 = arith.mulf %184, %250 : vector<32x3xf32>
    %cst_72 = arith.constant dense<0.000000e+00> : vector<32xf32>
    %252 = vector.multi_reduction <add>, %251, %cst_72 [1] : vector<32x3xf32> to vector<32xf32>
    %253 = vector.shape_cast %252 : vector<32xf32> to vector<32x1xf32>
    %cst_73 = arith.constant 1.000000e+00 : f32
    %254 = vector.broadcast %cst_73 : f32 to vector<1x1xf32>
    %255 = tpu.concatenate %207, %230, %253, %254 in 0 : vector<32x1xf32>, vector<32x1xf32>, vector<32x1xf32>, vector<1x1xf32> -> vector<97x1xf32>
    %256 = vector.broadcast %255 : vector<97x1xf32> to vector<97x2xf32>
    %257 = arith.mulf %154, %256 : vector<97x2xf32>
    %cst_74 = arith.constant dense<0.000000e+00> : vector<2xf32>
    %258 = vector.multi_reduction <add>, %257, %cst_74 [0] : vector<97x2xf32> to vector<2xf32>
    %259 = vector.shape_cast %258 : vector<2xf32> to vector<1x2xf32>
    %260 = vector.extract_strided_slice %15 {offsets = [0, 30], sizes = [32, 30], strides = [1, 1]} : vector<32x60xf32> to vector<32x30xf32>
    %cst_75 = arith.constant dense<0xFF800000> : vector<32xf32>
    %261 = vector.multi_reduction <maximumf>, %260, %cst_75 [1] : vector<32x30xf32> to vector<32xf32>
    %262 = vector.shape_cast %261 : vector<32xf32> to vector<32x1xf32>
    %263 = vector.extract_strided_slice %32 {offsets = [0, 29], sizes = [32, 29], strides = [1, 1]} : vector<32x58xf32> to vector<32x29xf32>
    %cst_76 = arith.constant dense<0xFF800000> : vector<32xf32>
    %264 = vector.multi_reduction <maximumf>, %263, %cst_76 [1] : vector<32x29xf32> to vector<32xf32>
    %265 = vector.shape_cast %264 : vector<32xf32> to vector<32x1xf32>
    %266 = vector.extract_strided_slice %51 {offsets = [0, 28], sizes = [32, 28], strides = [1, 1]} : vector<32x56xf32> to vector<32x28xf32>
    %cst_77 = arith.constant dense<0xFF800000> : vector<32xf32>
    %267 = vector.multi_reduction <maximumf>, %266, %cst_77 [1] : vector<32x28xf32> to vector<32xf32>
    %268 = vector.shape_cast %267 : vector<32xf32> to vector<32x1xf32>
    %269 = tpu.concatenate %262, %265, %268 in 1 : vector<32x1xf32>, vector<32x1xf32>, vector<32x1xf32> -> vector<32x3xf32>
    %270 = vector.extract_strided_slice %66 {offsets = [0, 28], sizes = [32, 28], strides = [1, 1]} : vector<32x56xf32> to vector<32x28xf32>
    %cst_78 = arith.constant dense<0xFF800000> : vector<32xf32>
    %271 = vector.multi_reduction <maximumf>, %270, %cst_78 [1] : vector<32x28xf32> to vector<32xf32>
    %272 = vector.shape_cast %271 : vector<32xf32> to vector<32x1xf32>
    %273 = vector.extract_strided_slice %83 {offsets = [0, 26], sizes = [32, 26], strides = [1, 1]} : vector<32x52xf32> to vector<32x26xf32>
    %cst_79 = arith.constant dense<0xFF800000> : vector<32xf32>
    %274 = vector.multi_reduction <maximumf>, %273, %cst_79 [1] : vector<32x26xf32> to vector<32xf32>
    %275 = vector.shape_cast %274 : vector<32xf32> to vector<32x1xf32>
    %276 = vector.extract_strided_slice %102 {offsets = [0, 24], sizes = [32, 24], strides = [1, 1]} : vector<32x48xf32> to vector<32x24xf32>
    %cst_80 = arith.constant dense<0xFF800000> : vector<32xf32>
    %277 = vector.multi_reduction <maximumf>, %276, %cst_80 [1] : vector<32x24xf32> to vector<32xf32>
    %278 = vector.shape_cast %277 : vector<32xf32> to vector<32x1xf32>
    %279 = tpu.concatenate %272, %275, %278 in 1 : vector<32x1xf32>, vector<32x1xf32>, vector<32x1xf32> -> vector<32x3xf32>
    %280 = vector.extract_strided_slice %117 {offsets = [0, 26], sizes = [32, 26], strides = [1, 1]} : vector<32x52xf32> to vector<32x26xf32>
    %cst_81 = arith.constant dense<0xFF800000> : vector<32xf32>
    %281 = vector.multi_reduction <maximumf>, %280, %cst_81 [1] : vector<32x26xf32> to vector<32xf32>
    %282 = vector.shape_cast %281 : vector<32xf32> to vector<32x1xf32>
    %283 = vector.extract_strided_slice %134 {offsets = [0, 23], sizes = [32, 23], strides = [1, 1]} : vector<32x46xf32> to vector<32x23xf32>
    %cst_82 = arith.constant dense<0xFF800000> : vector<32xf32>
    %284 = vector.multi_reduction <maximumf>, %283, %cst_82 [1] : vector<32x23xf32> to vector<32xf32>
    %285 = vector.shape_cast %284 : vector<32xf32> to vector<32x1xf32>
    %286 = vector.extract_strided_slice %153 {offsets = [0, 20], sizes = [32, 20], strides = [1, 1]} : vector<32x40xf32> to vector<32x20xf32>
    %cst_83 = arith.constant dense<0xFF800000> : vector<32xf32>
    %287 = vector.multi_reduction <maximumf>, %286, %cst_83 [1] : vector<32x20xf32> to vector<32xf32>
    %288 = vector.shape_cast %287 : vector<32xf32> to vector<32x1xf32>
    %289 = tpu.concatenate %282, %285, %288 in 1 : vector<32x1xf32>, vector<32x1xf32>, vector<32x1xf32> -> vector<32x3xf32>
    %c0_84 = arith.constant 0 : index
    %c0_85 = arith.constant 0 : index
    %290 = vector.load %arg4[%c0_84, %c0_85] : memref<96x1xf32, #tpu.memory_space<vmem>>, vector<32x1xf32>
    %291 = vector.broadcast %290 : vector<32x1xf32> to vector<32x3xf32>
    %292 = arith.mulf %291, %269 : vector<32x3xf32>
    %cst_86 = arith.constant dense<0.000000e+00> : vector<3xf32>
    %293 = vector.multi_reduction <add>, %292, %cst_86 [0] : vector<32x3xf32> to vector<3xf32>
    %294 = vector.shape_cast %293 : vector<3xf32> to vector<1x3xf32>
    %c0_87 = arith.constant 0 : index
    %295 = memref.load %arg6[%c0_87] : memref<3xf32, #tpu.memory_space<smem>>
    %296 = vector.broadcast %295 : f32 to vector<1x3xf32>
    %297 = arith.addf %294, %296 : vector<1x3xf32>
    %298 = math.tanh %297 : vector<1x3xf32>
    %cst_88 = arith.constant dense<0xFF800000> : vector<1xf32>
    %299 = vector.multi_reduction <maximumf>, %298, %cst_88 [1] : vector<1x3xf32> to vector<1xf32>
    %300 = vector.shape_cast %299 : vector<1xf32> to vector<1x1xf32>
    %301 = vector.broadcast %300 : vector<1x1xf32> to vector<1x3xf32>
    %302 = arith.subf %298, %301 : vector<1x3xf32>
    %303 = math.exp %302 : vector<1x3xf32>
    %cst_89 = arith.constant dense<0.000000e+00> : vector<1xf32>
    %304 = vector.multi_reduction <add>, %303, %cst_89 [1] : vector<1x3xf32> to vector<1xf32>
    %305 = vector.shape_cast %304 : vector<1xf32> to vector<1x1xf32>
    %306 = tpu.reciprocal %305 {approx = true} : vector<1x1xf32> -> vector<1x1xf32>
    %307 = vector.broadcast %306 : vector<1x1xf32> to vector<1x3xf32>
    %308 = arith.mulf %303, %307 : vector<1x3xf32>
    %309 = vector.broadcast %308 : vector<1x3xf32> to vector<32x3xf32>
    %310 = arith.mulf %269, %309 : vector<32x3xf32>
    %cst_90 = arith.constant dense<0.000000e+00> : vector<32xf32>
    %311 = vector.multi_reduction <add>, %310, %cst_90 [1] : vector<32x3xf32> to vector<32xf32>
    %312 = vector.shape_cast %311 : vector<32xf32> to vector<32x1xf32>
    %c32_91 = arith.constant 32 : index
    %c0_92 = arith.constant 0 : index
    %313 = vector.load %arg4[%c32_91, %c0_92] : memref<96x1xf32, #tpu.memory_space<vmem>>, vector<32x1xf32>
    %314 = vector.broadcast %313 : vector<32x1xf32> to vector<32x3xf32>
    %315 = arith.mulf %314, %279 : vector<32x3xf32>
    %cst_93 = arith.constant dense<0.000000e+00> : vector<3xf32>
    %316 = vector.multi_reduction <add>, %315, %cst_93 [0] : vector<32x3xf32> to vector<3xf32>
    %317 = vector.shape_cast %316 : vector<3xf32> to vector<1x3xf32>
    %c1_94 = arith.constant 1 : index
    %318 = memref.load %arg6[%c1_94] : memref<3xf32, #tpu.memory_space<smem>>
    %319 = vector.broadcast %318 : f32 to vector<1x3xf32>
    %320 = arith.addf %317, %319 : vector<1x3xf32>
    %321 = math.tanh %320 : vector<1x3xf32>
    %cst_95 = arith.constant dense<0xFF800000> : vector<1xf32>
    %322 = vector.multi_reduction <maximumf>, %321, %cst_95 [1] : vector<1x3xf32> to vector<1xf32>
    %323 = vector.shape_cast %322 : vector<1xf32> to vector<1x1xf32>
    %324 = vector.broadcast %323 : vector<1x1xf32> to vector<1x3xf32>
    %325 = arith.subf %321, %324 : vector<1x3xf32>
    %326 = math.exp %325 : vector<1x3xf32>
    %cst_96 = arith.constant dense<0.000000e+00> : vector<1xf32>
    %327 = vector.multi_reduction <add>, %326, %cst_96 [1] : vector<1x3xf32> to vector<1xf32>
    %328 = vector.shape_cast %327 : vector<1xf32> to vector<1x1xf32>
    %329 = tpu.reciprocal %328 {approx = true} : vector<1x1xf32> -> vector<1x1xf32>
    %330 = vector.broadcast %329 : vector<1x1xf32> to vector<1x3xf32>
    %331 = arith.mulf %326, %330 : vector<1x3xf32>
    %332 = vector.broadcast %331 : vector<1x3xf32> to vector<32x3xf32>
    %333 = arith.mulf %279, %332 : vector<32x3xf32>
    %cst_97 = arith.constant dense<0.000000e+00> : vector<32xf32>
    %334 = vector.multi_reduction <add>, %333, %cst_97 [1] : vector<32x3xf32> to vector<32xf32>
    %335 = vector.shape_cast %334 : vector<32xf32> to vector<32x1xf32>
    %c64_98 = arith.constant 64 : index
    %c0_99 = arith.constant 0 : index
    %336 = vector.load %arg4[%c64_98, %c0_99] : memref<96x1xf32, #tpu.memory_space<vmem>>, vector<32x1xf32>
    %337 = vector.broadcast %336 : vector<32x1xf32> to vector<32x3xf32>
    %338 = arith.mulf %337, %289 : vector<32x3xf32>
    %cst_100 = arith.constant dense<0.000000e+00> : vector<3xf32>
    %339 = vector.multi_reduction <add>, %338, %cst_100 [0] : vector<32x3xf32> to vector<3xf32>
    %340 = vector.shape_cast %339 : vector<3xf32> to vector<1x3xf32>
    %c2_101 = arith.constant 2 : index
    %341 = memref.load %arg6[%c2_101] : memref<3xf32, #tpu.memory_space<smem>>
    %342 = vector.broadcast %341 : f32 to vector<1x3xf32>
    %343 = arith.addf %340, %342 : vector<1x3xf32>
    %344 = math.tanh %343 : vector<1x3xf32>
    %cst_102 = arith.constant dense<0xFF800000> : vector<1xf32>
    %345 = vector.multi_reduction <maximumf>, %344, %cst_102 [1] : vector<1x3xf32> to vector<1xf32>
    %346 = vector.shape_cast %345 : vector<1xf32> to vector<1x1xf32>
    %347 = vector.broadcast %346 : vector<1x1xf32> to vector<1x3xf32>
    %348 = arith.subf %344, %347 : vector<1x3xf32>
    %349 = math.exp %348 : vector<1x3xf32>
    %cst_103 = arith.constant dense<0.000000e+00> : vector<1xf32>
    %350 = vector.multi_reduction <add>, %349, %cst_103 [1] : vector<1x3xf32> to vector<1xf32>
    %351 = vector.shape_cast %350 : vector<1xf32> to vector<1x1xf32>
    %352 = tpu.reciprocal %351 {approx = true} : vector<1x1xf32> -> vector<1x1xf32>
    %353 = vector.broadcast %352 : vector<1x1xf32> to vector<1x3xf32>
    %354 = arith.mulf %349, %353 : vector<1x3xf32>
    %355 = vector.broadcast %354 : vector<1x3xf32> to vector<32x3xf32>
    %356 = arith.mulf %289, %355 : vector<32x3xf32>
    %cst_104 = arith.constant dense<0.000000e+00> : vector<32xf32>
    %357 = vector.multi_reduction <add>, %356, %cst_104 [1] : vector<32x3xf32> to vector<32xf32>
    %358 = vector.shape_cast %357 : vector<32xf32> to vector<32x1xf32>
    %cst_105 = arith.constant 1.000000e+00 : f32
    %359 = vector.broadcast %cst_105 : f32 to vector<1x1xf32>
    %360 = tpu.concatenate %312, %335, %358, %359 in 0 : vector<32x1xf32>, vector<32x1xf32>, vector<32x1xf32>, vector<1x1xf32> -> vector<97x1xf32>
    %361 = vector.broadcast %360 : vector<97x1xf32> to vector<97x2xf32>
    %362 = arith.mulf %154, %361 : vector<97x2xf32>
    %cst_106 = arith.constant dense<0.000000e+00> : vector<2xf32>
    %363 = vector.multi_reduction <add>, %362, %cst_106 [0] : vector<97x2xf32> to vector<2xf32>
    %364 = vector.shape_cast %363 : vector<2xf32> to vector<1x2xf32>
    %365 = tpu.concatenate %259, %364 in 0 : vector<1x2xf32>, vector<1x2xf32> -> vector<2x2xf32>
    %c0_107 = arith.constant 0 : index
    %c0_108 = arith.constant 0 : index
    %366 = vector.load %arg7[%c0_107, %c0_108] : memref<2x2xf32, #tpu.memory_space<vmem>>, vector<2x2xf32>
    tpu.vector_store %arg7[%c0_107, %c0_108], %365 {strides = array<i32>} : memref<2x2xf32, #tpu.memory_space<vmem>>, vector<2x2xf32>,
    return
  }
}

</mosaic_0001>

<bundles_post_ra>
// kernel: _lambda_.1
= control target key start
LH: loop header
LB: loop body
LE: loop exit
PB: predicated region body
PF: predicated region fallthrough
CT: control target
= control target key end

     0   :  { %12 = vsyncpa [#allocation3], 0  ;;  %s5062_s0 = inlined_call_operand.vmem [shape: f32[8,64], index: 0, kind: input, shape index: {}]   ;;  %s5063_s1 = inlined_call_operand.hbm [shape: f32[96,41], index: 1, kind: input, shape index: {}]   ;;  %s5064_s2 = inlined_call_operand.hbm [shape: f32[96,161], index: 2, kind: input, shape index: {}]   ;;  %s5065_s3 = inlined_call_operand.hbm [shape: f32[96,161], index: 3, kind: input, shape index: {}]   ;;  %s5066_s4 = inlined_call_operand.hbm [shape: f32[96,1], index: 4, kind: input, shape index: {}]   ;;  %s5067_s5 = inlined_call_operand.hbm [shape: f32[97,2], index: 5, kind: input, shape index: {}]   ;;  %s5068_s6 = inlined_call_operand.vmem [shape: f32[3], index: 6, kind: input, shape index: {}]   ;;  %s5069_s7 = inlined_call_operand.hbm [shape: f32[2,2], index: 7, kind: output, shape index: {}]  }
   0x1   :  { %13 = vsyncpa [#allocation7], 0 }
   0x2   :  { %14 = vsyncpa [#allocation10], 0 }
   0x3   :  { %15 = vsyncpa [#allocation5], 0 }
   0x4   :  { %16 = vsyncpa [#allocation4], 0  ;;  %s3552_s24 = smov [#allocation6]   ;;  %s3398_s28 = scalar_lea.hbm %s5064_s2, 3072 }
   0x5   :  { %s36_s25 = sshll.u32 %s3552_s24, 4  ;;  %p3399_p0 = scmp.ne.s32.totalorder %s5064_s2, %s3398_s28  ;;  %s37_s25 = int_to_ptr.vmem [resolvable:$true] %s36_s25 }
   0x6   :  { %p3402_p1 = scmp.lt.u32.totalorder %s3398_s28, %s5064_s2 }
   0x8   :  { %p3404_p2 = pnand %p3402_p1, %p3399_p0 }
   0xa   :  { %3407 = shalt.err (!%p3404_p2)
}
   0xb   :  { %s3408_s10 = scalar_lea.vmem %s37_s25, 3072  ;;  %p3413_p4 = scmp.lt.s32.totalorder %s37_s25, %s37_s25 }
   0xc   :  { %p3409_p3 = scmp.ne.s32.totalorder %s37_s25, %s3408_s10  ;;  %p3414_p5 = scmp.lt.s32.totalorder %s3408_s10, %s3408_s10 }
   0xe   :  { %p3415_p6 = por %p3414_p5, %p3413_p4 }
  0x10   :  { %p3416_p7 = pnand %p3415_p6, %p3409_p3 }
  0x12   :  { %3419 = shalt.err (!%p3416_p7)
}
  0x13   :  { %s3553_s11 = smov 256   ;;  %s3554_s12 = smov 16  }
  0x14   :  { %42 = dma.hbm_to_vmem [thread:$0]  %s5064_s2, 3072, %s37_s25, [#allocation7], %s3553_s11, %s3553_s11, %s3554_s12  }
  0x15   :  { %s3555_s15 = smov [#allocation9]   ;;  %s3556_s17 = smov [#allocation2]  }
  0x16   :  { %s60_s16 = sshll.u32 %s3555_s15, 4  ;;  %s24_s18 = sshll.u32 %s3556_s17, 4  ;;  %s61_s16 = int_to_ptr.vmem [resolvable:$true] %s60_s16  ;;  %s25_s18 = int_to_ptr.vmem [resolvable:$true] %s24_s18 }
  0x17   :  { %s3420_s21 = scalar_lea.hbm %s5066_s4, 1536 }
  0x18   :  { %p3421_p8 = scmp.ne.s32.totalorder %s5066_s4, %s3420_s21  ;;  %p3424_p9 = scmp.lt.u32.totalorder %s3420_s21, %s5066_s4 }
  0x1a   :  { %p3426_p10 = pnand %p3424_p9, %p3421_p8 }
  0x1c   :  { %3429 = shalt.err (!%p3426_p10)
}
  0x1d   :  { %s3430_s2 = scalar_lea.vmem %s61_s16, 1536  ;;  %p3435_p12 = scmp.lt.s32.totalorder %s61_s16, %s61_s16 }
  0x1e   :  { %p3431_p11 = scmp.ne.s32.totalorder %s61_s16, %s3430_s2  ;;  %p3436_p13 = scmp.lt.s32.totalorder %s3430_s2, %s3430_s2 }
  0x20   :  { %p3437_p0 = por %p3436_p13, %p3435_p12 }
  0x22   :  { %p3438_p1 = pnand %p3437_p0, %p3431_p11 }
  0x24   :  { %3441 = shalt.err (!%p3438_p1)
}
  0x25   :  { %s3557_s25 = smov 128   ;;  %s3558_s27 = smov 8  }
  0x26   :  { %66 = dma.hbm_to_vmem [thread:$0]  %s5066_s4, 1536, %s61_s16, [#allocation10], %s3557_s25, %s3557_s25, %s3558_s27  }
  0x27   :  { %s3442_s9 = scalar_lea.hbm %s5063_s1, 1536 }
  0x28   :  { %p3443_p2 = scmp.ne.s32.totalorder %s5063_s1, %s3442_s9  ;;  %p3446_p3 = scmp.lt.u32.totalorder %s3442_s9, %s5063_s1 }
  0x2a   :  { %p3448_p4 = pnand %p3446_p3, %p3443_p2 }
  0x2c   :  { %3451 = shalt.err (!%p3448_p4)
}
  0x2d   :  { %s3452_s17 = scalar_lea.vmem %s25_s18, 1536  ;;  %p3457_p6 = scmp.lt.s32.totalorder %s25_s18, %s25_s18 }
  0x2e   :  { %p3453_p5 = scmp.ne.s32.totalorder %s25_s18, %s3452_s17  ;;  %p3458_p7 = scmp.lt.s32.totalorder %s3452_s17, %s3452_s17 }
  0x30   :  { %p3459_p8 = por %p3458_p7, %p3457_p6 }
  0x32   :  { %p3460_p9 = pnand %p3459_p8, %p3453_p5 }
  0x34   :  { %3463 = shalt.err (!%p3460_p9)
}
  0x35   :  { %30 = dma.hbm_to_vmem [thread:$0]  %s5063_s1, 1536, %s25_s18, [#allocation3], %s3557_s25, %s3557_s25, %s3558_s27  }
  0x36   :  { %s3559_s19 = smov [#allocation8]   ;;  %s3560_s21 = smov [#allocation11]  }
  0x37   :  { %s48_s20 = sshll.u32 %s3559_s19, 4  ;;  %s72_s22 = sshll.u32 %s3560_s21, 4  ;;  %s49_s20 = int_to_ptr.vmem [resolvable:$true] %s48_s20  ;;  %s73_s22 = int_to_ptr.vmem [resolvable:$true] %s72_s22 }
  0x38   :  { %s3464_s26 = scalar_lea.hbm %s5065_s3, 3072 }
  0x39   :  { %p3465_p10 = scmp.ne.s32.totalorder %s5065_s3, %s3464_s26  ;;  %p3468_p11 = scmp.lt.u32.totalorder %s3464_s26, %s5065_s3 }
  0x3b   :  { %p3470_p12 = pnand %p3468_p11, %p3465_p10 }
  0x3d   :  { %3473 = shalt.err (!%p3470_p12)
}
  0x3e   :  { %s3474_s1 = scalar_lea.vmem %s49_s20, 3072  ;;  %p3479_p0 = scmp.lt.s32.totalorder %s49_s20, %s49_s20 }
  0x3f   :  { %p3475_p13 = scmp.ne.s32.totalorder %s49_s20, %s3474_s1  ;;  %p3480_p1 = scmp.lt.s32.totalorder %s3474_s1, %s3474_s1 }
  0x41   :  { %p3481_p2 = por %p3480_p1, %p3479_p0 }
  0x43   :  { %p3482_p3 = pnand %p3481_p2, %p3475_p13 }
  0x45   :  { %3485 = shalt.err (!%p3482_p3)
}
  0x46   :  { %54 = dma.hbm_to_vmem [thread:$0]  %s5065_s3, 3072, %s49_s20, [#allocation7], %s3553_s11, %s3553_s11, %s3554_s12  }
  0x47   :  { %s85_s13 = sshll.u32 %s5068_s6, 4  ;;  %s3486_s17 = scalar_lea.hbm %s5067_s5, 1664  ;;  %s86_s13 = int_to_ptr.vmem [resolvable:$true] %s85_s13 }
  0x48   :  { %p3487_p4 = scmp.ne.s32.totalorder %s5067_s5, %s3486_s17  ;;  %p3490_p5 = scmp.lt.u32.totalorder %s3486_s17, %s5067_s5 }
  0x4a   :  { %p3492_p6 = pnand %p3490_p5, %p3487_p4 }
  0x4c   :  { %3495 = shalt.err (!%p3492_p6)
}
  0x4d   :  { %s3496_s3 = scalar_lea.vmem %s73_s22, 1664  ;;  %p3501_p8 = scmp.lt.s32.totalorder %s73_s22, %s73_s22 }
  0x4e   :  { %p3497_p7 = scmp.ne.s32.totalorder %s73_s22, %s3496_s3  ;;  %p3502_p9 = scmp.lt.s32.totalorder %s3496_s3, %s3496_s3 }
  0x50   :  { %p3503_p10 = por %p3502_p9, %p3501_p8 }
  0x52   :  { %p3504_p11 = pnand %p3503_p10, %p3497_p7 }
  0x54   :  { %3507 = shalt.err (!%p3504_p11)
}
  0x55   :  { %78 = dma.hbm_to_vmem [thread:$0]  %s5067_s5, 1664, %s73_s22, [#allocation10], %s3557_s25, %s3557_s25, %s3558_s27  }
  0x56   :  { %s3508_s12 = scalar_lea.vmem %s86_s13, 16  ;;  %p3513_p13 = scmp.lt.s32.totalorder %s86_s13, %s86_s13 }
  0x57   :  { %p3509_p12 = scmp.ne.s32.totalorder %s86_s13, %s3508_s12  ;;  %p3514_p0 = scmp.lt.s32.totalorder %s3508_s12, %s3508_s12 }
  0x59   :  { %p3515_p1 = por %p3514_p0, %p3513_p13 }
  0x5b   :  { %p3516_p2 = pnand %p3515_p1, %p3509_p12 }
  0x5d   :  { %3519 = shalt.err (!%p3516_p2)
}
  0x5e   :  { %s3561_s20 = smov [#allocation12]  }
  0x5f   :  { %88 = dma.vmem_to_smem %s86_s13, 16, %s3561_s20, [#allocation5]  }
  0x60   :  { %3542 = dma.done.wait [#allocation3], 1536  }
  0x61   :  { %3543 = vsyncadd [#allocation3], 4294965760 }
  0x62   :  { %3544 = dma.done.wait [#allocation7], 6144  }
  0x63   :  { %3545 = vsyncadd [#allocation7], 4294961152 }
  0x64   :  { %3546 = dma.done.wait [#allocation10], 3200  }
  0x65   :  { %3547 = vsyncadd [#allocation10], 4294964096 }
  0x66   :  { %3548 = dma.done.wait [#allocation5], 16  }
  0x67   :  { %3549 = vsyncadd [#allocation5], 4294967280 }
  0x68   :  { %107 = sfence }
  0x69   :  { %v3693_v0 = vld [vmem:[%s5062_s0] sm:$0xff]  ;;  %s3562_s27 = smov 127   ;;  %s3563_s22 = smov 125   ;;  %vm130_vm0 = vcmask 203776   ;;  %vm384_vm1 = vcmask 334848   ;;  %vm122_vm2 = vcmask 244736  }
  0x6a   :  { %110 = vrot.lane.b32.xlu0 %v3693_v0, %s3562_s27  ;;  %236 = vrot.lane.b32.xlu1 %v3693_v0, %s3563_s22  ;;  %s3564_s23 = smov 126   ;;  %s3565_s24 = smov 124   ;;  %v126_v1 = vld [vmem:[#allocation2] sm:$0xff]  ;;  %vm374_vm3 = vcmask 228352   ;;  %vm143_vm4 = vcmask 1040384   ;;  %vm3566_vm5 = vmmov 1  }
  0x6b   :  { %2678 = vmatprep.mubr.msk.f32.mxu1 %vm130_vm0, %v126_v1  ;;  %v380_v7 = vld [vmem:[#allocation2 + $0x40] sm:$0xff]  ;;  %vm3721_vm6 = vmpackc.low %vm143_vm4, %vm3566_vm5  ;;  %v5082_v18 = vmov 1.0   ;;  %v127_v25 = vld [vmem:[#allocation2 + $0x8] sm:$0xff]  ;;  %vm248_vm7 = vcmask 236544   ;;  %vm257_vm8 = vcmask 269312   ;;  %v5080_v16 = vmov 0.0|0.0  }
  0x6c   :  { %2712 = vmatprep.mubr.msk.f32.mxu0 %vm384_vm1, %v380_v7  ;;  %v128_v26 = vld [vmem:[#allocation2 + $0x10] sm:$0xff]  ;;  %v129_v37 = vld [vmem:[#allocation2 + $0x18] sm:$0xff]  ;;  %v253_v42 = vld [vmem:[#allocation2 + $0x20] sm:$0xff]  ;;  %vm554_vm9 = vcmask 793600   ;;  %vm732_vm10 = vcmask 211968   ;;  %vm757_vm11 = vcmask 7168  }
  0x6d   :  { %v381_v44 = vld [vmem:[#allocation2 + $0x48] sm:$0xff]  ;;  %v382_v45 = vld [vmem:[#allocation2 + $0x50] sm:$0xff]  ;;  %v383_v46 = vld [vmem:[#allocation2 + $0x58] sm:$0xff]  ;;  %vm959_vm12 = vcmask 195584   ;;  %vm1334_vm13 = vcmask 187392   ;;  %vm1560_vm14 = vcmask 162816  }
  0x6e   :  { %113 = vrot.lane.b32.xlu0 %v3693_v0, %s3564_s23  ;;  %359 = vrot.lane.b32.xlu1 %v3693_v0, %s3565_s24  ;;  %v254_v47 = vld [vmem:[#allocation2 + $0x28] sm:$0xff]  ;;  %v255_v48 = vld [vmem:[#allocation2 + $0x30] sm:$0xff]  ;;  %v256_v49 = vld [vmem:[#allocation2 + $0x38] sm:$0xff]  ;;  %vm2162_vm15 = vcmask 490736   ;;  %vm2267_vm5 = vcmask 375992   ;;  %s4879_s0 = sld [smem:[#allocation12]] }
  0x6f   :  { %s2607_s26 = sld [smem:[#allocation12 + $0x1]]  ;;  %s2608_s2 = sld [smem:[#allocation12 + $0x2]] }
  0x70   :  { %s3571_s28 = smov [#allocation13]  }
  0x71   :  { %s2550_s29 = sshll.u32 %s3571_s28, 4  ;;  %s2551_s29 = int_to_ptr.vmem [resolvable:$true] %s2550_s29 }
  0x72   :  { %s3520_s30 = scalar_lea.vmem %s2551_s29, 32  ;;  %p3525_p4 = scmp.lt.s32.totalorder %s2551_s29, %s2551_s29 }
  0x73   :  { %p3521_p3 = scmp.ne.s32.totalorder %s2551_s29, %s3520_s30  ;;  %p3526_p5 = scmp.lt.s32.totalorder %s3520_s30, %s3520_s30 }
  0x75   :  { %p3527_p6 = por %p3526_p5, %p3525_p4 }
  0x77   :  { %p3528_p7 = pnand %p3527_p6, %p3521_p3 }
  0xdc   :  { %v111_v2 = vpop.permute.xlu0 %110  ;;  %v3704_v3 = vpop.permute.xlu1 %236 }
  0xdd   :  { %116 = vrot.lane.b32.xlu0 %v111_v2, %s3564_s23  ;;  %v249_v33 = vsel %vm248_vm7, %v3693_v0, %v3704_v3 }
  0xe0   :  { %v114_v4 = vpop.permute.xlu0 %113  ;;  %v360_v5 = vpop.permute.xlu1 %359 }
  0xe1   :  { %362 = vrot.lane.b32.xlu0 %v111_v2, %s3565_s24  ;;  %118 = vrot.lane.b32.xlu1 %v114_v4, %s3564_s23  ;;  %v2990_v6 = vpack.i.bf16 %v3704_v3, %v114_v4  ;;  %v123_v10 = vsel %vm122_vm2, %v3693_v0, %v114_v4  ;;  %v375_v17 = vsel %vm374_vm3, %v3693_v0, %v360_v5 }
  0xe5   :  { %368 = vrot.lane.b32.xlu0 %v360_v5, %s3565_s24  ;;  %2991 = vrot.lane.b32.xlu1 %v2990_v6, %s3565_s24 }
  0xe9   :  { %2996 = vrot.lane.b32.xlu0 %v2990_v6, %s3563_s22  ;;  %239 = vrot.lane.b32.xlu1 %v111_v2, %s3563_s22 }
 0x14f   :  { %v117_v8 = vpop.permute.xlu0 %116 }
 0x150   :  { %v124_v9 = vsel %vm122_vm2, %v111_v2, %v117_v8 }
 0x151   :  { %v2782_v11 = vpack.c.bf16 %v124_v9, %v123_v10 }
 0x153   :  { %v119_v12 = vpop.permute.xlu1 %118  ;;  %2783 = vmatprep.subr.bf16.mxu1 %v2782_v11  ;;  %v363_v13 = vpop.permute.xlu0 %362 }
 0x154   :  { %v125_v14 = vsel %vm122_vm2, %v114_v4, %v119_v12  ;;  %v376_v15 = vsel %vm374_vm3, %v111_v2, %v363_v13  ;;  %2785 = vmatpush3.bf16.msra.mxu1 %v2782_v11 }
 0x155   :  { %v2786_v19 = vpack.c.bf16 %v5082_v18, %v125_v14  ;;  %v2800_v20 = vpack.c.bf16 %v376_v15, %v375_v17 }
 0x157   :  { %v2992_v21 = vpop.permute.xlu1 %2991  ;;  %2788 = vmatprep.subr.msk.bf16.mxu1 %vm3721_vm6, %v2786_v19  ;;  %2801 = vmatprep.subr.bf16.mxu0 %v2800_v20  ;;  %v369_v22 = vpop.permute.xlu0 %368 }
 0x158   :  { %v2994_v23 = vunpack.i.h.bf16 %v2992_v21  ;;  %v2993_v24 = vunpack.i.l.bf16 %v2992_v21  ;;  %2791 = vmatpush3.bf16.msk.msra.mxu1 %vm3721_vm6, %v2786_v19  ;;  %2803 = vmatpush3.bf16.msra.mxu0 %v2800_v20  ;;  %v379_v29 = vsel %vm374_vm3, %v360_v5, %v369_v22 }
 0x159   :  { %v2808_v39 = vpack.c.bf16 %v5082_v18, %v379_v29 }
 0x15a   :  { %v377_v27 = vsel %vm374_vm3, %v114_v4, %v2993_v24  ;;  %v378_v28 = vsel %vm374_vm3, %v3704_v3, %v2994_v23 }
 0x15b   :  { %v240_v30 = vpop.permute.xlu1 %239  ;;  %2679 = vmatmul.mubr.msk.f32.vlgmr.msra.gmra.mrb[0].mxu1 %vm130_vm0, %v127_v25  ;;  %v2997_v31 = vpop.permute.xlu0 %2996  ;;  %v2804_v32 = vpack.c.bf16 %v378_v28, %v377_v27 }
 0x15c   :  { %v250_v34 = vsel %vm248_vm7, %v111_v2, %v240_v30  ;;  %v2999_v35 = vunpack.i.h.bf16 %v2997_v31  ;;  %v2998_v36 = vunpack.i.l.bf16 %v2997_v31  ;;  %2681 = vmatprep.mubr.msk.f32.mxu1 %vm130_vm0, %v128_v26 }
 0x15d   :  { %v2792_v38 = vpack.c.bf16 %v250_v34, %v249_v33  ;;  %2805 = vmatprep.subr.bf16.mxu0 %v2804_v32 }
 0x15e   :  { %2807 = vmatpush3.bf16.msra.mxu0 %v2804_v32  ;;  %v251_v40 = vsel %vm248_vm7, %v114_v4, %v2998_v36  ;;  %v252_v41 = vsel %vm248_vm7, %v3704_v3, %v2999_v35 }
 0x15f   :  { %2682 = vmatmul.mubr.msk.f32.gmra.mrb[2].mxu1 %vm130_vm0, %v129_v37  ;;  %2793 = vmatprep.subr.bf16.mxu1 %v2792_v38  ;;  %v2796_v43 = vpack.c.bf16 %v252_v41, %v251_v40  ;;  %v550_v41 = vld [vmem:[#allocation6] sm:$0xff]  ;;  %vm2175_vm0 = vcmask 474344  }
 0x160   :  { %2810 = vmatprep.subr.msk.bf16.mxu0 %vm3721_vm6, %v2808_v39  ;;  %2795 = vmatpush3.bf16.msra.mxu1 %v2792_v38 }
 0x161   :  { %2797 = vmatprep.subr.bf16.mxu1 %v2796_v43  ;;  %2694 = vmatprep.mubr.msk.f32.mxu1 %vm257_vm8, %v253_v42 }
 0x162   :  { %2813 = vmatpush3.bf16.msk.msra.mxu0 %vm3721_vm6, %v2808_v39  ;;  %vm1743_vm6 = vcmask 15360  }
 0x163   :  { %2838 = vmatprep.subr.bf16.mxu0 %v5080_v16 }
 0x164   :  { %2799 = vmatpush3.bf16.msra.mxu1 %v2796_v43 }
 0x165   :  { %2713 = vmatmul.mubr.msk.f32.vlgmr.msra.gmra.mrb[0].mxu0 %vm384_vm1, %v381_v44  ;;  %2692 = vmatprep.subr.msk.mxu1 %vm143_vm4, %v5082_v18 }
 0x166   :  { %2715 = vmatprep.mubr.msk.f32.mxu0 %vm384_vm1, %v382_v45 }
 0x168   :  { %2693 = vmatpush3.msk.msra.mxu1 %vm143_vm4, %v5082_v18 }
 0x169   :  { %2716 = vmatmul.mubr.msk.f32.gmra.mrb[2].mxu0 %vm384_vm1, %v383_v46  ;;  %2695 = vmatmul.mubr.msk.f32.vlgmr.msra.gmra.mrb[4].mxu1 %vm257_vm8, %v254_v47  ;;  %vm2188_vm1 = vcmask 457952  }
 0x16a   :  { %2697 = vmatprep.mubr.msk.f32.mxu1 %vm257_vm8, %v255_v48 }
 0x16d   :  { %2698 = vmatmul.mubr.msk.f32.gmra.mrb[6].mxu1 %vm257_vm8, %v256_v49 }
 0x16e   :  { %2744 = vmatprep.mubr.msk.f32.mxu1 %vm554_vm9, %v550_v41 }
 0x22e   :  { %v2680_v50 = vpop.f32.mrb[0].mxu1 }
 0x22f   :  { %v3762_v51 = vmax.f32 %v2680_v50, 0.0  ;;  %v213_v52 = vpop.f32.mrb[1].mxu1 }
 0x230   :  { %v3764_v53 = vmax.f32 %v213_v52, 0.0 }
 0x232   :  { %v2683_v54 = vpop.f32.mrb[2].mxu1  ;;  %v3000_v55 = vpack.i.bf16 %v3762_v51, %v3764_v53 }
 0x233   :  { %v3768_v56 = vmax.f32 %v2683_v54, 0.0  ;;  %v223_v57 = vpop.f32.mrb[3].mxu1 }
 0x234   :  { %v3770_v58 = vmax.f32 %v223_v57, 0.0  ;;  %3001 = vrot.lane.b32.xlu1 %v3000_v55, %s3562_s27 }
 0x236   :  { %v3005_v59 = vpack.i.bf16 %v3768_v56, %v3770_v58 }
 0x238   :  { %3011 = vrot.lane.b32.xlu1 %v3000_v55, %s3564_s23  ;;  %3006 = vrot.lane.b32.xlu0 %v3005_v59, %s3562_s27  ;;  %v2714_v60 = vpop.f32.mrb[0].mxu0 }
 0x239   :  { %v3777_v61 = vmax.f32 %v2714_v60, 0.0  ;;  %v463_v62 = vpop.f32.mrb[1].mxu0 }
 0x23a   :  { %v3779_v63 = vmax.f32 %v463_v62, 0.0 }
 0x23c   :  { %3016 = vrot.lane.b32.xlu0 %v3005_v59, %s3564_s23  ;;  %v2717_v0 = vpop.f32.mrb[2].mxu0  ;;  %v3020_v1 = vpack.i.bf16 %v3777_v61, %v3779_v63  ;;  %v2696_v2 = vpop.f32.mrb[4].mxu1 }
 0x23d   :  { %v3784_v3 = vmax.f32 %v2717_v0, 0.0  ;;  %v473_v4 = vpop.f32.mrb[3].mxu0  ;;  %v336_v5 = vpop.f32.mrb[5].mxu1  ;;  %v3789_v7 = vmax.f32 %v2696_v2, 0.0 }
 0x23e   :  { %v3786_v6 = vmax.f32 %v473_v4, 0.0  ;;  %3021 = vrot.lane.b32.xlu1 %v3020_v1, %s3562_s27  ;;  %v3791_v8 = vmax.f32 %v336_v5, 0.0 }
 0x240   :  { %v3025_v9 = vpack.i.bf16 %v3784_v3, %v3786_v6  ;;  %v2699_v10 = vpop.f32.mrb[6].mxu1  ;;  %v3050_v14 = vpack.i.bf16 %v3789_v7, %v3791_v8 }
 0x241   :  { %v346_v11 = vpop.f32.mrb[7].mxu1  ;;  %v3797_v12 = vmax.f32 %v2699_v10, 0.0 }
 0x242   :  { %3026 = vrot.lane.b32.xlu0 %v3025_v9, %s3562_s27  ;;  %3031 = vrot.lane.b32.xlu1 %v3020_v1, %s3564_s23  ;;  %v3799_v13 = vmax.f32 %v346_v11, 0.0 }
 0x244   :  { %v3055_v15 = vpack.i.bf16 %v3797_v12, %v3799_v13 }
 0x246   :  { %3036 = vrot.lane.b32.xlu0 %v3025_v9, %s3564_s23  ;;  %3051 = vrot.lane.b32.xlu1 %v3050_v14, %s3562_s27 }
 0x24a   :  { %3041 = vrot.lane.b32.xlu0 %v3020_v1, %s3563_s22  ;;  %3056 = vrot.lane.b32.xlu1 %v3055_v15, %s3562_s27 }
 0x24e   :  { %3046 = vrot.lane.b32.xlu0 %v3025_v9, %s3563_s22  ;;  %3061 = vrot.lane.b32.xlu1 %v3050_v14, %s3564_s23 }
 0x252   :  { %3066 = vrot.lane.b32.xlu0 %v3020_v1, %s3565_s24  ;;  %3081 = vrot.lane.b32.xlu1 %v3055_v15, %s3564_s23 }
 0x256   :  { %3071 = vrot.lane.b32.xlu0 %v3025_v9, %s3565_s24 }
 0x25a   :  { %3076 = vrot.lane.b32.xlu0 %v3050_v14, %s3563_s22 }
 0x25e   :  { %3086 = vrot.lane.b32.xlu0 %v3055_v15, %s3563_s22 }
 0x2a6   :  { %v3817_v17 = vpop.permute.xlu1 %3001 }
 0x2a7   :  { %v3004_v19 = vunpack.i.h.bf16 %v3817_v17  ;;  %v3003_v20 = vunpack.i.l.bf16 %v3817_v17  ;;  %3091 = vrot.lane.b32.xlu1 %v3817_v17, %s3564_s23 }
 0x2aa   :  { %v3821_v21 = vpop.permute.xlu1 %3011  ;;  %v3823_v22 = vpop.permute.xlu0 %3006 }
 0x2ab   :  { %v3014_v23 = vunpack.i.h.bf16 %v3821_v21  ;;  %v3013_v24 = vunpack.i.l.bf16 %v3821_v21  ;;  %v3009_v25 = vunpack.i.h.bf16 %v3823_v22  ;;  %v3008_v26 = vunpack.i.l.bf16 %v3823_v22  ;;  %3096 = vrot.lane.b32.xlu1 %v3823_v22, %s3564_s23 }
 0x2ad   :  { %v538_v27 = vsel %vm374_vm3, %v3764_v53, %v3013_v24  ;;  %v539_v28 = vsel %vm374_vm3, %v3762_v51, %v3014_v23 }
 0x2ae   :  { %v3839_v29 = vpop.permute.xlu0 %3016  ;;  %v2814_v30 = vpack.c.bf16 %v539_v28, %v538_v27 }
 0x2af   :  { %v3019_v31 = vunpack.i.h.bf16 %v3839_v29  ;;  %v3018_v32 = vunpack.i.l.bf16 %v3839_v29  ;;  %3106 = vrot.lane.b32.xlu0 %v3839_v29, %s3564_s23  ;;  %3101 = vrot.lane.b32.xlu1 %v3821_v21, %s3564_s23 }
 0x2b0   :  { %2815 = vmatprep.subr.bf16.mxu1 %v2814_v30  ;;  %v3845_v33 = vpop.permute.xlu1 %3021 }
 0x2b1   :  { %2817 = vmatpush3.bf16.msra.mxu1 %v2814_v30  ;;  %v3024_v34 = vunpack.i.h.bf16 %v3845_v33  ;;  %v3023_v35 = vunpack.i.l.bf16 %v3845_v33  ;;  %v540_v36 = vsel %vm374_vm3, %v3770_v58, %v3018_v32  ;;  %v541_v37 = vsel %vm374_vm3, %v3768_v56, %v3019_v31 }
 0x2b2   :  { %v2818_v38 = vpack.c.bf16 %v541_v37, %v540_v36 }
 0x2b3   :  { %3111 = vrot.lane.b32.xlu1 %v3845_v33, %s3565_s24 }
 0x2b4   :  { %v3861_v39 = vpop.permute.xlu0 %3026  ;;  %v3863_v40 = vpop.permute.xlu1 %3031  ;;  %2819 = vmatprep.subr.bf16.mxu1 %v2818_v38 }
 0x2b5   :  { %2821 = vmatpush3.bf16.msra.mxu1 %v2818_v38  ;;  %3116 = vrot.lane.b32.xlu0 %v3861_v39, %s3565_s24 }
 0x2b7   :  { %3121 = vrot.lane.b32.xlu1 %v3863_v40, %s3565_s24 }
 0x2b8   :  { %v3872_v46 = vpop.permute.xlu0 %3036  ;;  %v3874_v47 = vpop.permute.xlu1 %3051 }
 0x2b9   :  { %v3054_v50 = vunpack.i.h.bf16 %v3874_v47  ;;  %v3053_v52 = vunpack.i.l.bf16 %v3874_v47  ;;  %3126 = vrot.lane.b32.xlu0 %v3872_v46, %s3565_s24 }
 0x2bb   :  { %3141 = vrot.lane.b32.xlu1 %v3874_v47, %s3563_s22 }
 0x2bc   :  { %v3884_v54 = vpop.permute.xlu0 %3041  ;;  %v3886_v55 = vpop.permute.xlu1 %3056 }
 0x2bd   :  { %v3059_v60 = vunpack.i.h.bf16 %v3886_v55  ;;  %v3058_v62 = vunpack.i.l.bf16 %v3886_v55  ;;  %3131 = vrot.lane.b32.xlu0 %v3884_v54, %s3565_s24 }
 0x2bf   :  { %3146 = vrot.lane.b32.xlu1 %v3886_v55, %s3563_s22 }
 0x2c0   :  { %v3896_v0 = vpop.permute.xlu0 %3046  ;;  %v3898_v1 = vpop.permute.xlu1 %3061 }
 0x2c1   :  { %v3064_v5 = vunpack.i.h.bf16 %v3898_v1  ;;  %v3063_v9 = vunpack.i.l.bf16 %v3898_v1  ;;  %3136 = vrot.lane.b32.xlu0 %v3896_v0, %s3565_s24 }
 0x2c3   :  { %3151 = vrot.lane.b32.xlu1 %v3898_v1, %s3563_s22 }
 0x2c4   :  { %v3908_v10 = vpop.permute.xlu0 %3066  ;;  %v3910_v11 = vpop.permute.xlu1 %3081 }
 0x2c5   :  { %v3069_v14 = vunpack.i.h.bf16 %v3908_v10  ;;  %v3068_v15 = vunpack.i.l.bf16 %v3908_v10  ;;  %3156 = vrot.lane.b32.xlu0 %v3908_v10, %s3565_s24 }
 0x2c7   :  { %3166 = vrot.lane.b32.xlu1 %v3910_v11, %s3563_s22  ;;  %v960_v29 = vsel %vm959_vm12, %v3779_v63, %v3068_v15 }
 0x2c8   :  { %v3920_v30 = vpop.permute.xlu0 %3071 }
 0x2c9   :  { %v3074_v36 = vunpack.i.h.bf16 %v3920_v30  ;;  %v3073_v37 = vunpack.i.l.bf16 %v3920_v30  ;;  %3161 = vrot.lane.b32.xlu0 %v3920_v30, %s3565_s24  ;;  %v983_v30 = vld [vmem:[#allocation6 + $0x98] sm:$0xff] }
 0x2cc   :  { %v3928_v38 = vpop.permute.xlu0 %3076 }
 0x2cd   :  { %v5070_v41 = vunpack.i.h.bf16 %v3928_v38  ;;  %v5071_v4 = vunpack.i.l.bf16 %v3928_v38  ;;  %3171 = vrot.lane.b32.xlu1 %v3928_v38, %s3563_s22 }
 0x2cf   :  { %v734_v2 = vsel %vm732_vm10, %v3789_v7, %v5070_v41  ;;  %v733_v59 = vsel %vm732_vm10, %v3791_v8, %v5071_v4 }
 0x2d0   :  { %v3942_v57 = vpop.permute.xlu0 %3086  ;;  %v2839_v49 = vpack.c.bf16 %v734_v2, %v733_v59 }
 0x2d1   :  { %v5072_v48 = vunpack.i.h.bf16 %v3942_v57  ;;  %v5073_v45 = vunpack.i.l.bf16 %v3942_v57  ;;  %3176 = vrot.lane.b32.xlu0 %v3942_v57, %s3563_s22 }
 0x2d2   :  { %2840 = vmatpush1.bf16.msra.mxu0 %v2839_v49  ;;  %v750_v49 = vld [vmem:[#allocation6 + $0x48] sm:$0xff] }
 0x2d3   :  { %v736_v41 = vsel %vm732_vm10, %v3797_v12, %v5072_v48  ;;  %v735_v4 = vsel %vm732_vm10, %v3799_v13, %v5073_v45  ;;  %2841 = vmatprep.subr.bf16.mxu0 %v5080_v16  ;;  %2583 = vmatprep.mubr.msk.f32.mxu0 %vm757_vm11, %v750_v49 }
 0x2d4   :  { %v2842_v59 = vpack.c.bf16 %v736_v41, %v735_v4 }
 0x2d6   :  { %2843 = vmatpush1.bf16.msra.mxu0 %v2842_v59 }
 0x2d7   :  { %2844 = vmatprep.subr.bf16.mxu0 %v5080_v16 }
 0x319   :  { %v3092_v2 = vpop.permute.xlu1 %3091 }
 0x31a   :  { %v3094_v48 = vunpack.i.h.bf16 %v3092_v2  ;;  %v3093_v28 = vunpack.i.l.bf16 %v3092_v2 }
 0x31c   :  { %v542_v45 = vsel %vm374_vm3, %v3003_v20, %v3093_v28  ;;  %v543_v4 = vsel %vm374_vm3, %v3004_v19, %v3094_v48 }
 0x31d   :  { %v3097_v41 = vpop.permute.xlu1 %3096  ;;  %v2822_v27 = vpack.c.bf16 %v543_v4, %v542_v45 }
 0x31e   :  { %v3099_v59 = vunpack.i.h.bf16 %v3097_v41  ;;  %v3098_v44 = vunpack.i.l.bf16 %v3097_v41  ;;  %v551_v41 = vld [vmem:[#allocation6 + $0x10] sm:$0xff] }
 0x31f   :  { %2823 = vmatprep.subr.bf16.mxu1 %v2822_v27 }
 0x320   :  { %2825 = vmatpush3.bf16.msra.mxu1 %v2822_v27  ;;  %v544_v49 = vsel %vm374_vm3, %v3008_v26, %v3098_v44  ;;  %v545_v2 = vsel %vm374_vm3, %v3009_v25, %v3099_v59 }
 0x321   :  { %v3107_v43 = vpop.permute.xlu0 %3106  ;;  %v3102_v20 = vpop.permute.xlu1 %3101  ;;  %v2826_v28 = vpack.c.bf16 %v545_v2, %v544_v49  ;;  %v552_v49 = vld [vmem:[#allocation6 + $0x20] sm:$0xff] }
 0x322   :  { %v3109_v17 = vunpack.i.h.bf16 %v3107_v43  ;;  %v3108_v42 = vunpack.i.l.bf16 %v3107_v43  ;;  %v3104_v19 = vunpack.i.h.bf16 %v3102_v20  ;;  %v3103_v48 = vunpack.i.l.bf16 %v3102_v20 }
 0x323   :  { %2827 = vmatprep.subr.bf16.mxu1 %v2826_v28 }
 0x324   :  { %2829 = vmatpush3.bf16.msra.mxu1 %v2826_v28  ;;  %v546_v45 = vsel %vm374_vm3, %v3013_v24, %v3103_v48  ;;  %v547_v26 = vsel %vm374_vm3, %v3014_v23, %v3104_v19  ;;  %v548_v22 = vsel %vm374_vm3, %v3018_v32, %v3108_v42  ;;  %v549_v25 = vsel %vm374_vm3, %v3019_v31, %v3109_v17 }
 0x325   :  { %v3112_v43 = vpop.permute.xlu1 %3111  ;;  %v2830_v44 = vpack.c.bf16 %v547_v26, %v546_v45  ;;  %v2834_v4 = vpack.c.bf16 %v549_v25, %v548_v22  ;;  %v961_v23 = vsel %vm959_vm12, %v3777_v61, %v3069_v14  ;;  %v963_v19 = vsel %vm959_vm12, %v3784_v3, %v3074_v36  ;;  %v553_v22 = vld [vmem:[#allocation6 + $0x30] sm:$0xff] }
 0x326   :  { %v3114_v2 = vunpack.i.h.bf16 %v3112_v43  ;;  %v2863_v17 = vpack.c.bf16 %v961_v23, %v960_v29  ;;  %v962_v48 = vsel %vm959_vm12, %v3786_v6, %v3073_v37  ;;  %v3113_v45 = vunpack.i.l.bf16 %v3112_v43 }
 0x327   :  { %v3985_v27 = vpop.permute.xlu0 %3116  ;;  %2831 = vmatprep.subr.bf16.mxu1 %v2830_v44  ;;  %v2866_v29 = vpack.c.bf16 %v963_v19, %v962_v48 }
 0x328   :  { %2833 = vmatpush3.bf16.msra.mxu1 %v2830_v44  ;;  %v981_v44 = vld [vmem:[#allocation6 + $0x88] sm:$0xff]  ;;  %v965_v43 = vsel %vm959_vm12, %v3024_v34, %v3114_v2 }
 0x329   :  { %v3987_v24 = vpop.permute.xlu1 %3121  ;;  %2835 = vmatprep.subr.bf16.mxu1 %v2834_v4 }
 0x32a   :  { %v3124_v33 = vunpack.i.h.bf16 %v3987_v24 }
 0x32b   :  { %v3989_v21 = vpop.permute.xlu0 %3126 }
 0x32c   :  { %2837 = vmatpush3.bf16.msra.mxu1 %v2834_v4 }
 0x32d   :  { %v3142_v31 = vpop.permute.xlu1 %3141  ;;  %2742 = vmatprep.subr.msk.mxu1 %vm143_vm4, %v5082_v18 }
 0x32e   :  { %v3144_v32 = vunpack.i.h.bf16 %v3142_v31  ;;  %v3143_v42 = vunpack.i.l.bf16 %v3142_v31  ;;  %v964_v31 = vsel %vm959_vm12, %v3023_v35, %v3113_v45 }
 0x32f   :  { %v4001_v59 = vpop.permute.xlu0 %3131 }
 0x330   :  { %v738_v20 = vsel %vm732_vm10, %v3054_v50, %v3144_v32  ;;  %v737_v28 = vsel %vm732_vm10, %v3053_v52, %v3143_v42  ;;  %2743 = vmatpush3.msk.msra.mxu1 %vm143_vm4, %v5082_v18  ;;  %v3119_v32 = vunpack.i.h.bf16 %v3985_v27  ;;  %v3118_v42 = vunpack.i.l.bf16 %v3985_v27 }
 0x331   :  { %2745 = vmatmul.mubr.msk.f32.vlgmr.msra.gmra.mrb[8].mxu1 %vm554_vm9, %v551_v41  ;;  %2862 = vmatprep.subr.bf16.mxu1 %v5080_v16  ;;  %v3147_v47 = vpop.permute.xlu1 %3146  ;;  %v2845_v50 = vpack.c.bf16 %v738_v20, %v737_v28  ;;  %v5086_v27 = vunpack.i.h.bf16 %v3861_v39  ;;  %v5087_v20 = vunpack.i.l.bf16 %v3861_v39  ;;  %v5089_v39 = vunpack.i.h.bf16 %v3910_v11 }
 0x332   :  { %v3149_v52 = vunpack.i.h.bf16 %v3147_v47  ;;  %v3148_v26 = vunpack.i.l.bf16 %v3147_v47  ;;  %2864 = vmatpush1.bf16.msra.mxu1 %v2863_v17  ;;  %2747 = vmatprep.mubr.msk.f32.mxu1 %vm554_vm9, %v552_v49  ;;  %v3123_v17 = vunpack.i.l.bf16 %v3987_v24  ;;  %v5090_v24 = vunpack.i.l.bf16 %v3910_v11 }
 0x333   :  { %v4022_v25 = vpop.permute.xlu0 %3136  ;;  %2846 = vmatpush1.bf16.msra.mxu0 %v2845_v50  ;;  %2865 = vmatprep.subr.bf16.mxu1 %v5080_v16  ;;  %v967_v2 = vsel %vm959_vm12, %v5086_v27, %v3119_v32  ;;  %v966_v28 = vsel %vm959_vm12, %v5087_v20, %v3118_v42 }
 0x334   :  { %v740_v4 = vsel %vm732_vm10, %v3059_v60, %v3149_v52  ;;  %v739_v23 = vsel %vm732_vm10, %v3058_v62, %v3148_v26  ;;  %2847 = vmatprep.subr.bf16.mxu0 %v5080_v16  ;;  %v2869_v62 = vpack.c.bf16 %v965_v43, %v964_v31  ;;  %v2872_v26 = vpack.c.bf16 %v967_v2, %v966_v28 }
 0x335   :  { %2748 = vmatmul.mubr.msk.f32.gmra.mrb[10].mxu1 %vm554_vm9, %v553_v22  ;;  %v3152_v34 = vpop.permute.xlu1 %3151  ;;  %v2848_v41 = vpack.c.bf16 %v740_v4, %v739_v23  ;;  %v5091_v22 = vunpack.i.l.bf16 %v3863_v40  ;;  %v3129_v43 = vunpack.i.h.bf16 %v3989_v21  ;;  %v3128_v4 = vunpack.i.l.bf16 %v3989_v21 }
 0x336   :  { %v3154_v60 = vunpack.i.h.bf16 %v3152_v34  ;;  %v3153_v49 = vunpack.i.l.bf16 %v3152_v34  ;;  %2867 = vmatpush1.bf16.msra.mxu1 %v2866_v29  ;;  %2588 = vmatprep.mubr.msk.f32.mxu1 %vm257_vm8, %v981_v44 }
 0x337   :  { %2849 = vmatpush1.bf16.msra.mxu0 %v2848_v41  ;;  %2868 = vmatprep.subr.bf16.mxu1 %v5080_v16  ;;  %v4058_v19 = vpop.permute.xlu0 %3156  ;;  %v968_v44 = vsel %vm959_vm12, %v5091_v22, %v3123_v17  ;;  %v5093_v41 = vunpack.i.l.bf16 %v3872_v46  ;;  %v5096_v17 = vunpack.i.h.bf16 %v3884_v54 }
 0x338   :  { %v742_v35 = vsel %vm732_vm10, %v3064_v5, %v3154_v60  ;;  %v741_v55 = vsel %vm732_vm10, %v3063_v9, %v3153_v49  ;;  %2850 = vmatprep.subr.bf16.mxu0 %v5080_v16  ;;  %v5088_v9 = vunpack.i.h.bf16 %v3863_v40  ;;  %v5092_v40 = vunpack.i.h.bf16 %v3872_v46 }
 0x339   :  { %v3167_v5 = vpop.permute.xlu1 %3166  ;;  %v2851_v48 = vpack.c.bf16 %v742_v35, %v741_v55  ;;  %v970_v21 = vsel %vm959_vm12, %v5093_v41, %v3128_v4  ;;  %v3134_v60 = vunpack.i.h.bf16 %v4001_v59  ;;  %v3133_v49 = vunpack.i.l.bf16 %v4001_v59  ;;  %v980_v41 = vld [vmem:[#allocation6 + $0x80] sm:$0xff] }
 0x33a   :  { %v3169_v1 = vunpack.i.h.bf16 %v3167_v5  ;;  %v3168_v45 = vunpack.i.l.bf16 %v3167_v5  ;;  %2870 = vmatpush1.bf16.msra.mxu1 %v2869_v62  ;;  %v969_v47 = vsel %vm959_vm12, %v5088_v9, %v3124_v33  ;;  %v971_v34 = vsel %vm959_vm12, %v5092_v40, %v3129_v43  ;;  %v749_v43 = vld [vmem:[#allocation6 + $0x40] sm:$0xff]  ;;  %v754_v40 = vld [vmem:[#allocation6 + $0x68] sm:$0xff] }
 0x33b   :  { %2852 = vmatpush1.bf16.msra.mxu0 %v2851_v48  ;;  %2871 = vmatprep.subr.bf16.mxu1 %v5080_v16  ;;  %v3162_v29 = vpop.permute.xlu0 %3161  ;;  %v2875_v42 = vpack.c.bf16 %v969_v47, %v968_v44  ;;  %v5094_v33 = vunpack.i.h.bf16 %v3928_v38  ;;  %v5095_v55 = vunpack.i.l.bf16 %v3928_v38  ;;  %v2878_v28 = vpack.c.bf16 %v971_v34, %v970_v21  ;;  %v756_v34 = vld [vmem:[#allocation6 + $0x78] sm:$0xff]  ;;  %v985_v21 = vld [vmem:[#allocation6 + $0xa8] sm:$0xff] }
 0x33c   :  { %v744_v50 = vsel %vm732_vm10, %v5089_v39, %v3169_v1  ;;  %v743_v52 = vsel %vm732_vm10, %v5090_v24, %v3168_v45  ;;  %2853 = vmatprep.subr.bf16.mxu0 %v5080_v16  ;;  %v973_v59 = vsel %vm959_vm12, %v5096_v17, %v3134_v60  ;;  %v5097_v5 = vunpack.i.l.bf16 %v3884_v54  ;;  %v984_v60 = vld [vmem:[#allocation6 + $0xa0] sm:$0xff] }
 0x33d   :  { %v2854_v23 = vpack.c.bf16 %v744_v50, %v743_v52  ;;  %v3139_v38 = vunpack.i.h.bf16 %v4022_v25  ;;  %v3138_v1 = vunpack.i.l.bf16 %v4022_v25  ;;  %v5098_v45 = vunpack.i.h.bf16 %v3942_v57 }
 0x33e   :  { %2873 = vmatpush1.bf16.msra.mxu1 %v2872_v26  ;;  %v972_v48 = vsel %vm959_vm12, %v5097_v5, %v3133_v49  ;;  %v5099_v47 = vunpack.i.l.bf16 %v3942_v57  ;;  %v5100_v24 = vunpack.i.h.bf16 %v3896_v0  ;;  %v5101_v52 = vunpack.i.l.bf16 %v3896_v0  ;;  %v987_v49 = vld [vmem:[#allocation6 + $0xb8] sm:$0xff] }
 0x33f   :  { %v3172_v31 = vpop.permute.xlu1 %3171  ;;  %2855 = vmatpush1.bf16.msra.mxu0 %v2854_v23  ;;  %2874 = vmatprep.subr.bf16.mxu1 %v5080_v16  ;;  %v2881_v54 = vpack.c.bf16 %v973_v59, %v972_v48  ;;  %v3159_v22 = vunpack.i.h.bf16 %v4058_v19  ;;  %v3158_v57 = vunpack.i.l.bf16 %v4058_v19  ;;  %v5074_v44 = vmov 0.0   ;;  %v752_v23 = vld [vmem:[#allocation6 + $0x58] sm:$0xff] }
 0x340   :  { %v3174_v11 = vunpack.i.h.bf16 %v3172_v31  ;;  %v3173_v32 = vunpack.i.l.bf16 %v3172_v31  ;;  %2856 = vmatprep.subr.bf16.mxu0 %v5080_v16  ;;  %v975_v25 = vsel %vm959_vm12, %v5100_v24, %v3139_v38  ;;  %v974_v26 = vsel %vm959_vm12, %v5101_v52, %v3138_v1 }
 0x341   :  { %v2884_v4 = vpack.c.bf16 %v975_v25, %v974_v26  ;;  %v977_v0 = vsel %vm959_vm12, %v3069_v14, %v3159_v22  ;;  %v976_v31 = vsel %vm959_vm12, %v3068_v15, %v3158_v57  ;;  %v3163_v19 = vunpack.i.l.bf16 %v3162_v29  ;;  %v753_v15 = vld [vmem:[#allocation6 + $0x60] sm:$0xff] }
 0x342   :  { %v746_v35 = vsel %vm732_vm10, %v5094_v33, %v3174_v11  ;;  %v745_v62 = vsel %vm732_vm10, %v5095_v55, %v3173_v32  ;;  %2876 = vmatpush1.bf16.msra.mxu1 %v2875_v42  ;;  %v3164_v11 = vunpack.i.h.bf16 %v3162_v29  ;;  %v751_v32 = vld [vmem:[#allocation6 + $0x50] sm:$0xff]  ;;  %v2887_v42 = vpack.c.bf16 %v977_v0, %v976_v31 }
 0x343   :  { %v3177_v27 = vpop.permute.xlu0 %3176  ;;  %v2857_v2 = vpack.c.bf16 %v746_v35, %v745_v62  ;;  %2877 = vmatprep.subr.bf16.mxu1 %v5080_v16  ;;  %v978_v14 = vsel %vm959_vm12, %v3073_v37, %v3163_v19  ;;  %v982_v37 = vld [vmem:[#allocation6 + $0x90] sm:$0xff] }
 0x344   :  { %v3179_v46 = vunpack.i.h.bf16 %v3177_v27  ;;  %v3178_v20 = vunpack.i.l.bf16 %v3177_v27  ;;  %v979_v10 = vsel %vm959_vm12, %v3074_v36, %v3164_v11  ;;  %v755_v36 = vld [vmem:[#allocation6 + $0x70] sm:$0xff] }
 0x345   :  { %2858 = vmatpush1.bf16.msra.mxu0 %v2857_v2  ;;  %v2890_v29 = vpack.c.bf16 %v979_v10, %v978_v14  ;;  %v986_v33 = vld [vmem:[#allocation6 + $0xb0] sm:$0xff] }
 0x346   :  { %v748_v9 = vsel %vm732_vm10, %v5098_v45, %v3179_v46  ;;  %v747_v39 = vsel %vm732_vm10, %v5099_v47, %v3178_v20  ;;  %2879 = vmatpush1.bf16.msra.mxu1 %v2878_v28  ;;  %2859 = vmatprep.subr.bf16.mxu0 %v5080_v16 }
 0x347   :  { %v2860_v50 = vpack.c.bf16 %v748_v9, %v747_v39  ;;  %2880 = vmatprep.subr.bf16.mxu1 %v5080_v16 }
 0x349   :  { %2861 = vmatpush1.bf16.msra.mxu0 %v2860_v50 }
 0x34a   :  { %2882 = vmatpush1.bf16.msra.mxu1 %v2881_v54  ;;  %802 = vmatprep.subr.mxu0 %v5074_v44 }
 0x34b   :  { %2883 = vmatprep.subr.bf16.mxu1 %v5080_v16 }
 0x34d   :  { %2582 = vmatpush1.msk.msra.mxu0 %vm143_vm4, %v5082_v18 }
 0x34e   :  { %2885 = vmatpush1.bf16.msra.mxu1 %v2884_v4  ;;  %835 = vmatmul.mubr.f32.vlgmr.msra.gmra.mrb[4].mxu0 %v749_v43 }
 0x34f   :  { %2886 = vmatprep.subr.bf16.mxu1 %v5080_v16  ;;  %2584 = vmatprep.mubr.msk.f32.mxu0 %vm757_vm11, %v752_v23 }
 0x352   :  { %2888 = vmatpush1.bf16.msra.mxu1 %v2887_v42  ;;  %840 = vmatmul.mubr.f32.gmra.mrb[6].mxu0 %v751_v32 }
 0x353   :  { %2889 = vmatprep.subr.bf16.mxu1 %v5080_v16  ;;  %2585 = vmatprep.mubr.msk.f32.mxu0 %vm757_vm11, %v754_v40 }
 0x356   :  { %2891 = vmatpush1.bf16.msra.mxu1 %v2890_v29  ;;  %845 = vmatmul.mubr.f32.gmra.mrb[8].mxu0 %v753_v15 }
 0x357   :  { %1040 = vmatprep.subr.mxu1 %v5074_v44  ;;  %2586 = vmatprep.mubr.msk.f32.mxu0 %vm757_vm11, %v756_v34 }
 0x35a   :  { %2587 = vmatpush1.msk.msra.mxu1 %vm143_vm4, %v5082_v18  ;;  %850 = vmatmul.mubr.f32.gmra.mrb[10].mxu0 %v755_v36 }
 0x35b   :  { %1065 = vmatmul.mubr.f32.vlgmr.msra.gmra.mrb[12].mxu1 %v980_v41  ;;  %2916 = vmatprep.subr.bf16.mxu1 %v5080_v16 }
 0x35c   :  { %2589 = vmatprep.mubr.msk.f32.mxu1 %vm257_vm8, %v983_v30 }
 0x35f   :  { %1070 = vmatmul.mubr.f32.gmra.mrb[14].mxu1 %v982_v37 }
 0x360   :  { %2590 = vmatprep.mubr.msk.f32.mxu1 %vm257_vm8, %v985_v21 }
 0x363   :  { %1075 = vmatmul.mubr.f32.gmra.mrb[16].mxu1 %v984_v60 }
 0x364   :  { %2591 = vmatprep.mubr.msk.f32.mxu1 %vm257_vm8, %v987_v49 }
 0x367   :  { %1080 = vmatmul.mubr.f32.gmra.mrb[18].mxu1 %v986_v33 }
 0x404   :  { %v2746_v35 = vpop.f32.mrb[8].mxu1 }
 0x405   :  { %v4145_v55 = vmax.f32 %v2746_v35, 0.0  ;;  %v633_v62 = vpop.f32.mrb[9].mxu1 }
 0x406   :  { %v4147_v27 = vmax.f32 %v633_v62, 0.0 }
 0x408   :  { %v2749_v2 = vpop.f32.mrb[10].mxu1  ;;  %v3180_v46 = vpack.i.bf16 %v4145_v55, %v4147_v27 }
 0x409   :  { %v4151_v20 = vmax.f32 %v2749_v2, 0.0  ;;  %v643_v28 = vpop.f32.mrb[11].mxu1 }
 0x40a   :  { %v4153_v17 = vmax.f32 %v643_v28, 0.0  ;;  %3181 = vrot.lane.b32.xlu1 %v3180_v46, %s3562_s27 }
 0x40c   :  { %v3185_v59 = vpack.i.bf16 %v4151_v20, %v4153_v17 }
 0x40e   :  { %3186 = vrot.lane.b32.xlu0 %v3185_v59, %s3562_s27  ;;  %3191 = vrot.lane.b32.xlu1 %v3180_v46, %s3564_s23 }
 0x412   :  { %3196 = vrot.lane.b32.xlu0 %v3185_v59, %s3564_s23 }
 0x421   :  { %v836_v5 = vpop.f32.mrb[4].mxu0 }
 0x422   :  { %v838_v48 = vpop.f32.mrb[5].mxu0  ;;  %v4165_v22 = vmax.f32 %v836_v5, 0.0 }
 0x423   :  { %v1153_v48 = vld [vmem:[#allocation8] sm:$0xff] }
 0x424   :  { %2776 = vmatprep.mubr.msk.f32.mxu0 %vm554_vm9, %v1153_v48 }
 0x425   :  { %v841_v38 = vpop.f32.mrb[6].mxu0 }
 0x426   :  { %v843_v1 = vpop.f32.mrb[7].mxu0  ;;  %v4167_v57 = vmax.f32 %v841_v38, 0.0 }
 0x428   :  { %v3205_v19 = vpack.i.bf16 %v4167_v57, %v4165_v22 }
 0x429   :  { %v846_v45 = vpop.f32.mrb[8].mxu0 }
 0x42a   :  { %v848_v9 = vpop.f32.mrb[9].mxu0  ;;  %v4172_v0 = vmax.f32 %v846_v45, 0.0 }
 0x42d   :  { %v851_v47 = vpop.f32.mrb[10].mxu0 }
 0x42e   :  { %v1066_v39 = vpop.f32.mrb[12].mxu1  ;;  %v853_v50 = vpop.f32.mrb[11].mxu0  ;;  %v4174_v31 = vmax.f32 %v851_v47, 0.0  ;;  %v1718_v47 = vsel %vm248_vm7, %v3789_v7, -inf }
 0x42f   :  { %v1068_v54 = vpop.f32.mrb[13].mxu1  ;;  %v4161_v25 = vmax.f32 %v1066_v39, 0.0  ;;  %v1709_v39 = vsel %vm122_vm2, %v3770_v58, -inf }
 0x430   :  { %v3220_v14 = vpack.i.bf16 %v4174_v31, %v4172_v0 }
 0x432   :  { %v1071_v24 = vpop.f32.mrb[14].mxu1 }
 0x433   :  { %v4163_v52 = vmax.f32 %v1071_v24, 0.0  ;;  %v1073_v26 = vpop.f32.mrb[15].mxu1  ;;  %v1712_v24 = vsel %vm122_vm2, %v3768_v56, -inf }
 0x435   :  { %v3200_v43 = vpack.i.bf16 %v4163_v52, %v4161_v25 }
 0x436   :  { %v1076_v4 = vpop.f32.mrb[16].mxu1 }
 0x437   :  { %3201 = vrot.lane.b32.xlu1 %v3200_v43, %s3562_s27  ;;  %v1078_v23 = vpop.f32.mrb[17].mxu1  ;;  %v4176_v11 = vmax.f32 %v1076_v4, 0.0 }
 0x43a   :  { %v1081_v32 = vpop.f32.mrb[18].mxu1 }
 0x43b   :  { %v4180_v42 = vmax.f32 %v1081_v32, 0.0  ;;  %3206 = vrot.lane.b32.xlu1 %v3205_v19, %s3562_s27  ;;  %v1083_v40 = vpop.f32.mrb[19].mxu1 }
 0x43d   :  { %v3210_v10 = vpack.i.bf16 %v4180_v42, %v4176_v11 }
 0x43f   :  { %3211 = vrot.lane.b32.xlu0 %v3210_v10, %s3562_s27  ;;  %3221 = vrot.lane.b32.xlu1 %v3220_v14, %s3562_s27 }
 0x443   :  { %3216 = vrot.lane.b32.xlu0 %v3200_v43, %s3564_s23  ;;  %3226 = vrot.lane.b32.xlu1 %v3205_v19, %s3564_s23 }
 0x447   :  { %3231 = vrot.lane.b32.xlu0 %v3210_v10, %s3564_s23  ;;  %3241 = vrot.lane.b32.xlu1 %v3220_v14, %s3564_s23 }
 0x44b   :  { %3236 = vrot.lane.b32.xlu0 %v3200_v43, %s3563_s22  ;;  %3246 = vrot.lane.b32.xlu1 %v3205_v19, %s3563_s22 }
 0x44f   :  { %3251 = vrot.lane.b32.xlu0 %v3210_v10, %s3563_s22  ;;  %3261 = vrot.lane.b32.xlu1 %v3220_v14, %s3563_s22 }
 0x453   :  { %3256 = vrot.lane.b32.xlu0 %v3200_v43, %s3565_s24 }
 0x457   :  { %3266 = vrot.lane.b32.xlu0 %v3210_v10, %s3565_s24 }
 0x47c   :  { %v4199_v15 = vpop.permute.xlu1 %3181 }
 0x47d   :  { %v3184_v29 = vunpack.i.h.bf16 %v4199_v15  ;;  %v3183_v34 = vunpack.i.l.bf16 %v4199_v15  ;;  %3271 = vrot.lane.b32.xlu1 %v4199_v15, %s3564_s23 }
 0x480   :  { %v4203_v36 = vpop.permute.xlu0 %3186  ;;  %v4205_v41 = vpop.permute.xlu1 %3191 }
 0x481   :  { %v3189_v30 = vunpack.i.h.bf16 %v4203_v36  ;;  %v3188_v37 = vunpack.i.l.bf16 %v4203_v36  ;;  %v3194_v21 = vunpack.i.h.bf16 %v4205_v41  ;;  %v3193_v60 = vunpack.i.l.bf16 %v4205_v41  ;;  %3276 = vrot.lane.b32.xlu0 %v4203_v36, %s3564_s23  ;;  %3281 = vrot.lane.b32.xlu1 %v4205_v41, %s3564_s23 }
 0x482   :  { %v1736_v36 = vsel %vm374_vm3, %v3784_v3, -inf  ;;  %v1733_v41 = vsel %vm374_vm3, %v3786_v6, -inf }
 0x483   :  { %v1141_v49 = vsel %vm732_vm10, %v4147_v27, %v3193_v60  ;;  %v1142_v33 = vsel %vm732_vm10, %v4145_v55, %v3194_v21 }
 0x484   :  { %v4221_v35 = vpop.permute.xlu0 %3196  ;;  %v2892_v62 = vpack.c.bf16 %v1142_v33, %v1141_v49 }
 0x485   :  { %v3199_v2 = vunpack.i.h.bf16 %v4221_v35  ;;  %v3198_v46 = vunpack.i.l.bf16 %v4221_v35  ;;  %3286 = vrot.lane.b32.xlu0 %v4221_v35, %s3564_s23  ;;  %v1757_v35 = vsel %vm374_vm3, %v4151_v20, -inf }
 0x486   :  { %2893 = vmatprep.subr.bf16.mxu0 %v2892_v62 }
 0x487   :  { %2895 = vmatpush3.bf16.msra.mxu0 %v2892_v62  ;;  %v1143_v28 = vsel %vm732_vm10, %v4153_v17, %v3198_v46  ;;  %v1144_v59 = vsel %vm732_vm10, %v4151_v20, %v3199_v2 }
 0x488   :  { %v2896_v5 = vpack.c.bf16 %v1144_v59, %v1143_v28 }
 0x48a   :  { %2897 = vmatprep.subr.bf16.mxu0 %v2896_v5 }
 0x48b   :  { %2899 = vmatpush3.bf16.msra.mxu0 %v2896_v5 }
 0x4a9   :  { %v4240_v38 = vpop.permute.xlu1 %3201 }
 0x4aa   :  { %3291 = vrot.lane.b32.xlu1 %v4240_v38, %s3565_s24 }
 0x4ad   :  { %v4244_v9 = vpop.permute.xlu1 %3206 }
 0x4ae   :  { %3296 = vrot.lane.b32.xlu1 %v4244_v9, %s3563_s22 }
 0x4b1   :  { %v4250_v50 = vpop.permute.xlu0 %3211  ;;  %v4252_v54 = vpop.permute.xlu1 %3221 }
 0x4b2   :  { %3301 = vrot.lane.b32.xlu0 %v4250_v50, %s3565_s24  ;;  %3311 = vrot.lane.b32.xlu1 %v4252_v54, %s3563_s22 }
 0x4b5   :  { %v4260_v23 = vpop.permute.xlu0 %3216  ;;  %v4262_v19 = vpop.permute.xlu1 %3226 }
 0x4b6   :  { %3306 = vrot.lane.b32.xlu0 %v4260_v23, %s3565_s24  ;;  %3316 = vrot.lane.b32.xlu1 %v4262_v19, %s3563_s22 }
 0x4b9   :  { %v4272_v49 = vpop.permute.xlu0 %3231  ;;  %v4274_v33 = vpop.permute.xlu1 %3241 }
 0x4ba   :  { %3321 = vrot.lane.b32.xlu0 %v4272_v49, %s3565_s24  ;;  %3331 = vrot.lane.b32.xlu1 %v4274_v33, %s3563_s22 }
 0x4bd   :  { %v4284_v48 = vpop.permute.xlu0 %3236  ;;  %v4286_v44 = vpop.permute.xlu1 %3246 }
 0x4be   :  { %v5077_v28 = vunpack.i.h.bf16 %v4286_v44  ;;  %v5076_v59 = vunpack.i.l.bf16 %v4286_v44  ;;  %3326 = vrot.lane.b32.xlu0 %v4284_v48, %s3565_s24  ;;  %3336 = vrot.lane.b32.xlu1 %v4286_v44, %s3563_s22 }
 0x4c0   :  { %v1336_v5 = vsel %vm1334_vm13, %v4167_v57, %v5077_v28  ;;  %v1335_v62 = vsel %vm1334_vm13, %v4165_v22, %v5076_v59  ;;  %v1352_v59 = vld [vmem:[#allocation8 + $0x48] sm:$0xff] }
 0x4c1   :  { %v4304_v14 = vpop.permute.xlu0 %3251  ;;  %v4306_v10 = vpop.permute.xlu1 %3261  ;;  %v2917_v40 = vpack.c.bf16 %v1336_v5, %v1335_v62  ;;  %2598 = vmatprep.mubr.msk.f32.mxu1 %vm757_vm11, %v1352_v59 }
 0x4c2   :  { %v5079_v43 = vunpack.i.h.bf16 %v4306_v10  ;;  %v5078_v26 = vunpack.i.l.bf16 %v4306_v10  ;;  %3341 = vrot.lane.b32.xlu0 %v4304_v14, %s3565_s24  ;;  %3351 = vrot.lane.b32.xlu1 %v4306_v10, %s3563_s22 }
 0x4c3   :  { %2918 = vmatpush1.bf16.msra.mxu1 %v2917_v40 }
 0x4c4   :  { %v1338_v62 = vsel %vm1334_vm13, %v4174_v31, %v5079_v43  ;;  %v1337_v5 = vsel %vm1334_vm13, %v4172_v0, %v5078_v26  ;;  %2919 = vmatprep.subr.bf16.mxu1 %v5080_v16 }
 0x4c5   :  { %v4326_v4 = vpop.permute.xlu0 %3256  ;;  %v2920_v32 = vpack.c.bf16 %v1338_v62, %v1337_v5  ;;  %v3570_v62 = vmov 0   ;;  %v1706_v5 = vsel %vm122_vm2, %v3762_v51, -inf }
 0x4c6   :  { %v3259_v28 = vunpack.i.h.bf16 %v4326_v4  ;;  %3346 = vrot.lane.b32.xlu0 %v4326_v4, %s3565_s24  ;;  %3360 = vset.pattern.permute.xlu1 %v3570_v62 }
 0x4c7   :  { %2921 = vmatpush1.bf16.msra.mxu1 %v2920_v32  ;;  %3361 = vset.pattern.permute.xlu0 %v3570_v62  ;;  %v1703_v32 = vsel %vm122_vm2, %v3764_v53, -inf  ;;  %vm2221_vm2 = vcmask 425168  }
 0x4c8   :  { %2922 = vmatprep.subr.bf16.mxu1 %v5080_v16 }
 0x4c9   :  { %v4335_v59 = vpop.permute.xlu0 %3266 }
 0x4ca   :  { %3356 = vrot.lane.b32.xlu0 %v4335_v59, %s3565_s24 }
 0x4e6   :  { %1704 = vmax.xlane.f32.xlu1 %v1703_v32  ;;  %v1715_v32 = vsel %vm248_vm7, %v3791_v8, -inf }
 0x4e9   :  { %1707 = vmax.xlane.f32.xlu0 %v1706_v5  ;;  %v1724_v5 = vsel %vm248_vm7, %v3797_v12, -inf }
 0x4ea   :  { %1713 = vmax.xlane.f32.xlu1 %v1712_v24 }
 0x4ed   :  { %1710 = vmax.xlane.f32.xlu0 %v1709_v39 }
 0x4ee   :  { %1719 = vmax.xlane.f32.xlu1 %v1718_v47 }
 0x4ef   :  { %v3272_v62 = vpop.permute.xlu1 %3271 }
 0x4f0   :  { %v3274_v45 = vunpack.i.h.bf16 %v3272_v62  ;;  %v3273_v1 = vunpack.i.l.bf16 %v3272_v62  ;;  %v1721_v62 = vsel %vm248_vm7, %v3799_v13, -inf  ;;  %vm1864_vm7 = vcmask 23552  }
 0x4f1   :  { %1716 = vmax.xlane.f32.xlu0 %v1715_v32 }
 0x4f2   :  { %1725 = vmax.xlane.f32.xlu1 %v1724_v5  ;;  %v1145_v24 = vsel %vm732_vm10, %v3183_v34, %v3273_v1  ;;  %v1146_v39 = vsel %vm732_vm10, %v3184_v29, %v3274_v45  ;;  %v1730_v5 = vsel %vm374_vm3, %v3777_v61, -inf }
 0x4f3   :  { %v3277_v47 = vpop.permute.xlu0 %3276  ;;  %v3282_v16 = vpop.permute.xlu1 %3281  ;;  %v2900_v43 = vpack.c.bf16 %v1146_v39, %v1145_v24  ;;  %v1727_v39 = vsel %vm374_vm3, %v3779_v63, -inf }
 0x4f4   :  { %v3279_v26 = vunpack.i.h.bf16 %v3277_v47  ;;  %v3278_v32 = vunpack.i.l.bf16 %v3277_v47  ;;  %v3284_v18 = vunpack.i.h.bf16 %v3282_v16  ;;  %v3283_v40 = vunpack.i.l.bf16 %v3282_v16 }
 0x4f5   :  { %2901 = vmatprep.subr.bf16.mxu0 %v2900_v43  ;;  %1722 = vmax.xlane.f32.xlu0 %v1721_v62  ;;  %v5103_v47 = vmov 1.0   ;;  %v1754_v62 = vsel %vm374_vm3, %v4153_v17, -inf }
 0x4f6   :  { %2903 = vmatpush3.bf16.msra.mxu0 %v2900_v43  ;;  %1731 = vmax.xlane.f32.xlu1 %v1730_v5  ;;  %v1147_v15 = vsel %vm732_vm10, %v3188_v37, %v3278_v32  ;;  %v1148_v29 = vsel %vm732_vm10, %v3189_v30, %v3279_v26  ;;  %v1149_v34 = vsel %vm732_vm10, %v3193_v60, %v3283_v40  ;;  %v5102_v26 = vunpack.i.l.bf16 %v4326_v4  ;;  %v1154_v32 = vld [vmem:[#allocation8 + $0x10] sm:$0xff] }
 0x4f7   :  { %v3287_v16 = vpop.permute.xlu0 %3286  ;;  %v2904_v1 = vpack.c.bf16 %v1148_v29, %v1147_v15  ;;  %v1150_v45 = vsel %vm732_vm10, %v3194_v21, %v3284_v18  ;;  %v1751_v21 = vsel %vm374_vm3, %v4145_v55, -inf  ;;  %v1763_v5 = vsel %vm732_vm10, %v4167_v57, -inf  ;;  %v1155_v15 = vld [vmem:[#allocation8 + $0x20] sm:$0xff] }
 0x4f8   :  { %v3289_v43 = vunpack.i.h.bf16 %v3287_v16  ;;  %v3288_v24 = vunpack.i.l.bf16 %v3287_v16  ;;  %v2908_v30 = vpack.c.bf16 %v1150_v45, %v1149_v34  ;;  %v1561_v40 = vsel %vm1560_vm14, %v4161_v25, %v5102_v26 }
 0x4f9   :  { %2905 = vmatprep.subr.bf16.mxu0 %v2904_v1  ;;  %1728 = vmax.xlane.f32.xlu0 %v1727_v39  ;;  %v5104_v34 = vunpack.i.h.bf16 %v4335_v59  ;;  %v1156_v39 = vld [vmem:[#allocation8 + $0x30] sm:$0xff]  ;;  %v2192_v26 = vsel %vm2188_vm1, %v3777_v61, -inf }
 0x4fa   :  { %2907 = vmatpush3.bf16.msra.mxu0 %v2904_v1  ;;  %1737 = vmax.xlane.f32.xlu1 %v1736_v36  ;;  %v1151_v37 = vsel %vm732_vm10, %v3198_v46, %v3288_v24  ;;  %v1152_v18 = vsel %vm732_vm10, %v3199_v2, %v3289_v43  ;;  %v1748_v46 = vsel %vm374_vm3, %v4147_v27, -inf  ;;  %v1562_v2 = vsel %vm1560_vm14, %v4163_v52, %v3259_v28 }
 0x4fb   :  { %2909 = vmatprep.subr.bf16.mxu0 %v2908_v30  ;;  %v2912_v60 = vpack.c.bf16 %v1152_v18, %v1151_v37  ;;  %v2941_v29 = vpack.c.bf16 %v1562_v2, %v1561_v40  ;;  %v1564_v16 = vsel %vm1560_vm14, %v4180_v42, %v5104_v34  ;;  %v5105_v1 = vunpack.i.l.bf16 %v4335_v59 }
 0x4fc   :  { %v5106_v43 = vmov 0.0|0.0   ;;  %v1760_v24 = vsel %vm732_vm10, %v4165_v22, -inf  ;;  %v1769_v36 = vsel %vm732_vm10, %v4174_v31, -inf  ;;  %v1766_v18 = vsel %vm732_vm10, %v4172_v0, -inf }
 0x4fd   :  { %1734 = vmax.xlane.f32.xlu0 %v1733_v41  ;;  %v1563_v45 = vsel %vm1560_vm14, %v4176_v11, %v5105_v1  ;;  %v1775_v41 = vsel %vm959_vm12, %v4163_v52, -inf  ;;  %v2176_v2 = vsel %vm2175_vm0, %v3791_v8, -inf  ;;  %v2189_v40 = vsel %vm2188_vm1, %v3779_v63, -inf }
 0x4fe   :  { %2911 = vmatpush3.bf16.msra.mxu0 %v2908_v30  ;;  %1752 = vmax.xlane.f32.xlu1 %v1751_v21  ;;  %v1582_v30 = vld [vmem:[#allocation8 + $0x88] sm:$0xff]  ;;  %v2944_v37 = vpack.c.bf16 %v1564_v16, %v1563_v45  ;;  %v1772_v21 = vsel %vm959_vm12, %v4161_v25, -inf  ;;  %v5109_v1 = vunpack.i.h.bf16 %v4244_v9  ;;  %vm2234_vm3 = vcmask 392384  }
 0x4ff   :  { %2913 = vmatprep.subr.bf16.mxu0 %v2912_v60 }
 0x501   :  { %1749 = vmax.xlane.f32.xlu0 %v1748_v46  ;;  %v2163_v46 = vsel %vm2162_vm15, %v3764_v53, -inf }
 0x502   :  { %2915 = vmatpush3.bf16.msra.mxu0 %v2912_v60  ;;  %1758 = vmax.xlane.f32.xlu1 %v1757_v35  ;;  %v2166_v60 = vsel %vm2162_vm15, %v3762_v51, -inf  ;;  %v2179_v35 = vsel %vm2175_vm0, %v3789_v7, -inf  ;;  %v2182_v7 = vsel %vm2175_vm0, %v3799_v13, -inf  ;;  %v2172_v13 = vsel %vm2162_vm15, %v3768_v56, -inf }
 0x503   :  { %2774 = vmatprep.subr.msk.mxu0 %vm143_vm4, %v5103_v47  ;;  %v2198_v56 = vsel %vm2188_vm1, %v3784_v3, -inf  ;;  %v5114_v3 = vunpack.i.l.bf16 %v4252_v54 }
 0x505   :  { %1755 = vmax.xlane.f32.xlu0 %v1754_v62 }
 0x506   :  { %2775 = vmatpush3.msk.msra.mxu0 %vm143_vm4, %v5103_v47  ;;  %1764 = vmax.xlane.f32.xlu1 %v1763_v5  ;;  %v5108_v5 = vunpack.i.l.bf16 %v4240_v38 }
 0x507   :  { %2940 = vmatprep.subr.bf16.mxu0 %v5106_v43  ;;  %2777 = vmatmul.mubr.msk.f32.vlgmr.msra.gmra.mrb[12].mxu0 %vm554_vm9, %v1154_v32  ;;  %v5107_v32 = vunpack.i.h.bf16 %v4240_v38  ;;  %v5110_v38 = vunpack.i.l.bf16 %v4244_v9  ;;  %v5111_v9 = vunpack.i.h.bf16 %v4250_v50 }
 0x508   :  { %2942 = vmatpush1.bf16.msra.mxu0 %v2941_v29  ;;  %2779 = vmatprep.mubr.msk.f32.mxu0 %vm554_vm9, %v1155_v15  ;;  %v2169_v29 = vsel %vm2162_vm15, %v3770_v58, -inf }
 0x509   :  { %1761 = vmax.xlane.f32.xlu0 %v1760_v24  ;;  %2943 = vmatprep.subr.bf16.mxu0 %v5106_v43 }
 0x50a   :  { %1770 = vmax.xlane.f32.xlu1 %v1769_v36  ;;  %v2195_v36 = vsel %vm2188_vm1, %v3786_v6, -inf  ;;  %v5113_v6 = vunpack.i.h.bf16 %v4252_v54  ;;  %v2212_v54 = vsel %vm2188_vm1, %v4145_v55, -inf  ;;  %v2209_v55 = vsel %vm2188_vm1, %v4147_v27, -inf }
 0x50b   :  { %2780 = vmatmul.mubr.msk.f32.gmra.mrb[14].mxu0 %vm554_vm9, %v1156_v39  ;;  %vm2153_vm9 = vcmask 8192  }
 0x50c   :  { %2945 = vmatpush1.bf16.msra.mxu0 %v2944_v37  ;;  %2603 = vmatprep.mubr.msk.f32.mxu0 %vm257_vm8, %v1582_v30 }
 0x50d   :  { %1767 = vmax.xlane.f32.xlu0 %v1766_v18  ;;  %2946 = vmatprep.subr.bf16.mxu0 %v5106_v43 }
 0x50e   :  { %1776 = vmax.xlane.f32.xlu1 %v1775_v41 }
 0x511   :  { %1773 = vmax.xlane.f32.xlu0 %v1772_v21 }
 0x512   :  { %2167 = vmax.xlane.f32.xlu1 %v2166_v60 }
 0x515   :  { %2164 = vmax.xlane.f32.xlu0 %v2163_v46  ;;  %v5112_v46 = vunpack.i.l.bf16 %v4250_v50 }
 0x516   :  { %2180 = vmax.xlane.f32.xlu1 %v2179_v35 }
 0x519   :  { %2177 = vmax.xlane.f32.xlu0 %v2176_v2 }
 0x51a   :  { %2193 = vmax.xlane.f32.xlu1 %v2192_v26 }
 0x51c   :  { %v3292_v51 = vpop.permute.xlu1 %3291 }
 0x51d   :  { %v3294_v62 = vunpack.i.h.bf16 %v3292_v51  ;;  %v3293_v53 = vunpack.i.l.bf16 %v3292_v51  ;;  %2190 = vmax.xlane.f32.xlu0 %v2189_v40 }
 0x51e   :  { %2183 = vmax.xlane.f32.xlu1 %v2182_v7 }
 0x51f   :  { %v1566_v8 = vsel %vm1560_vm14, %v5107_v32, %v3294_v62  ;;  %v1565_v61 = vsel %vm1560_vm14, %v5108_v5, %v3293_v53  ;;  %v2185_v62 = vsel %vm2175_vm0, %v3797_v12, -inf }
 0x520   :  { %v3297_v15 = vpop.permute.xlu1 %3296  ;;  %v2947_v63 = vpack.c.bf16 %v1566_v8, %v1565_v61  ;;  %v5115_v61 = vunpack.i.h.bf16 %v4260_v23 }
 0x521   :  { %v3299_v34 = vunpack.i.h.bf16 %v3297_v15  ;;  %v3298_v16 = vunpack.i.l.bf16 %v3297_v15  ;;  %2170 = vmax.xlane.f32.xlu0 %v2169_v29  ;;  %v5116_v29 = vunpack.i.l.bf16 %v4260_v23 }
 0x522   :  { %2948 = vmatpush1.bf16.msra.mxu0 %v2947_v63  ;;  %2173 = vmax.xlane.f32.xlu1 %v2172_v13  ;;  %v5117_v63 = vunpack.i.h.bf16 %v4262_v19 }
 0x523   :  { %v1340_v45 = vsel %vm1334_vm13, %v5109_v1, %v3299_v34  ;;  %v1339_v24 = vsel %vm1334_vm13, %v5110_v38, %v3298_v16  ;;  %2949 = vmatprep.subr.bf16.mxu0 %v5106_v43  ;;  %v5118_v16 = vunpack.i.l.bf16 %v4262_v19  ;;  %v2225_v19 = vsel %vm2221_vm2, %v4167_v57, -inf }
 0x524   :  { %v3302_v58 = vpop.permute.xlu0 %3301  ;;  %v3312_v39 = vpop.permute.xlu1 %3311  ;;  %v2923_v30 = vpack.c.bf16 %v1340_v45, %v1339_v24  ;;  %v2222_v57 = vsel %vm2221_vm2, %v4165_v22, -inf }
 0x525   :  { %v3304_v37 = vunpack.i.h.bf16 %v3302_v58  ;;  %v3303_v18 = vunpack.i.l.bf16 %v3302_v58  ;;  %v3314_v41 = vunpack.i.h.bf16 %v3312_v39  ;;  %v3313_v21 = vunpack.i.l.bf16 %v3312_v39  ;;  %2196 = vmax.xlane.f32.xlu0 %v2195_v36 }
 0x526   :  { %2924 = vmatpush1.bf16.msra.mxu1 %v2923_v30  ;;  %2199 = vmax.xlane.f32.xlu1 %v2198_v56  ;;  %v5119_v30 = vunpack.i.h.bf16 %v4272_v49 }
 0x527   :  { %v1568_v60 = vsel %vm1560_vm14, %v5111_v9, %v3304_v37  ;;  %v1567_v35 = vsel %vm1560_vm14, %v5112_v46, %v3303_v18  ;;  %v1342_v2 = vsel %vm1334_vm13, %v5113_v6, %v3314_v41  ;;  %v1341_v26 = vsel %vm1334_vm13, %v5114_v3, %v3313_v21  ;;  %2925 = vmatprep.subr.bf16.mxu1 %v5106_v43 }
 0x528   :  { %v3307_v51 = vpop.permute.xlu0 %3306  ;;  %v3317_v40 = vpop.permute.xlu1 %3316  ;;  %v2926_v53 = vpack.c.bf16 %v1342_v2, %v1341_v26  ;;  %v2950_v7 = vpack.c.bf16 %v1568_v60, %v1567_v35  ;;  %v5120_v37 = vunpack.i.l.bf16 %v4272_v49  ;;  %v5121_v18 = vunpack.i.h.bf16 %v4274_v33 }
 0x529   :  { %v3309_v50 = vunpack.i.h.bf16 %v3307_v51  ;;  %v3308_v32 = vunpack.i.l.bf16 %v3307_v51  ;;  %v3319_v8 = vunpack.i.h.bf16 %v3317_v40  ;;  %v3318_v5 = vunpack.i.l.bf16 %v3317_v40  ;;  %2186 = vmax.xlane.f32.xlu0 %v2185_v62 }
 0x52a   :  { %2927 = vmatpush1.bf16.msra.mxu1 %v2926_v53  ;;  %2951 = vmatpush1.bf16.msra.mxu0 %v2950_v7  ;;  %v5122_v21 = vunpack.i.l.bf16 %v4274_v33  ;;  %v2238_v33 = vsel %vm2234_vm3, %v4163_v52, -inf  ;;  %v5123_v51 = vunpack.i.h.bf16 %v4284_v48  ;;  %v5124_v62 = vunpack.i.l.bf16 %v4284_v48 }
 0x52b   :  { %v1570_v15 = vsel %vm1560_vm14, %v5115_v61, %v3309_v50  ;;  %v1569_v12 = vsel %vm1560_vm14, %v5116_v29, %v3308_v32  ;;  %v1344_v34 = vsel %vm1334_vm13, %v5117_v63, %v3319_v8  ;;  %v1343_v13 = vsel %vm1334_vm13, %v5118_v16, %v3318_v5  ;;  %2213 = vmax.xlane.f32.xlu1 %v2212_v54 }
 0x52c   :  { %v3322_v1 = vpop.permute.xlu0 %3321  ;;  %v3332_v45 = vpop.permute.xlu1 %3331  ;;  %2928 = vmatprep.subr.bf16.mxu1 %v5106_v43  ;;  %2952 = vmatprep.subr.bf16.mxu0 %v5106_v43  ;;  %v2929_v23 = vpack.c.bf16 %v1344_v34, %v1343_v13  ;;  %v2953_v38 = vpack.c.bf16 %v1570_v15, %v1569_v12  ;;  %v5125_v53 = vunpack.i.h.bf16 %v4286_v44  ;;  %v5126_v50 = vunpack.i.l.bf16 %v4286_v44 }
 0x52d   :  { %v3324_v24 = vunpack.i.h.bf16 %v3322_v1  ;;  %v3323_v58 = vunpack.i.l.bf16 %v3322_v1  ;;  %v3334_v39 = vunpack.i.h.bf16 %v3332_v45  ;;  %v3333_v36 = vunpack.i.l.bf16 %v3332_v45  ;;  %2210 = vmax.xlane.f32.xlu0 %v2209_v55 }
 0x52e   :  { %2930 = vmatpush1.bf16.msra.mxu1 %v2929_v23  ;;  %2954 = vmatpush1.bf16.msra.mxu0 %v2953_v38  ;;  %v2235_v52 = vsel %vm2234_vm3, %v4161_v25, -inf  ;;  %v2228_v44 = vsel %vm2221_vm2, %v4172_v0, -inf  ;;  %v5127_v63 = vunpack.i.h.bf16 %v4304_v14  ;;  %v5128_v16 = vunpack.i.l.bf16 %v4304_v14 }
 0x52f   :  { %v1572_v56 = vsel %vm1560_vm14, %v5119_v30, %v3324_v24  ;;  %v1571_v27 = vsel %vm1560_vm14, %v5120_v37, %v3323_v58  ;;  %v1346_v41 = vsel %vm1334_vm13, %v5121_v18, %v3334_v39  ;;  %v1345_v9 = vsel %vm1334_vm13, %v5122_v21, %v3333_v36  ;;  %2226 = vmax.xlane.f32.xlu1 %v2225_v19  ;;  %v1354_v21 = vld [vmem:[#allocation8 + $0x58] sm:$0xff] }
 0x530   :  { %v3327_v60 = vpop.permute.xlu0 %3326  ;;  %v3337_v46 = vpop.permute.xlu1 %3336  ;;  %2931 = vmatprep.subr.bf16.mxu1 %v5106_v43  ;;  %2955 = vmatprep.subr.bf16.mxu0 %v5106_v43  ;;  %v2932_v49 = vpack.c.bf16 %v1346_v41, %v1345_v9  ;;  %v2956_v35 = vpack.c.bf16 %v1572_v56, %v1571_v27  ;;  %v5129_v13 = vunpack.i.h.bf16 %v4306_v10  ;;  %v5130_v45 = vunpack.i.l.bf16 %v4306_v10  ;;  %v1351_v27 = vld [vmem:[#allocation8 + $0x40] sm:$0xff] }
 0x531   :  { %v3329_v6 = vunpack.i.h.bf16 %v3327_v60  ;;  %v3328_v2 = vunpack.i.l.bf16 %v3327_v60  ;;  %v3339_v3 = vunpack.i.h.bf16 %v3337_v46  ;;  %v3338_v26 = vunpack.i.l.bf16 %v3337_v46  ;;  %2223 = vmax.xlane.f32.xlu0 %v2222_v57 }
 0x532   :  { %2933 = vmatpush1.bf16.msra.mxu1 %v2932_v49  ;;  %2957 = vmatpush1.bf16.msra.mxu0 %v2956_v35  ;;  %v2215_v0 = vsel %vm2188_vm1, %v4153_v17, -inf  ;;  %v2241_v10 = vsel %vm2234_vm3, %v4176_v11, -inf  ;;  %v5131_v36 = vunpack.i.l.bf16 %v4326_v4  ;;  %v5132_v17 = vmov 0.0   ;;  %v1353_v49 = vld [vmem:[#allocation8 + $0x50] sm:$0xff] }
 0x533   :  { %v1574_v40 = vsel %vm1560_vm14, %v5123_v51, %v3329_v6  ;;  %v1573_v22 = vsel %vm1560_vm14, %v5124_v62, %v3328_v2  ;;  %v1348_v7 = vsel %vm1334_vm13, %v5125_v53, %v3339_v3  ;;  %v1347_v32 = vsel %vm1334_vm13, %v5126_v50, %v3338_v26  ;;  %2239 = vmax.xlane.f32.xlu1 %v2238_v33  ;;  %v1358_v6 = vld [vmem:[#allocation8 + $0x78] sm:$0xff]  ;;  %v1357_v3 = vld [vmem:[#allocation8 + $0x70] sm:$0xff]  ;;  %v1586_v26 = vld [vmem:[#allocation8 + $0xa8] sm:$0xff] }
 0x534   :  { %v3342_v8 = vpop.permute.xlu0 %3341  ;;  %v3352_v5 = vpop.permute.xlu1 %3351  ;;  %2934 = vmatprep.subr.bf16.mxu1 %v5106_v43  ;;  %2958 = vmatprep.subr.bf16.mxu0 %v5106_v43  ;;  %v2935_v48 = vpack.c.bf16 %v1348_v7, %v1347_v32  ;;  %v2959_v54 = vpack.c.bf16 %v1574_v40, %v1573_v22  ;;  %v1778_v56 = vsel %vm959_vm12, %v4176_v11, -inf  ;;  %v2231_v4 = vsel %vm2221_vm2, %v4174_v31, -inf  ;;  %v1356_v31 = vld [vmem:[#allocation8 + $0x68] sm:$0xff]  ;;  %v1584_v2 = vld [vmem:[#allocation8 + $0x98] sm:$0xff]  ;;  %v1585_v33 = vld [vmem:[#allocation8 + $0xa0] sm:$0xff] }
 0x535   :  { %v3344_v61 = vunpack.i.h.bf16 %v3342_v8  ;;  %v3343_v15 = vunpack.i.l.bf16 %v3342_v8  ;;  %v3354_v29 = vunpack.i.h.bf16 %v3352_v5  ;;  %v3353_v12 = vunpack.i.l.bf16 %v3352_v5  ;;  %2236 = vmax.xlane.f32.xlu0 %v2235_v52  ;;  %v1588_v51 = vld [vmem:[#allocation8 + $0xb8] sm:$0xff]  ;;  %v1587_v40 = vld [vmem:[#allocation8 + $0xb0] sm:$0xff]  ;;  %v1837_v22 = vld [vmem:[#allocation9 + $0x8] sm:$0xff] }
 0x536   :  { %2936 = vmatpush1.bf16.msra.mxu1 %v2935_v48  ;;  %2960 = vmatpush1.bf16.msra.mxu0 %v2959_v54  ;;  %v5134_v60 = vunpack.i.l.bf16 %v4335_v59  ;;  %v2218_v46 = vsel %vm2188_vm1, %v4151_v20, -inf  ;;  %v1781_v35 = vsel %vm959_vm12, %v4180_v42, -inf  ;;  %v1581_v20 = vld [vmem:[#allocation8 + $0x80] sm:$0xff]  ;;  %v1838_v62 = vld [vmem:[#allocation9 + $0x10] sm:$0xff]  ;;  %v1839_v53 = vld [vmem:[#allocation9 + $0x18] sm:$0xff] }
 0x537   :  { %v1576_v34 = vsel %vm1560_vm14, %v5127_v63, %v3344_v61  ;;  %v1575_v25 = vsel %vm1560_vm14, %v5128_v16, %v3343_v15  ;;  %v1350_v1 = vsel %vm1334_vm13, %v5129_v13, %v3354_v29  ;;  %v1349_v55 = vsel %vm1334_vm13, %v5130_v45, %v3353_v12  ;;  %2229 = vmax.xlane.f32.xlu1 %v2228_v44  ;;  %v1909_v7 = vld [vmem:[#allocation9 + $0x20] sm:$0xff]  ;;  %v1910_v50 = vld [vmem:[#allocation9 + $0x28] sm:$0xff]  ;;  %v1912_v32 = vld [vmem:[#allocation9 + $0x38] sm:$0xff] }
 0x538   :  { %v3347_v23 = vpop.permute.xlu0 %3346  ;;  %2937 = vmatprep.subr.bf16.mxu1 %v5106_v43  ;;  %2961 = vmatprep.subr.bf16.mxu0 %v5106_v43  ;;  %v2938_v14 = vpack.c.bf16 %v1350_v1, %v1349_v55  ;;  %v2962_v38 = vpack.c.bf16 %v1576_v34, %v1575_v25  ;;  %v1911_v8 = vld [vmem:[#allocation9 + $0x30] sm:$0xff]  ;;  %v1981_v5 = vld [vmem:[#allocation9 + $0x40] sm:$0xff]  ;;  %v1982_v52 = vld [vmem:[#allocation9 + $0x48] sm:$0xff] }
 0x539   :  { %v3349_v24 = vunpack.i.h.bf16 %v3347_v23  ;;  %v3348_v58 = vunpack.i.l.bf16 %v3347_v23  ;;  %2216 = vmax.xlane.f32.xlu0 %v2215_v0 }
 0x53a   :  { %2939 = vmatpush1.bf16.msra.mxu1 %v2938_v14  ;;  %2963 = vmatpush1.bf16.msra.mxu0 %v2962_v38 }
 0x53b   :  { %v1578_v39 = vsel %vm1560_vm14, %v3259_v28, %v3349_v24  ;;  %v1577_v19 = vsel %vm1560_vm14, %v5131_v36, %v3348_v58  ;;  %2242 = vmax.xlane.f32.xlu1 %v2241_v10  ;;  %1403 = vmatprep.subr.mxu1 %v5132_v17  ;;  %v5133_v28 = vunpack.i.h.bf16 %v4335_v59  ;;  %v2244_v59 = vsel %vm2234_vm3, %v4180_v42, -inf  ;;  %v1583_v42 = vld [vmem:[#allocation8 + $0x90] sm:$0xff] }
 0x53c   :  { %v3357_v30 = vpop.permute.xlu0 %3356  ;;  %2964 = vmatprep.subr.bf16.mxu0 %v5106_v43  ;;  %v2965_v37 = vpack.c.bf16 %v1578_v39, %v1577_v19 }
 0x53d   :  { %v3359_v18 = vunpack.i.h.bf16 %v3357_v30  ;;  %v3358_v41 = vunpack.i.l.bf16 %v3357_v30  ;;  %1779 = vmax.xlane.f32.xlu0 %v1778_v56 }
 0x53e   :  { %2597 = vmatpush1.msk.msra.mxu1 %vm143_vm4, %v5103_v47  ;;  %2966 = vmatpush1.bf16.msra.mxu0 %v2965_v37 }
 0x53f   :  { %v1580_v9 = vsel %vm1560_vm14, %v5133_v28, %v3359_v18  ;;  %v1579_v11 = vsel %vm1560_vm14, %v5134_v60, %v3358_v41  ;;  %2232 = vmax.xlane.f32.xlu1 %v2231_v4  ;;  %1436 = vmatmul.mubr.f32.vlgmr.msra.gmra.mrb[20].mxu1 %v1351_v27 }
 0x540   :  { %2967 = vmatprep.subr.bf16.mxu0 %v5106_v43  ;;  %2599 = vmatprep.mubr.msk.f32.mxu1 %vm757_vm11, %v1354_v21  ;;  %v2968_v57 = vpack.c.bf16 %v1580_v9, %v1579_v11  ;;  %v1355_v43 = vld [vmem:[#allocation8 + $0x60] sm:$0xff] }
 0x541   :  { %2219 = vmax.xlane.f32.xlu0 %v2218_v46 }
 0x542   :  { %2969 = vmatpush1.bf16.msra.mxu0 %v2968_v57 }
 0x543   :  { %1782 = vmax.xlane.f32.xlu1 %v1781_v35  ;;  %1441 = vmatmul.mubr.f32.gmra.mrb[22].mxu1 %v1353_v49 }
 0x544   :  { %2600 = vmatprep.mubr.msk.f32.mxu1 %vm757_vm11, %v1356_v31  ;;  %1641 = vmatprep.subr.mxu0 %v5132_v17 }
 0x545   :  { %2245 = vmax.xlane.f32.xlu0 %v2244_v59 }
 0x546   :  { %2602 = vmatpush1.msk.msra.mxu0 %vm143_vm4, %v5103_v47  ;;  %v1836_v47 = vld [vmem:[#allocation9] sm:$0xff] }
 0x547   :  { %1446 = vmatmul.mubr.f32.gmra.mrb[24].mxu1 %v1355_v43  ;;  %1666 = vmatmul.mubr.f32.vlgmr.msra.gmra.mrb[16].mxu0 %v1581_v20 }
 0x548   :  { %2601 = vmatprep.mubr.msk.f32.mxu1 %vm757_vm11, %v1358_v6  ;;  %2604 = vmatprep.mubr.msk.f32.mxu0 %vm257_vm8, %v1584_v2 }
 0x54b   :  { %1451 = vmatmul.mubr.f32.gmra.mrb[26].mxu1 %v1357_v3  ;;  %1671 = vmatmul.mubr.f32.gmra.mrb[18].mxu0 %v1583_v42 }
 0x54c   :  { %2605 = vmatprep.mubr.msk.f32.mxu0 %vm257_vm8, %v1586_v26 }
 0x54f   :  { %1676 = vmatmul.mubr.f32.gmra.mrb[20].mxu0 %v1585_v33 }
 0x550   :  { %2606 = vmatprep.mubr.msk.f32.mxu0 %vm257_vm8, %v1588_v51  ;;  %vm2280_vm8 = vcmask 326816  }
 0x553   :  { %1681 = vmatmul.mubr.f32.gmra.mrb[22].mxu0 %v1587_v40 }
 0x554   :  { %1842 = vperm.xlu1 %3360, %v1836_v47  }
 0x558   :  { %1852 = vperm.xlu1 %3360, %v1838_v62  }
 0x55b   :  { %1847 = vperm.xlu0 %3361, %v1837_v22  }
 0x55c   :  { %1857 = vperm.xlu1 %3360, %v1839_v53  }
 0x55f   :  { %1915 = vperm.xlu0 %3361, %v1909_v7  }
 0x560   :  { %1920 = vperm.xlu1 %3360, %v1910_v50  }
 0x563   :  { %1930 = vperm.xlu0 %3361, %v1912_v32  }
 0x564   :  { %1925 = vperm.xlu1 %3360, %v1911_v8  }
 0x568   :  { %1987 = vperm.xlu1 %3360, %v1981_v5  }
 0x56c   :  { %1992 = vperm.xlu1 %3360, %v1982_v52  }
 0x573   :  { %v4598_v48 = vpop.xlane.xlu1 %1704 }
 0x576   :  { %v4604_v15 = vpop.xlane.xlu0 %1707 }
 0x577   :  { %v4600_v54 = vpop.xlane.xlu1 %1713 }
 0x57a   :  { %v4608_v12 = vpop.xlane.xlu0 %1710 }
 0x57b   :  { %v4602_v61 = vpop.xlane.xlu1 %1719 }
 0x57e   :  { %v4612_v63 = vpop.xlane.xlu0 %1716 }
 0x57f   :  { %v4606_v29 = vpop.xlane.xlu1 %1725 }
 0x582   :  { %v4616_v16 = vpop.xlane.xlu0 %1722 }
 0x583   :  { %v4610_v44 = vpop.xlane.xlu1 %1731 }
 0x586   :  { %v4620_v13 = vpop.xlane.xlu0 %1728 }
 0x587   :  { %v4614_v34 = vpop.xlane.xlu1 %1737 }
 0x58a   :  { %v4624_v45 = vpop.xlane.xlu0 %1734 }
 0x58b   :  { %v4618_v25 = vpop.xlane.xlu1 %1752 }
 0x58e   :  { %v4628_v23 = vpop.xlane.xlu0 %1749 }
 0x58f   :  { %v4622_v1 = vpop.xlane.xlu1 %1758 }
 0x592   :  { %v4632_v14 = vpop.xlane.xlu0 %1755 }
 0x593   :  { %v4626_v55 = vpop.xlane.xlu1 %1764 }
 0x596   :  { %v4636_v24 = vpop.xlane.xlu0 %1761 }
 0x597   :  { %v4630_v0 = vpop.xlane.xlu1 %1770 }
 0x59a   :  { %v4640_v10 = vpop.xlane.xlu0 %1767 }
 0x59b   :  { %v4634_v38 = vpop.xlane.xlu1 %1776 }
 0x59e   :  { %v4644_v36 = vpop.xlane.xlu0 %1773 }
 0x59f   :  { %v4638_v58 = vpop.xlane.xlu1 %2167 }
 0x5a2   :  { %v4648_v17 = vpop.xlane.xlu0 %2164 }
 0x5a3   :  { %v4642_v39 = vpop.xlane.xlu1 %2180 }
 0x5a6   :  { %v4652_v56 = vpop.xlane.xlu0 %2177 }
 0x5a7   :  { %v4646_v19 = vpop.xlane.xlu1 %2193 }
 0x5aa   :  { %v4656_v41 = vpop.xlane.xlu0 %2190 }
 0x5ab   :  { %v4650_v30 = vpop.xlane.xlu1 %2183 }
 0x5ae   :  { %v4662_v57 = vpop.xlane.xlu0 %2170 }
 0x5af   :  { %v4654_v37 = vpop.xlane.xlu1 %2173 }
 0x5b0   :  { %5135 = vst [vmem:[#allocation19_spill] sm:$0xff] %v4654_v37 }
 0x5b2   :  { %v4668_v43 = vpop.xlane.xlu0 %2196 }
 0x5b3   :  { %v4658_v28 = vpop.xlane.xlu1 %2199 }
 0x5b4   :  { %5136 = vst [vmem:[#allocation20_spill] sm:$0xff] %v4658_v28 }
 0x5b6   :  { %v4674_v42 = vpop.xlane.xlu0 %2186 }
 0x5b8   :  { %v4665_v31 = vpop.xlane.xlu1 %2213 }
 0x5ba   :  { %v4679_v51 = vpop.xlane.xlu0 %2210 }
 0x5bc   :  { %v4671_v6 = vpop.xlane.xlu1 %2226 }
 0x5be   :  { %v4684_v62 = vpop.xlane.xlu0 %2223 }
 0x5c0   :  { %v4676_v26 = vpop.xlane.xlu1 %2239 }
 0x5c2   :  { %v4688_v53 = vpop.xlane.xlu0 %2236 }
 0x5c4   :  { %v4682_v47 = vpop.xlane.xlu1 %2229 }
 0x5c6   :  { %v4692_v50 = vpop.xlane.xlu0 %2216 }
 0x5c8   :  { %v4686_v22 = vpop.xlane.xlu1 %2242 }
 0x5ca   :  { %v4696_v8 = vpop.xlane.xlu0 %1779 }
 0x5cc   :  { %v4690_v7 = vpop.xlane.xlu1 %2232 }
 0x5ce   :  { %v4700_v52 = vpop.xlane.xlu0 %2219 }
 0x5d0   :  { %v4694_v32 = vpop.xlane.xlu1 %1782 }
 0x5d4   :  { %v4698_v5 = vpop.permute.xlu1 %1842 }
 0x5da   :  { %v2778_v27 = vpop.f32.mrb[12].mxu0 }
 0x5db   :  { %v1235_v18 = vpop.f32.mrb[13].mxu0  ;;  %v1255_v21 = vmax.f32 %v2778_v27, 0.0 }
 0x5dc   :  { %v1254_v4 = vmax.f32 %v1235_v18, 0.0  ;;  %v4702_v18 = vpop.permute.xlu1 %1852 }
 0x5dd   :  { %v2258_v9 = vsel %vm2221_vm2, %v1255_v21, -inf  ;;  %v1795_v49 = vsel %vm732_vm10, %v1255_v21, -inf }
 0x5de   :  { %v2781_v60 = vpop.f32.mrb[14].mxu0  ;;  %2259 = vmax.xlane.f32.xlu0 %v2258_v9  ;;  %v1792_v46 = vsel %vm732_vm10, %v1254_v4, -inf  ;;  %1796 = vmax.xlane.f32.xlu1 %v1795_v49  ;;  %v2255_v59 = vsel %vm2221_vm2, %v1254_v4, -inf  ;;  %v4705_v49 = vpop.xlane.xlu0 %2245 }
 0x5df   :  { %v1245_v11 = vpop.f32.mrb[15].mxu0  ;;  %v1257_v35 = vmax.f32 %v2781_v60, 0.0 }
 0x5e0   :  { %v1256_v2 = vmax.f32 %v1245_v11, 0.0 }
 0x5e1   :  { %v1801_v20 = vsel %vm732_vm10, %v1257_v35, -inf  ;;  %v2264_v3 = vsel %vm2221_vm2, %v1257_v35, -inf  ;;  %v4707_v35 = vpop.permute.xlu1 %1857 }
 0x5e2   :  { %1793 = vmax.xlane.f32.xlu0 %v1792_v46  ;;  %v1798_v33 = vsel %vm732_vm10, %v1256_v2, -inf  ;;  %v2261_v40 = vsel %vm2221_vm2, %v1256_v2, -inf  ;;  %vm2542_vm10 = vcmask 9216  }
 0x5e6   :  { %2256 = vmax.xlane.f32.xlu0 %v2255_v59 }
 0x5ea   :  { %1802 = vmax.xlane.f32.xlu0 %v1801_v20 }
 0x5ee   :  { %2265 = vmax.xlane.f32.xlu0 %v2264_v3 }
 0x5f2   :  { %1799 = vmax.xlane.f32.xlu0 %v1798_v33 }
 0x5f6   :  { %2262 = vmax.xlane.f32.xlu0 %v2261_v40 }
 0x612   :  { %v1437_v27 = vpop.f32.mrb[20].mxu1 }
 0x613   :  { %v1456_v21 = vmax.f32 %v1437_v27, 0.0  ;;  %v1439_v4 = vpop.f32.mrb[21].mxu1 }
 0x614   :  { %v4711_v4 = vpop.permute.xlu0 %1847 }
 0x615   :  { %v1804_v9 = vsel %vm1334_vm13, %v1456_v21, -inf  ;;  %v2268_v59 = vsel %vm2267_vm5, %v1456_v21, -inf }
 0x616   :  { %1805 = vmax.xlane.f32.xlu0 %v1804_v9  ;;  %v1442_v60 = vpop.f32.mrb[22].mxu1 }
 0x617   :  { %v1457_v11 = vmax.f32 %v1442_v60, 0.0  ;;  %v1444_v46 = vpop.f32.mrb[23].mxu1 }
 0x619   :  { %v1807_v40 = vsel %vm1334_vm13, %v1457_v11, -inf }
 0x61a   :  { %v1447_v20 = vpop.f32.mrb[24].mxu1  ;;  %2269 = vmax.xlane.f32.xlu0 %v2268_v59  ;;  %v1667_v2 = vpop.f32.mrb[16].mxu0 }
 0x61b   :  { %v1458_v3 = vmax.f32 %v1447_v20, 0.0  ;;  %v1449_v33 = vpop.f32.mrb[25].mxu1  ;;  %v1669_v27 = vpop.f32.mrb[17].mxu0  ;;  %v1740_v20 = vsel %vm757_vm11, %v4604_v15, %v4602_v61  ;;  %v1686_v15 = vmax.f32 %v1667_v2, 0.0 }
 0x61c   :  { %v4722_v33 = vsel %vm1743_vm6, %v1740_v20, %v4610_v44  ;;  %v1921_v27 = vpop.permute.xlu1 %1920 }
 0x61d   :  { %v1810_v9 = vsel %vm1334_vm13, %v1458_v3, -inf  ;;  %v2274_v59 = vsel %vm2267_vm5, %v1458_v3, -inf }
 0x61e   :  { %1811 = vmax.xlane.f32.xlu1 %v1810_v9  ;;  %1808 = vmax.xlane.f32.xlu0 %v1807_v40  ;;  %v1452_v60 = vpop.f32.mrb[26].mxu1  ;;  %v4714_v46 = vpop.f32.mrb[18].mxu0  ;;  %v2271_v9 = vsel %vm2267_vm5, %v1457_v11, -inf  ;;  %v1739_v40 = vsel %vm757_vm11, %v4598_v48, %v4612_v63  ;;  %v1742_v48 = vsel %vm757_vm11, %v4600_v54, %v4606_v29  ;;  %v1784_v54 = vsel %vm757_vm11, %v4628_v23, %v4636_v24 }
 0x61f   :  { %v1459_v28 = vmax.f32 %v1452_v60, 0.0  ;;  %v1454_v21 = vpop.f32.mrb[27].mxu1  ;;  %v1674_v37 = vpop.f32.mrb[19].mxu0  ;;  %v1861_v60 = vmul.f32 %v4711_v4, %v4722_v33  ;;  %v4734_v61 = vsel %vm1743_vm6, %v1739_v40, %v4620_v13  ;;  %v1741_v13 = vsel %vm757_vm11, %v4608_v12, %v4616_v16 }
 0x620   :  { %v1860_v63 = vmul.f32 %v4698_v5, %v4734_v61  ;;  %v4748_v2 = vsel %vm1743_vm6, %v1742_v48, %v4614_v34  ;;  %v1916_v29 = vpop.permute.xlu0 %1915  ;;  %v4758_v21 = vsel %vm1743_vm6, %v1741_v13, %v4624_v45  ;;  %v4766_v34 = vsel %vm1743_vm6, %v1784_v54, %v4644_v36  ;;  %v1926_v23 = vpop.permute.xlu1 %1925 }
 0x621   :  { %v2277_v44 = vsel %vm2267_vm5, %v1459_v28, -inf  ;;  %v1813_v11 = vsel %vm1334_vm13, %v1459_v28, -inf  ;;  %v1785_v28 = vsel %vm757_vm11, %v4618_v25, %v4626_v55  ;;  %v1866_v16 = vsel %vm1864_vm7, %v1861_v60, 0.0 }
 0x622   :  { %2275 = vmax.xlane.f32.xlu1 %v2274_v59  ;;  %2272 = vmax.xlane.f32.xlu0 %v2271_v9  ;;  %v4730_v37 = vpop.f32.mrb[20].mxu0  ;;  %v4762_v12 = vsel %vm1743_vm6, %v1785_v28, %v4634_v38  ;;  %v1862_v55 = vmul.f32 %v4702_v18, %v4758_v21  ;;  %v1687_v45 = vmax.f32 %v4714_v46, 0.0  ;;  %v2281_v24 = vsel %vm2280_vm8, %v1686_v15, -inf }
 0x623   :  { %v1679_v3 = vpop.f32.mrb[21].mxu0  ;;  %v1816_v38 = vsel %vm1560_vm14, %v1686_v15, -inf  ;;  %v1786_v36 = vsel %vm757_vm11, %v4632_v14, %v4640_v10  ;;  %v1865_v20 = vsel %vm1864_vm7, %v1860_v63, 0.0  ;;  %v1933_v9 = vmul.f32 %v1916_v29, %v4766_v34 }
 0x624   :  { %v1934_v40 = vmul.f32 %v1921_v27, %v4762_v12  ;;  %v2248_v60 = vsel %vm757_vm11, %v4665_v31, %v4671_v6  ;;  %v2247_v46 = vsel %vm757_vm11, %v4679_v51, %v4684_v62  ;;  %v4790_v15 = vsel %vm1743_vm6, %v1786_v36, %v4696_v8  ;;  %v1931_v48 = vpop.permute.xlu0 %1930 }
 0x625   :  { %v4794_v14 = vsel %vm1743_vm6, %v2248_v60, %v4676_v26  ;;  %v2249_v10 = vsel %vm757_vm11, %v4692_v50, %v4682_v47  ;;  %v4802_v31 = vsel %vm1743_vm6, %v2247_v46, %v4688_v53  ;;  %v1868_v6 = vsel %vm1864_vm7, %v1862_v55, 0.0 }
 0x626   :  { %2278 = vmax.xlane.f32.xlu1 %v2277_v44  ;;  %1814 = vmax.xlane.f32.xlu0 %v1813_v11  ;;  %v4769_v25 = vpop.f32.mrb[22].mxu0  ;;  %v1867_v44 = vadd.f32 %v1866_v16, %v1865_v20  ;;  %v1935_v11 = vmul.f32 %v1926_v23, %v4790_v15  ;;  %v1863_v51 = vmul.f32 %v4707_v35, %v4748_v2  ;;  %v1819_v26 = vsel %vm1560_vm14, %v1687_v45, -inf }
 0x627   :  { %v1684_v59 = vpop.f32.mrb[23].mxu0  ;;  %v1937_v62 = vsel %vm1864_vm7, %v1933_v9, 0.0  ;;  %v2347_v8 = vmul.f32 %v4802_v31, %v1916_v29  ;;  %v1938_v47 = vsel %vm1864_vm7, %v1934_v40, 0.0  ;;  %v2348_v50 = vmul.f32 %v4794_v14, %v1921_v27 }
 0x628   :  { %v4814_v3 = vsel %vm1743_vm6, %v2249_v10, %v4686_v22  ;;  %v1869_v53 = vadd.f32 %v1868_v6, %v1867_v44  ;;  %v1787_v63 = vsel %vm757_vm11, %v4622_v1, %v4630_v0  ;;  %v1940_v13 = vsel %vm1864_vm7, %v1935_v11, 0.0  ;;  %v1983_v11 = vld [vmem:[#allocation9 + $0x50] sm:$0xff] }
 0x629   :  { %v2349_v28 = vmul.f32 %v4814_v3, %v1926_v23  ;;  %v4823_v54 = vsel %vm1743_vm6, %v1787_v63, %v4694_v32  ;;  %v1939_v27 = vadd.f32 %v1938_v47, %v1937_v62  ;;  %v1688_v29 = vmax.f32 %v4730_v37, 0.0 }
 0x62a   :  { %2282 = vmax.xlane.f32.xlu1 %v2281_v24  ;;  %1817 = vmax.xlane.f32.xlu0 %v1816_v38  ;;  %v1870_v22 = vsel %vm1864_vm7, %v1863_v51, 0.0  ;;  %v2351_v16 = vsel %vm1864_vm7, %v2347_v8, 0.0  ;;  %v2352_v55 = vsel %vm1864_vm7, %v2348_v50, 0.0  ;;  %v1936_v1 = vmul.f32 %v1931_v48, %v4823_v54 }
 0x62b   :  { %v1871_v0 = vadd.f32 %v1870_v22, %v1869_v53  ;;  %v1941_v24 = vadd.f32 %v1940_v13, %v1939_v27  ;;  %v2284_v23 = vsel %vm2280_vm8, %v1687_v45, -inf  ;;  %v2250_v32 = vsel %vm757_vm11, %v4700_v52, %v4690_v7 }
 0x62c   :  { %v2354_v38 = vsel %vm1864_vm7, %v2349_v28, 0.0  ;;  %v4837_v37 = vsel %vm1743_vm6, %v2250_v32, %v4705_v49  ;;  %v2353_v59 = vadd.f32 %v2352_v55, %v2351_v16  ;;  %v1822_v36 = vsel %vm1560_vm14, %v1688_v29, -inf }
 0x62d   :  { %v1942_v20 = vsel %vm1864_vm7, %v1936_v1, 0.0  ;;  %v2350_v9 = vmul.f32 %v4837_v37, %v1931_v48  ;;  %v1872_v40 = vrot.slane %v1871_v0, 4  ;;  %v2202_v7 = vsel %vm757_vm11, %v4638_v58, %v4642_v39 }
 0x62e   :  { %1820 = vmax.xlane.f32.xlu0 %v1819_v26  ;;  %v1943_v45 = vadd.f32 %v1942_v20, %v1941_v24  ;;  %v2355_v60 = vadd.f32 %v2354_v38, %v2353_v59  ;;  %v4847_v52 = vsel %vm1743_vm6, %v2202_v7, %v4646_v19  ;;  %v1689_v49 = vmax.f32 %v4769_v25, 0.0  ;;  %v1984_v7 = vld [vmem:[#allocation9 + $0x58] sm:$0xff] }
 0x62f   :  { %v2201_v46 = vsel %vm757_vm11, %v4648_v17, %v4652_v56  ;;  %v2302_v44 = vmul.f32 %v4847_v52, %v4711_v4  ;;  %v2356_v10 = vsel %vm1864_vm7, %v2350_v9, 0.0  ;;  %v1873_v6 = vadd.f32 %v1872_v40, %v1871_v0 }
 0x630   :  { %v1944_v51 = vrot.slane %v1943_v45, 4  ;;  %v2357_v58 = vadd.f32 %v2356_v10, %v2355_v60  ;;  %v2287_v39 = vsel %vm2280_vm8, %v1688_v29, -inf  ;;  %v4859_v19 = vsel %vm1743_vm6, %v2201_v46, %v4656_v41 }
 0x631   :  { %v2301_v25 = vmul.f32 %v4859_v19, %v4698_v5  ;;  %v1825_v17 = vsel %vm1560_vm14, %v1689_v49, -inf  ;;  %v2306_v56 = vsel %vm1864_vm7, %v2302_v44, 0.0  ;;  %v1874_v4 = vrot.slane %v1873_v6, 2  ;;  %v5137_v5 = vld [vmem:[#allocation19_spill] sm:$0xff] }
 0x632   :  { %2285 = vmax.xlane.f32.xlu0 %v2284_v23  ;;  %v1945_v26 = vadd.f32 %v1944_v51, %v1943_v45  ;;  %v2358_v62 = vrot.slane %v2357_v58, 4  ;;  %v2203_v8 = vsel %vm757_vm11, %v4662_v57, %v4650_v30  ;;  %v2204_v50 = vsel %vm757_vm11, %v5137_v5, %v4674_v42  ;;  %v5138_v57 = vld [vmem:[#allocation20_spill] sm:$0xff] }
 0x633   :  { %v4870_v41 = vsel %vm1743_vm6, %v2203_v8, %v4668_v43  ;;  %v2305_v47 = vsel %vm1864_vm7, %v2301_v25, 0.0  ;;  %v1875_v63 = vadd.f32 %v1874_v4, %v1873_v6  ;;  %v2290_v30 = vsel %vm2280_vm8, %v1689_v49, -inf }
 0x634   :  { %v2303_v53 = vmul.f32 %v4870_v41, %v4702_v18  ;;  %v2307_v48 = vadd.f32 %v2306_v56, %v2305_v47  ;;  %v1946_v13 = vrot.slane %v1945_v26, 2  ;;  %v2359_v28 = vadd.f32 %v2358_v62, %v2357_v58 }
 0x635   :  { %v4883_v43 = vsel %vm1743_vm6, %v2204_v50, %v5138_v57  ;;  %v1876_v18 = vrot.slane %v1875_v63, 1  ;;  %v1879_v32 = vstv %s4879_s0  ;;  %v1951_v9 = vstv %s2607_s26 }
 0x636   :  { %1823 = vmax.xlane.f32.xlu0 %v1822_v36  ;;  %v2308_v27 = vsel %vm1864_vm7, %v2303_v53, 0.0  ;;  %v2304_v42 = vmul.f32 %v4883_v43, %v4707_v35  ;;  %v1947_v22 = vadd.f32 %v1946_v13, %v1945_v26  ;;  %v2360_v16 = vrot.slane %v2359_v28, 2  ;;  %v1988_v13 = vpop.permute.xlu1 %1987 }
 0x637   :  { %v2309_v29 = vadd.f32 %v2308_v27, %v2307_v48  ;;  %v1877_v1 = vadd.f32 %v1876_v18, %v1875_v63 }
 0x638   :  { %v2310_v55 = vsel %vm1864_vm7, %v2304_v42, 0.0  ;;  %v1948_v24 = vrot.slane %v1947_v22, 1  ;;  %v2361_v23 = vadd.f32 %v2360_v16, %v2359_v28 }
 0x639   :  { %v2311_v0 = vadd.f32 %v2310_v55, %v2309_v29  ;;  %v1880_v38 = vadd.f32 %v1879_v32, %v1877_v1 }
 0x63a   :  { %2288 = vmax.xlane.f32.xlu0 %v2287_v39  ;;  %v1949_v36 = vadd.f32 %v1948_v24, %v1947_v22  ;;  %v2362_v20 = vrot.slane %v2361_v23, 1  ;;  %v1993_v57 = vpop.permute.xlu1 %1992 }
 0x63b   :  { %1997 = vperm.xlu1 %3360, %v1983_v11   ;;  %v2312_v59 = vrot.slane %v2311_v0, 4  ;;  %3362 = vtanh.f32 %v1880_v38 }
 0x63c   :  { %v2363_v45 = vadd.f32 %v2362_v20, %v2361_v23  ;;  %v1952_v35 = vadd.f32 %v1951_v9, %v1949_v36 }
 0x63d   :  { %v2313_v40 = vadd.f32 %v2312_v59, %v2311_v0 }
 0x63e   :  { %1826 = vmax.xlane.f32.xlu0 %v1825_v17  ;;  %3364 = vtanh.f32 %v1952_v35  ;;  %v2364_v49 = vadd.f32 %v2363_v45, %v1951_v9 }
 0x63f   :  { %v2314_v60 = vrot.slane %v2313_v40, 2 }
 0x640   :  { %3366 = vtanh.f32 %v2364_v49 }
 0x641   :  { %v2315_v46 = vadd.f32 %v2314_v60, %v2313_v40 }
 0x642   :  { %2291 = vmax.xlane.f32.xlu0 %v2290_v30 }
 0x643   :  { %v2316_v10 = vrot.slane %v2315_v46, 1 }
 0x645   :  { %v4890_v44 = vpop.eup %3362  ;;  %v2317_v51 = vadd.f32 %v2316_v10, %v2315_v46 }
 0x646   :  { %v1882_v11 = vsel %vm1864_vm7, %v4890_v44, -inf }
 0x647   :  { %v2318_v25 = vadd.f32 %v2317_v51, %v1879_v32 }
 0x648   :  { %v4894_v6 = vpop.eup %3364 }
 0x649   :  { %v1954_v58 = vsel %vm1864_vm7, %v4894_v6, -inf  ;;  %3368 = vtanh.f32 %v2318_v25 }
 0x64a   :  { %v4898_v39 = vpop.eup %3366 }
 0x64b   :  { %v2366_v17 = vsel %vm1864_vm7, %v4898_v39, -inf }
 0x653   :  { %v4902_v56 = vpop.eup %3368 }
 0x654   :  { %v2320_v4 = vsel %vm1864_vm7, %v4902_v56, -inf }
 0x658   :  { %2002 = vperm.xlu0 %3361, %v1984_v7  }
 0x65f   :  { %1883 = vmax.xlane.f32.xlu1 %v1882_v11 }
 0x663   :  { %1955 = vmax.xlane.f32.xlu1 %v1954_v58 }
 0x667   :  { %2367 = vmax.xlane.f32.xlu1 %v2366_v17 }
 0x66b   :  { %v2260_v26 = vpop.xlane.xlu0 %2259  ;;  %v1797_v42 = vpop.xlane.xlu1 %1796 }
 0x66f   :  { %v1794_v62 = vpop.xlane.xlu0 %1793 }
 0x673   :  { %v2257_v8 = vpop.xlane.xlu0 %2256 }
 0x677   :  { %2321 = vmax.xlane.f32.xlu0 %v2320_v4  ;;  %v1803_v47 = vpop.xlane.xlu0 %1802 }
 0x67b   :  { %v2266_v5 = vpop.xlane.xlu0 %2265 }
 0x67f   :  { %v1800_v50 = vpop.xlane.xlu0 %1799 }
 0x683   :  { %v2263_v53 = vpop.xlane.xlu0 %2262 }
 0x6a3   :  { %v1806_v48 = vpop.xlane.xlu0 %1805 }
 0x6a4   :  { %v1828_v9 = vsel %vm757_vm11, %v1794_v62, %v1806_v48 }
 0x6a7   :  { %v2270_v63 = vpop.xlane.xlu0 %2269 }
 0x6a8   :  { %v2293_v40 = vsel %vm757_vm11, %v2257_v8, %v2270_v63 }
 0x6ab   :  { %v1809_v28 = vpop.xlane.xlu0 %1808  ;;  %v1812_v29 = vpop.xlane.xlu1 %1811 }
 0x6ac   :  { %v1829_v32 = vsel %vm757_vm11, %v1797_v42, %v1809_v28  ;;  %v1830_v45 = vsel %vm757_vm11, %v1800_v50, %v1812_v29 }
 0x6af   :  { %v2273_v30 = vpop.xlane.xlu0 %2272  ;;  %v2276_v16 = vpop.xlane.xlu1 %2275 }
 0x6b0   :  { %v2294_v38 = vsel %vm757_vm11, %v2260_v26, %v2273_v30  ;;  %v2295_v35 = vsel %vm757_vm11, %v2263_v53, %v2276_v16 }
 0x6b3   :  { %v1815_v27 = vpop.xlane.xlu0 %1814  ;;  %v2279_v0 = vpop.xlane.xlu1 %2278 }
 0x6b4   :  { %v2296_v50 = vsel %vm757_vm11, %v2266_v5, %v2279_v0  ;;  %v1831_v53 = vsel %vm757_vm11, %v1803_v47, %v1815_v27 }
 0x6b7   :  { %v1818_v18 = vpop.xlane.xlu0 %1817  ;;  %v2283_v23 = vpop.xlane.xlu1 %2282 }
 0x6b8   :  { %v4919_v60 = vsel %vm1743_vm6, %v2293_v40, %v2283_v23  ;;  %v4922_v7 = vsel %vm1743_vm6, %v1828_v9, %v1818_v18 }
 0x6b9   :  { %v2393_v58 = vmul.f32 %v4919_v60, %v1988_v13  ;;  %v2005_v25 = vmul.f32 %v1988_v13, %v4922_v7 }
 0x6bb   :  { %v1821_v22 = vpop.xlane.xlu0 %1820  ;;  %v1998_v51 = vpop.permute.xlu1 %1997  ;;  %v2397_v48 = vsel %vm1864_vm7, %v2393_v58, 0.0  ;;  %v2009_v63 = vsel %vm1864_vm7, %v2005_v25, 0.0 }
 0x6bc   :  { %v4909_v59 = vsel %vm1743_vm6, %v1829_v32, %v1821_v22 }
 0x6bd   :  { %v2006_v10 = vmul.f32 %v1993_v57, %v4909_v59 }
 0x6bf   :  { %v2286_v55 = vpop.xlane.xlu0 %2285  ;;  %v2010_v62 = vsel %vm1864_vm7, %v2006_v10, 0.0 }
 0x6c0   :  { %v4912_v36 = vsel %vm1743_vm6, %v2294_v38, %v2286_v55  ;;  %v2011_v30 = vadd.f32 %v2010_v62, %v2009_v63 }
 0x6c1   :  { %v2394_v11 = vmul.f32 %v4912_v36, %v1993_v57 }
 0x6c3   :  { %v1824_v1 = vpop.xlane.xlu0 %1823  ;;  %v2398_v8 = vsel %vm1864_vm7, %v2394_v11, 0.0  ;;  %v2023_v11 = vstv %s2608_s2 }
 0x6c4   :  { %v4925_v49 = vsel %vm1743_vm6, %v1830_v45, %v1824_v1  ;;  %v2399_v57 = vadd.f32 %v2398_v8, %v2397_v48 }
 0x6c5   :  { %v2007_v17 = vmul.f32 %v1998_v51, %v4925_v49 }
 0x6c7   :  { %v2289_v24 = vpop.xlane.xlu0 %2288  ;;  %v2012_v28 = vsel %vm1864_vm7, %v2007_v17, 0.0 }
 0x6c8   :  { %v4928_v46 = vsel %vm1743_vm6, %v2295_v35, %v2289_v24  ;;  %v2013_v27 = vadd.f32 %v2012_v28, %v2011_v30 }
 0x6c9   :  { %v2395_v4 = vmul.f32 %v4928_v46, %v1998_v51 }
 0x6cb   :  { %v1827_v20 = vpop.xlane.xlu0 %1826  ;;  %v2400_v13 = vsel %vm1864_vm7, %v2395_v4, 0.0 }
 0x6cc   :  { %v4945_v42 = vsel %vm1743_vm6, %v1831_v53, %v1827_v20  ;;  %v2401_v22 = vadd.f32 %v2400_v13, %v2399_v57 }
 0x6cf   :  { %v2292_v26 = vpop.xlane.xlu0 %2291 }
 0x6d0   :  { %v4948_v18 = vsel %vm1743_vm6, %v2296_v50, %v2292_v26 }
 0x6d7   :  { %v2003_v29 = vpop.permute.xlu0 %2002 }
 0x6d8   :  { %v2008_v5 = vmul.f32 %v2003_v29, %v4945_v42  ;;  %v2396_v47 = vmul.f32 %v4948_v18, %v2003_v29 }
 0x6da   :  { %v2014_v16 = vsel %vm1864_vm7, %v2008_v5, 0.0  ;;  %v2402_v55 = vsel %vm1864_vm7, %v2396_v47, 0.0 }
 0x6db   :  { %v2015_v1 = vadd.f32 %v2014_v16, %v2013_v27  ;;  %v2403_v0 = vadd.f32 %v2402_v55, %v2401_v22 }
 0x6dd   :  { %v2016_v24 = vrot.slane %v2015_v1, 4  ;;  %v2404_v23 = vrot.slane %v2403_v0, 4 }
 0x6df   :  { %v2017_v32 = vadd.f32 %v2016_v24, %v2015_v1  ;;  %v2405_v38 = vadd.f32 %v2404_v23, %v2403_v0 }
 0x6e1   :  { %v2018_v20 = vrot.slane %v2017_v32, 2  ;;  %v2406_v9 = vrot.slane %v2405_v38, 2 }
 0x6e3   :  { %v2019_v40 = vadd.f32 %v2018_v20, %v2017_v32  ;;  %v2407_v45 = vadd.f32 %v2406_v9, %v2405_v38 }
 0x6e5   :  { %v2020_v35 = vrot.slane %v2019_v40, 1  ;;  %v2408_v10 = vrot.slane %v2407_v45, 1 }
 0x6e7   :  { %v2021_v51 = vadd.f32 %v2020_v35, %v2019_v40  ;;  %v2409_v58 = vadd.f32 %v2408_v10, %v2407_v45 }
 0x6e9   :  { %v2024_v25 = vadd.f32 %v2023_v11, %v2021_v51  ;;  %v2410_v17 = vadd.f32 %v2409_v58, %v2023_v11 }
 0x6eb   :  { %3370 = vtanh.f32 %v2024_v25 }
 0x6ec   :  { %v1884_v4 = vpop.xlane.xlu1 %1883  ;;  %3372 = vtanh.f32 %v2410_v17 }
 0x6ed   :  { %v1885_v26 = vsub.f32 %v4890_v44, %v1884_v4 }
 0x6ef   :  { %v1886_v62 = vmul.f32 1.442695, %v1885_v26 }
 0x6f0   :  { %v1956_v8 = vpop.xlane.xlu1 %1955 }
 0x6f1   :  { %3374 = vpow2.f32 %v1886_v62  ;;  %v1957_v50 = vsub.f32 %v4894_v6, %v1956_v8 }
 0x6f3   :  { %v1958_v53 = vmul.f32 1.442695, %v1957_v50 }
 0x6f4   :  { %v2368_v29 = vpop.xlane.xlu1 %2367 }
 0x6f5   :  { %v3371_v48 = vpop.eup %3370  ;;  %3376 = vpow2.f32 %v1958_v53  ;;  %v2369_v6 = vsub.f32 %v4898_v39, %v2368_v29 }
 0x6f6   :  { %v2026_v63 = vsel %vm1864_vm7, %v3371_v48, -inf  ;;  %v3373_v28 = vpop.eup %3372 }
 0x6f7   :  { %2027 = vmax.xlane.f32.xlu1 %v2026_v63  ;;  %v2412_v13 = vsel %vm1864_vm7, %v3373_v28, -inf  ;;  %v2370_v22 = vmul.f32 1.442695, %v2369_v6 }
 0x6fb   :  { %v3375_v30 = vpop.eup %3374  ;;  %2413 = vmax.xlane.f32.xlu1 %v2412_v13 }
 0x6fc   :  { %v1888_v57 = vsel %vm1864_vm7, %v3375_v30, 0.0 }
 0x6fd   :  { %1889 = vadd.xlane.f32.xlu0 %v1888_v57 }
 0x6ff   :  { %v3377_v44 = vpop.eup %3376 }
 0x700   :  { %v1960_v5 = vsel %vm1864_vm7, %v3377_v44, 0.0 }
 0x701   :  { %1961 = vadd.xlane.f32.xlu0 %v1960_v5 }
 0x704   :  { %v2322_v47 = vpop.xlane.xlu0 %2321 }
 0x705   :  { %v2323_v27 = vsub.f32 %v4902_v56, %v2322_v47 }
 0x707   :  { %v2324_v16 = vmul.f32 1.442695, %v2323_v27 }
 0x709   :  { %3378 = vpow2.f32 %v2324_v16 }
 0x70a   :  { %3380 = vpow2.f32 %v2370_v22 }
 0x713   :  { %v3379_v55 = vpop.eup %3378 }
 0x714   :  { %v2326_v1 = vsel %vm1864_vm7, %v3379_v55, 0.0  ;;  %v3381_v0 = vpop.eup %3380 }
 0x715   :  { %2327 = vadd.xlane.f32.xlu1 %v2326_v1  ;;  %v2372_v24 = vsel %vm1864_vm7, %v3381_v0, 0.0 }
 0x719   :  { %2373 = vadd.xlane.f32.xlu1 %v2372_v24 }
 0x784   :  { %v2028_v23 = vpop.xlane.xlu1 %2027 }
 0x785   :  { %v2029_v32 = vsub.f32 %v3371_v48, %v2028_v23 }
 0x787   :  { %v2030_v38 = vmul.f32 1.442695, %v2029_v32 }
 0x788   :  { %v2414_v51 = vpop.xlane.xlu1 %2413 }
 0x789   :  { %3382 = vpow2.f32 %v2030_v38  ;;  %v2415_v58 = vsub.f32 %v3373_v28, %v2414_v51 }
 0x78a   :  { %v1890_v39 = vpop.xlane.xlu0 %1889 }
 0x78b   :  { %3384 = vrcp.f32 %v1890_v39  ;;  %v2416_v17 = vmul.f32 1.442695, %v2415_v58 }
 0x78e   :  { %v1962_v4 = vpop.xlane.xlu0 %1961 }
 0x793   :  { %v4964_v20 = vpop.eup %3382 }
 0x794   :  { %v2032_v56 = vsel %vm1864_vm7, %v4964_v20, 0.0 }
 0x795   :  { %v3385_v9 = vpop.eup %3384  ;;  %2033 = vadd.xlane.f32.xlu0 %v2032_v56 }
 0x796   :  { %v1892_v40 = vmul.f32 %v3385_v9, %v3375_v30 }
 0x798   :  { %v1894_v45 = vmul.f32 %v1892_v40, %v4722_v33  ;;  %v1893_v35 = vmul.f32 %v1892_v40, %v4734_v61  ;;  %v1895_v63 = vmul.f32 %v1892_v40, %v4758_v21  ;;  %v1896_v13 = vmul.f32 %v1892_v40, %v4748_v2 }
 0x79a   :  { %v1900_v10 = vsel %vm1864_vm7, %v1894_v45, 0.0  ;;  %v1897_v11 = vsel %vm1864_vm7, %v1893_v35, 0.0  ;;  %v1906_v5 = vsel %vm1864_vm7, %v1896_v13, 0.0 }
 0x79b   :  { %1901 = vadd.xlane.f32.xlu1 %v1900_v10  ;;  %1898 = vadd.xlane.f32.xlu0 %v1897_v11 }
 0x7a2   :  { %v2328_v25 = vpop.xlane.xlu1 %2327 }
 0x7a3   :  { %3386 = vrcp.f32 %v2328_v25 }
 0x7a4   :  { %3388 = vpow2.f32 %v2416_v17 }
 0x7a5   :  { %3390 = vrcp.f32 %v1962_v4 }
 0x7a6   :  { %v2374_v26 = vpop.xlane.xlu1 %2373 }
 0x7a7   :  { %3392 = vrcp.f32 %v2374_v26 }
 0x7ad   :  { %v3387_v62 = vpop.eup %3386 }
 0x7ae   :  { %v2330_v33 = vmul.f32 %v3387_v62, %v3379_v55  ;;  %v4974_v50 = vpop.eup %3388 }
 0x7af   :  { %v3391_v28 = vpop.eup %3390  ;;  %v2418_v57 = vsel %vm1864_vm7, %v4974_v50, 0.0 }
 0x7b0   :  { %v2332_v61 = vmul.f32 %v2330_v33, %v4847_v52  ;;  %v2331_v8 = vmul.f32 %v2330_v33, %v4859_v19  ;;  %v1964_v30 = vmul.f32 %v3391_v28, %v3377_v44  ;;  %v1903_v52 = vsel %vm1864_vm7, %v1895_v63, 0.0 }
 0x7b1   :  { %v2333_v19 = vmul.f32 %v2330_v33, %v4870_v41  ;;  %v3393_v29 = vpop.eup %3392  ;;  %v2334_v47 = vmul.f32 %v2330_v33, %v4883_v43 }
 0x7b2   :  { %v2338_v53 = vsel %vm1864_vm7, %v2332_v61, 0.0  ;;  %v2335_v48 = vsel %vm1864_vm7, %v2331_v8, 0.0  ;;  %v2376_v6 = vmul.f32 %v3393_v29, %v3381_v0  ;;  %v1965_v2 = vmul.f32 %v1964_v30, %v4766_v34 }
 0x7b3   :  { %2339 = vadd.xlane.f32.xlu1 %v2338_v53  ;;  %2336 = vadd.xlane.f32.xlu0 %v2335_v48  ;;  %v2341_v21 = vsel %vm1864_vm7, %v2333_v19, 0.0  ;;  %v2344_v44 = vsel %vm1864_vm7, %v2334_v47, 0.0  ;;  %v1966_v22 = vmul.f32 %v1964_v30, %v4762_v12  ;;  %v1967_v34 = vmul.f32 %v1964_v30, %v4790_v15 }
 0x7b4   :  { %v1969_v27 = vsel %vm1864_vm7, %v1965_v2, 0.0  ;;  %v2377_v41 = vmul.f32 %v2376_v6, %v4802_v31  ;;  %v2378_v43 = vmul.f32 %v2376_v6, %v4794_v14  ;;  %v2379_v31 = vmul.f32 %v2376_v6, %v4814_v3  ;;  %v1690_v2 = vld [vmem:[#allocation11] sm:$0xff] }
 0x7b5   :  { %v1972_v55 = vsel %vm1864_vm7, %v1966_v22, 0.0  ;;  %v1975_v0 = vsel %vm1864_vm7, %v1967_v34, 0.0  ;;  %v1968_v12 = vmul.f32 %v1964_v30, %v4823_v54  ;;  %v2380_v14 = vmul.f32 %v2376_v6, %v4837_v37 }
 0x7b6   :  { %v2381_v16 = vsel %vm1864_vm7, %v2377_v41, 0.0  ;;  %v2384_v1 = vsel %vm1864_vm7, %v2378_v43, 0.0  ;;  %v2387_v24 = vsel %vm1864_vm7, %v2379_v31, 0.0 }
 0x7b7   :  { %2419 = vadd.xlane.f32.xlu1 %v2418_v57  ;;  %1904 = vadd.xlane.f32.xlu0 %v1903_v52  ;;  %v1978_v23 = vsel %vm1864_vm7, %v1968_v12, 0.0  ;;  %v2390_v15 = vsel %vm1864_vm7, %v2380_v14, 0.0 }
 0x7bb   :  { %2342 = vadd.xlane.f32.xlu1 %v2341_v21  ;;  %1907 = vadd.xlane.f32.xlu0 %v1906_v5 }
 0x7bf   :  { %2345 = vadd.xlane.f32.xlu1 %v2344_v44  ;;  %1970 = vadd.xlane.f32.xlu0 %v1969_v27  ;;  %v1691_v27 = vld [vmem:[#allocation11 + $0x8] sm:$0xff] }
 0x7c3   :  { %2382 = vadd.xlane.f32.xlu1 %v2381_v16  ;;  %1973 = vadd.xlane.f32.xlu0 %v1972_v55 }
 0x7c7   :  { %2385 = vadd.xlane.f32.xlu1 %v2384_v1  ;;  %1976 = vadd.xlane.f32.xlu0 %v1975_v0 }
 0x7cb   :  { %2388 = vadd.xlane.f32.xlu1 %v2387_v24  ;;  %1979 = vadd.xlane.f32.xlu0 %v1978_v23 }
 0x7cf   :  { %2391 = vadd.xlane.f32.xlu1 %v2390_v15 }
 0x822   :  { %v2034_v32 = vpop.xlane.xlu0 %2033 }
 0x823   :  { %3394 = vrcp.f32 %v2034_v32 }
 0x828   :  { %v1902_v35 = vpop.xlane.xlu1 %1901  ;;  %v1899_v10 = vpop.xlane.xlu0 %1898 }
 0x82d   :  { %v3395_v38 = vpop.eup %3394 }
 0x82e   :  { %v2036_v3 = vmul.f32 %v3395_v38, %v4964_v20 }
 0x830   :  { %v2037_v54 = vmul.f32 %v2036_v3, %v4922_v7  ;;  %v2038_v56 = vmul.f32 %v2036_v3, %v4909_v59  ;;  %v2039_v37 = vmul.f32 %v2036_v3, %v4925_v49  ;;  %v2040_v45 = vmul.f32 %v2036_v3, %v4945_v42  ;;  %v1692_v3 = vld [vmem:[#allocation11 + $0x10] sm:$0xff] }
 0x832   :  { %v2041_v39 = vsel %vm1864_vm7, %v2037_v54, 0.0  ;;  %v2044_v9 = vsel %vm1864_vm7, %v2038_v56, 0.0  ;;  %v2047_v40 = vsel %vm1864_vm7, %v2039_v37, 0.0  ;;  %v2050_v20 = vsel %vm1864_vm7, %v2040_v45, 0.0 }
 0x833   :  { %2042 = vadd.xlane.f32.xlu0 %v2041_v39 }
 0x837   :  { %2045 = vadd.xlane.f32.xlu0 %v2044_v9  ;;  %v1693_v9 = vld [vmem:[#allocation11 + $0x18] sm:$0xff] }
 0x83b   :  { %2048 = vadd.xlane.f32.xlu0 %v2047_v40 }
 0x83f   :  { %2051 = vadd.xlane.f32.xlu0 %v2050_v20 }
 0x840   :  { %v2340_v7 = vpop.xlane.xlu1 %2339  ;;  %v2337_v59 = vpop.xlane.xlu0 %2336 }
 0x844   :  { %v2420_v11 = vpop.xlane.xlu1 %2419  ;;  %v1905_v51 = vpop.xlane.xlu0 %1904 }
 0x845   :  { %3396 = vrcp.f32 %v2420_v11 }
 0x848   :  { %v1908_v17 = vpop.xlane.xlu0 %1907  ;;  %v2343_v53 = vpop.xlane.xlu1 %2342 }
 0x84c   :  { %v1971_v33 = vpop.xlane.xlu0 %1970  ;;  %v2346_v48 = vpop.xlane.xlu1 %2345 }
 0x84f   :  { %v3397_v58 = vpop.eup %3396 }
 0x850   :  { %v2422_v25 = vmul.f32 %v3397_v58, %v4974_v50  ;;  %v1974_v8 = vpop.xlane.xlu0 %1973  ;;  %v2383_v63 = vpop.xlane.xlu1 %2382 }
 0x852   :  { %v2423_v49 = vmul.f32 %v2422_v25, %v4919_v60  ;;  %v2424_v42 = vmul.f32 %v2422_v25, %v4912_v36  ;;  %v2425_v62 = vmul.f32 %v2422_v25, %v4928_v46  ;;  %v2426_v36 = vmul.f32 %v2422_v25, %v4948_v18  ;;  %v1695_v25 = vld [vmem:[#allocation11 + $0x28] sm:$0xff] }
 0x854   :  { %v2427_v4 = vsel %vm1864_vm7, %v2423_v49, 0.0  ;;  %v2430_v26 = vsel %vm1864_vm7, %v2424_v42, 0.0  ;;  %v2433_v61 = vsel %vm1864_vm7, %v2425_v62, 0.0  ;;  %v1977_v60 = vpop.xlane.xlu0 %1976  ;;  %v2436_v46 = vsel %vm1864_vm7, %v2426_v36, 0.0  ;;  %v2386_v28 = vpop.xlane.xlu1 %2385 }
 0x855   :  { %2428 = vadd.xlane.f32.xlu1 %v2427_v4  ;;  %2055 = vperm.xlu0 %3361, %v1899_v10  }
 0x858   :  { %v1980_v50 = vpop.xlane.xlu0 %1979  ;;  %v2389_v13 = vpop.xlane.xlu1 %2388 }
 0x859   :  { %2431 = vadd.xlane.f32.xlu1 %v2430_v26  ;;  %2065 = vperm.xlu0 %3361, %v1905_v51   ;;  %v1696_v26 = vld [vmem:[#allocation11 + $0x30] sm:$0xff] }
 0x85c   :  { %v2392_v30 = vpop.xlane.xlu1 %2391 }
 0x85d   :  { %2434 = vadd.xlane.f32.xlu1 %v2433_v61  ;;  %2070 = vperm.xlu0 %3361, %v1908_v17  }
 0x861   :  { %2075 = vperm.xlu0 %3361, %v1971_v33  }
 0x865   :  { %2080 = vperm.xlu0 %3361, %v1974_v8  }
 0x869   :  { %2085 = vperm.xlu0 %3361, %v1977_v60   ;;  %v1697_v60 = vld [vmem:[#allocation11 + $0x38] sm:$0xff] }
 0x86d   :  { %2090 = vperm.xlu0 %3361, %v1980_v50   ;;  %v1698_v50 = vld [vmem:[#allocation11 + $0x40] sm:$0xff] }
 0x86e   :  { %2060 = vperm.xlu1 %3360, %v1902_v35  }
 0x872   :  { %2441 = vperm.xlu1 %3360, %v2337_v59  }
 0x876   :  { %2446 = vperm.xlu1 %3360, %v2340_v7   ;;  %v1694_v7 = vld [vmem:[#allocation11 + $0x20] sm:$0xff] }
 0x89a   :  { %2437 = vadd.xlane.f32.xlu1 %v2436_v46 }
 0x8ab   :  { %2451 = vperm.xlu1 %3360, %v2343_v53  }
 0x8af   :  { %2456 = vperm.xlu1 %3360, %v2346_v48   ;;  %v1699_v48 = vld [vmem:[#allocation11 + $0x48] sm:$0xff] }
 0x8b3   :  { %2461 = vperm.xlu1 %3360, %v2383_v63  }
 0x8b7   :  { %2466 = vperm.xlu1 %3360, %v2386_v28  }
 0x8bb   :  { %2471 = vperm.xlu1 %3360, %v2389_v13  }
 0x8bf   :  { %2476 = vperm.xlu1 %3360, %v2392_v30  }
 0x8c0   :  { %v2043_v57 = vpop.xlane.xlu0 %2042 }
 0x8c1   :  { %2095 = vperm.xlu0 %3361, %v2043_v57   ;;  %v1700_v57 = vld [vmem:[#allocation11 + $0x50] sm:$0xff] }
 0x8c4   :  { %v2046_v52 = vpop.xlane.xlu0 %2045 }
 0x8c5   :  { %2100 = vperm.xlu0 %3361, %v2046_v52  }
 0x8c8   :  { %v2049_v18 = vpop.xlane.xlu0 %2048 }
 0x8c9   :  { %2105 = vperm.xlu0 %3361, %v2049_v18  }
 0x8cc   :  { %v2052_v19 = vpop.xlane.xlu0 %2051 }
 0x8cd   :  { %2110 = vperm.xlu0 %3361, %v2052_v19   ;;  %v1701_v19 = vld [vmem:[#allocation11 + $0x58] sm:$0xff] }
 0x8d4   :  { %v2056_v1 = vpop.permute.xlu0 %2055 }
 0x8d5   :  { %v2117_v38 = vmul.f32 %v2056_v1, %v1690_v2 }
 0x8d7   :  { %v2130_v39 = vsel %vm1743_vm6, %v2117_v38, 0.0 }
 0x8d8   :  { %v2066_v0 = vpop.permute.xlu0 %2065 }
 0x8d9   :  { %v2119_v56 = vmul.f32 %v2066_v0, %v1692_v3 }
 0x8db   :  { %v2133_v35 = vsel %vm1743_vm6, %v2119_v56, 0.0 }
 0x8dc   :  { %v2071_v31 = vpop.permute.xlu0 %2070 }
 0x8dd   :  { %v2120_v20 = vmul.f32 %v2071_v31, %v1693_v9 }
 0x8df   :  { %v2135_v51 = vsel %vm1743_vm6, %v2120_v20, 0.0 }
 0x8e0   :  { %v2076_v12 = vpop.permute.xlu0 %2075 }
 0x8e1   :  { %v2121_v58 = vmul.f32 %v2076_v12, %v1694_v7 }
 0x8e2   :  { %v2429_v29 = vpop.xlane.xlu1 %2428 }
 0x8e3   :  { %2481 = vperm.xlu1 %3360, %v2429_v29   ;;  %v2137_v4 = vsel %vm1743_vm6, %v2121_v58, 0.0 }
 0x8e4   :  { %v2081_v24 = vpop.permute.xlu0 %2080 }
 0x8e5   :  { %v2122_v42 = vmul.f32 %v2081_v24, %v1695_v25 }
 0x8e6   :  { %v2432_v5 = vpop.xlane.xlu1 %2431 }
 0x8e7   :  { %2486 = vperm.xlu1 %3360, %v2432_v5   ;;  %v2139_v61 = vsel %vm1743_vm6, %v2122_v42, 0.0 }
 0x8e8   :  { %v2086_v15 = vpop.permute.xlu0 %2085 }
 0x8e9   :  { %v2123_v8 = vmul.f32 %v2086_v15, %v1696_v26 }
 0x8ea   :  { %v2435_v6 = vpop.xlane.xlu1 %2434 }
 0x8eb   :  { %2491 = vperm.xlu1 %3360, %v2435_v6   ;;  %v2141_v63 = vsel %vm1743_vm6, %v2123_v8, 0.0 }
 0x8ec   :  { %v2091_v37 = vpop.permute.xlu0 %2090 }
 0x8ed   :  { %v2124_v28 = vmul.f32 %v2091_v37, %v1697_v60 }
 0x8ee   :  { %v2061_v21 = vpop.permute.xlu1 %2060 }
 0x8ef   :  { %v2118_v14 = vmul.f32 %v2061_v21, %v1691_v27  ;;  %v2143_v6 = vsel %vm1743_vm6, %v2124_v28, 0.0 }
 0x8f1   :  { %v2131_v54 = vsel %vm1743_vm6, %v2118_v14, 0.0 }
 0x8f2   :  { %v2442_v47 = vpop.permute.xlu1 %2441  ;;  %v2132_v40 = vadd.f32 %v2131_v54, %v2130_v39 }
 0x8f3   :  { %v2499_v44 = vmul.f32 %v2442_v47, %v1690_v2 }
 0x8f4   :  { %v2134_v10 = vadd.f32 %v2133_v35, %v2132_v40 }
 0x8f5   :  { %v2511_v16 = vsel %vm1743_vm6, %v2499_v44, 0.0 }
 0x8f6   :  { %v2447_v41 = vpop.permute.xlu1 %2446  ;;  %v2136_v49 = vadd.f32 %v2135_v51, %v2134_v10 }
 0x8f7   :  { %v2500_v22 = vmul.f32 %v2447_v41, %v1691_v27 }
 0x8f8   :  { %v2138_v62 = vadd.f32 %v2137_v4, %v2136_v49 }
 0x8f9   :  { %v2512_v55 = vsel %vm1743_vm6, %v2500_v22, 0.0 }
 0x8fa   :  { %v5024_v43 = vadd.f32 %v2512_v55, %v2511_v16  ;;  %v2140_v36 = vadd.f32 %v2139_v61, %v2138_v62 }
 0x8fc   :  { %v2142_v30 = vadd.f32 %v2141_v63, %v2140_v36 }
 0x8fe   :  { %v2144_v44 = vadd.f32 %v2143_v6, %v2142_v30 }
 0x927   :  { %v2438_v34 = vpop.xlane.xlu1 %2437 }
 0x928   :  { %2496 = vperm.xlu1 %3360, %v2438_v34  }
 0x92b   :  { %v2452_v23 = vpop.permute.xlu1 %2451 }
 0x92c   :  { %v2501_v52 = vmul.f32 %v2452_v23, %v1692_v3  ;;  %v1702_v3 = vld [vmem:[#allocation11 + $0x60] sm:$0x1] }
 0x92d   :  { %v2154_v40 = vsel %vm2153_vm9, %v1702_v3, 0.0 }
 0x92e   :  { %v2514_v27 = vsel %vm1743_vm6, %v2501_v52, 0.0 }
 0x92f   :  { %v2457_v32 = vpop.permute.xlu1 %2456  ;;  %v2515_v31 = vadd.f32 %v2514_v27, %v5024_v43 }
 0x930   :  { %v2502_v21 = vmul.f32 %v2457_v32, %v1693_v9 }
 0x932   :  { %v2516_v34 = vsel %vm1743_vm6, %v2502_v21, 0.0 }
 0x933   :  { %v2462_v45 = vpop.permute.xlu1 %2461  ;;  %v2517_v32 = vadd.f32 %v2516_v34, %v2515_v31 }
 0x934   :  { %v2503_v41 = vmul.f32 %v2462_v45, %v1694_v7 }
 0x936   :  { %v2518_v23 = vsel %vm1743_vm6, %v2503_v41, 0.0 }
 0x937   :  { %v2467_v59 = vpop.permute.xlu1 %2466  ;;  %v2519_v56 = vadd.f32 %v2518_v23, %v2517_v32 }
 0x938   :  { %v2504_v1 = vmul.f32 %v2467_v59, %v1695_v25 }
 0x93a   :  { %v2520_v54 = vsel %vm1743_vm6, %v2504_v1, 0.0 }
 0x93b   :  { %v2472_v33 = vpop.permute.xlu1 %2471  ;;  %v2521_v45 = vadd.f32 %v2520_v54, %v2519_v56 }
 0x93c   :  { %v2505_v14 = vmul.f32 %v2472_v33, %v1696_v26 }
 0x93e   :  { %v2522_v37 = vsel %vm1743_vm6, %v2505_v14, 0.0 }
 0x93f   :  { %v2477_v53 = vpop.permute.xlu1 %2476  ;;  %v2523_v10 = vadd.f32 %v2522_v37, %v2521_v45 }
 0x940   :  { %v2096_v11 = vpop.permute.xlu0 %2095  ;;  %v2506_v39 = vmul.f32 %v2477_v53, %v1697_v60 }
 0x941   :  { %v2125_v13 = vmul.f32 %v2096_v11, %v1698_v50 }
 0x942   :  { %v2524_v20 = vsel %vm1743_vm6, %v2506_v39, 0.0 }
 0x943   :  { %v2145_v47 = vsel %vm1743_vm6, %v2125_v13, 0.0  ;;  %v2525_v58 = vadd.f32 %v2524_v20, %v2523_v10 }
 0x944   :  { %v2101_v17 = vpop.permute.xlu0 %2100  ;;  %v2146_v55 = vadd.f32 %v2145_v47, %v2144_v44 }
 0x945   :  { %v2126_v18 = vmul.f32 %v2101_v17, %v1699_v48 }
 0x947   :  { %v2147_v22 = vsel %vm1743_vm6, %v2126_v18, 0.0 }
 0x948   :  { %v2106_v46 = vpop.permute.xlu0 %2105  ;;  %v2148_v12 = vadd.f32 %v2147_v22, %v2146_v55 }
 0x949   :  { %v2127_v2 = vmul.f32 %v2106_v46, %v1700_v57 }
 0x94b   :  { %v2149_v0 = vsel %vm1743_vm6, %v2127_v2, 0.0 }
 0x94c   :  { %v2111_v29 = vpop.permute.xlu0 %2110  ;;  %v2150_v38 = vadd.f32 %v2149_v0, %v2148_v12 }
 0x94d   :  { %v2128_v16 = vmul.f32 %v2111_v29, %v1701_v19 }
 0x94f   :  { %v2151_v15 = vsel %vm1743_vm6, %v2128_v16, 0.0 }
 0x950   :  { %v2152_v9 = vadd.f32 %v2151_v15, %v2150_v38 }
 0x952   :  { %v2155_v11 = vadd.f32 %v2154_v40, %v2152_v9 }
 0x954   :  { %v2156_v49 = vrot.slane %v2155_v11, 4 }
 0x956   :  { %v2157_v33 = vadd.f32 %v2156_v49, %v2155_v11 }
 0x962   :  { %v2482_v5 = vpop.permute.xlu1 %2481 }
 0x963   :  { %v2507_v43 = vmul.f32 %v2482_v5, %v1698_v50  ;;  %v2158_v50 = vrot.slane %v2157_v33, 2 }
 0x965   :  { %v2526_v59 = vsel %vm1743_vm6, %v2507_v43, 0.0 }
 0x966   :  { %v2487_v24 = vpop.permute.xlu1 %2486  ;;  %v2527_v17 = vadd.f32 %v2526_v59, %v2525_v58 }
 0x967   :  { %v2508_v7 = vmul.f32 %v2487_v24, %v1699_v48  ;;  %v2159_v48 = vadd.f32 %v2158_v50, %v2157_v33 }
 0x969   :  { %v2528_v25 = vsel %vm1743_vm6, %v2508_v7, 0.0  ;;  %v2160_v28 = vrot.slane %v2159_v48, 1 }
 0x96a   :  { %v2492_v35 = vpop.permute.xlu1 %2491  ;;  %v2529_v42 = vadd.f32 %v2528_v25, %v2527_v17 }
 0x96b   :  { %v2509_v51 = vmul.f32 %v2492_v35, %v1700_v57  ;;  %v2161_v57 = vadd.f32 %v2160_v28, %v2159_v48 }
 0x96d   :  { %v2530_v4 = vsel %vm1743_vm6, %v2509_v51, 0.0 }
 0x96e   :  { %v2531_v61 = vadd.f32 %v2530_v4, %v2529_v42 }
 0x9a7   :  { %v2497_v26 = vpop.permute.xlu1 %2496 }
 0x9a8   :  { %v2510_v62 = vmul.f32 %v2497_v26, %v1701_v19 }
 0x9aa   :  { %v2532_v8 = vsel %vm1743_vm6, %v2510_v62, 0.0 }
 0x9ab   :  { %v2533_v60 = vadd.f32 %v2532_v8, %v2531_v61 }
 0x9ad   :  { %v2534_v36 = vadd.f32 %v2533_v60, %v2154_v40 }
 0x9af   :  { %v2535_v46 = vrot.slane %v2534_v36, 4 }
 0x9b1   :  { %v2536_v53 = vadd.f32 %v2535_v46, %v2534_v36 }
 0x9b3   :  { %v2537_v63 = vrot.slane %v2536_v53, 2 }
 0x9b5   :  { %v2538_v13 = vadd.f32 %v2537_v63, %v2536_v53 }
 0x9b7   :  { %v2539_v30 = vrot.slane %v2538_v13, 1 }
 0x9b9   :  { %v2540_v52 = vadd.f32 %v2539_v30, %v2538_v13 }
 0x9bb   :  { %v2541_v18 = vsel %vm143_vm4, %v2161_v57, %v2540_v52 }
 0x9bc   :  { %2543 = vst.msk [vmem:[#allocation13] sm:$0x3] %vm2542_vm10, %v2541_v18 }
 0x9bd   :  { %3531 = shalt.err (!%p3528_p7)
}
 0x9be   :  { %s3532_s8 = scalar_lea.hbm %s5069_s7, 32 }
 0x9bf   :  { %p3533_p8 = scmp.ne.s32.totalorder %s5069_s7, %s3532_s8  ;;  %p3536_p9 = scmp.lt.u32.totalorder %s3532_s8, %s5069_s7 }
 0x9c1   :  { %p3538_p10 = pnand %p3536_p9, %p3533_p8 }
 0x9c3   :  { %3541 = shalt.err (!%p3538_p10)
}
 0x9c4   :  { %2553 = dma.vmem_to_hbm [thread:$0]  %s2551_s29, 32, %s5069_s7, [#allocation4]  }
 0x9c5   :  { %3550 = dma.done.wait [#allocation4], 32  }
 0x9c6   :  { %3551 = vsyncadd [#allocation4], 4294967264 }
 0x9c7   :  { %2557 = vsyncpa [#allocation3], 1 }
 0x9c8   :  { %2558 = vsyncpa [#allocation7], 1 }
 0x9c9   :  { %2559 = vsyncpa [#allocation10], 1 }
 0x9ca   :  { %2560 = vsyncpa [#allocation4], 1 }
 0x9cb   :  { %2561 = vsyncpa [#allocation5], 1 }

</bundles_post_ra>
